<compile_context>
chip_gen: v7x
topology: tpu7x:2x2x1
jax: 0.10.0
libtpu: 0.0.40
codegen_flags: <defaults>
</compile_context>

<pallas_src>
import numpy as np
import jax
import jax.numpy as jnp
from jax import lax
from jax.experimental import pallas as pl
from jax.experimental.pallas import tpu as pltpu


def make_kernel(n_layers, vocab, kernel_size, block_b, seq_len, compute_dtype):
    """Build the Pallas kernel body (Bb batch elements per grid step)."""
    K1 = kernel_size
    K2 = kernel_size - 2
    pad1 = (K1 - 1) // 2
    pad2 = (K2 - 1) // 2
    Bb, T = block_b, seq_len
    M = Bb * T  # rows per grid step (batch-major, time-minor)

    # All conv tap offsets needed by either conv (keys of the hoisted masks).
    taps = sorted({k - pad1 for k in range(K1)} | {k - pad2 for k in range(K2)})

    def kernel(*refs):
        tokens_ref, emb_ref = refs[0], refs[1]
        layer_refs = refs[2:2 + 6 * n_layers]
        proj_w_ref, proj_b_ref, out_ref = refs[2 + 6 * n_layers:]

        # ---- Hoisted per-row time index + tap validity masks (review item):
        # built once per grid step, reused by every conv in every layer (JAX
        # does not CSE iota/broadcast, so re-emitting them per tap is filler).
        t_idx = lax.rem(lax.broadcasted_iota(jnp.int32, (M, 1), 0), T)
        tap_mask = {}
        for d in taps:
            if d > 0:
                tap_mask[d] = t_idx < (T - d)
            elif d < 0:
                tap_mask[d] = t_idx >= (-d)

        # ---- Embedding: one-hot (M, V) @ emb (V, E) on the MXU (V is tiny) ----
        tok = tokens_ref[...].reshape(M, 1)                       # (M, 1) int32 (relabel)
        vid = lax.broadcasted_iota(jnp.int32, (M, vocab), 1)      # (M, V)
        onehot = (tok == vid).astype(compute_dtype)
        x = jnp.dot(onehot, emb_ref[...],
                    preferred_element_type=jnp.float32)           # (M, E) f32

        def tap(x, d):
            # out[b*T + t] = x[b*T + (t + d)] if 0 <= t + d < T else 0
            # ("same" zero padding; the mask also prevents cross-batch leakage).
            if d == 0:
                return x.astype(compute_dtype)
            xs = pltpu.roll(x, (-d) % M, 0)                       # f32 sublane roll (XLU)
            return jnp.where(tap_mask[d], xs, 0.0).astype(compute_dtype)

        def conv1d_same(x, K, pad, w_ref, b_ref):
            # im2col: K taps cast to compute_dtype before the concat, then one
            # (M, K*Cin) @ (K*Cin, Cout) MXU dot with f32 accumulation.
            cols = jnp.concatenate([tap(x, k - pad) for k in range(K)], axis=-1)
            y = jnp.dot(cols, w_ref[...], preferred_element_type=jnp.float32)
            return y + b_ref[...]

        for i in range(n_layers):
            w1, b1, w2, b2, g, bln = layer_refs[6 * i: 6 * i + 6]
            x = conv1d_same(x, K1, pad1, w1, b1)                  # Conv1d(kernel)
            x = conv1d_same(x, K2, pad2, w2, b2)                  # Conv1d(kernel - 2)
            x = jnp.maximum(x, 0.0)                               # ReLU
            # Single-pass LayerNorm: var = E[x^2] - mu^2; gamma folded into scale.
            mu = jnp.mean(x, axis=-1, keepdims=True)
            ms = jnp.mean(x * x, axis=-1, keepdims=True)
            inv = lax.rsqrt(ms - mu * mu + 1e-5)                  # EUP slot
            x = (x - mu) * (inv * g[...]) + bln[...]
            # nn.Dropout: identity in eval mode.

        # Final Linear (output_dim == 1): contract the channel (minor) dims of
        # (1, C) x (M, C) -> (1, M).  The result already has time*batch on lanes,
        # so the store is a full-width lane-dense slab (no width-16 masked vst).
        y = lax.dot_general(proj_w_ref[...], x, (((1,), (1,)), ((), ())),
                            preferred_element_type=jnp.float32)   # (1, M)
        y = y + proj_b_ref[...]
        out_ref[...] = y.reshape(1, 1, M).astype(out_ref.dtype)

    return kernel


def cnn_predictor_forward(tokens, params, *, block_b=64, compute_dtype=jnp.bfloat16):
    """Pallas forward. tokens: (B, T) int32 -> (B, T) float32 (output_dim == 1)."""
    n_layers = len(params["layers"])
    vocab, emb_dim = params["emb"].shape
    B, T = tokens.shape
    channels, output_dim = params["proj_w"].shape
    if output_dim != 1:
        raise NotImplementedError("kernel assumes output_dim == 1 (module squeezes last dim)")
    kernel_size = params["layers"][0]["w1"].shape[0]

    # --- Batch-block size: as large as possible (amortize per-step pipeline
    # overhead, tall MXU operands), but keep >=2 grid steps when the batch
    # allows so both v7x TensorCores get work, and keep M = Bb*T >= 128 so the
    # flattened output block stays lane-dense.  T is expected to be a multiple
    # of 8 so the (Bb, T, C) <-> (Bb*T, C) reshapes are cheap sublane relabels.
    min_bb = max(1, -(-128 // T))
    Bb = max(int(block_b), min_bb)
    while Bb > min_bb and -(-B // Bb) < 2:
        Bb = max(min_bb, Bb // 2)
    B_pad = -(-B // Bb) * Bb
    G = B_pad // Bb
    M = Bb * T

    # Pad the batch with the padding token (zero embedding row); outputs discarded.
    tokens_p = jnp.pad(tokens.astype(jnp.int32), ((0, B_pad - B), (0, 0)),
                       constant_values=vocab - 1)
    tokens3 = tokens_p.reshape(B_pad, T, 1)

    def conv_w(w):  # (K, Cin, Cout) -> (K*Cin, Cout): im2col layout, MXU dtype
        K, cin, cout = w.shape
        return w.reshape(K * cin, cout).astype(compute_dtype)

    weight_args = [params["emb"].astype(compute_dtype)]
    for lyr in params["layers"]:
        weight_args += [conv_w(lyr["w1"]), lyr["b1"].astype(jnp.float32),
                        conv_w(lyr["w2"]), lyr["b2"].astype(jnp.float32),
                        lyr["g"].astype(jnp.float32), lyr["b"].astype(jnp.float32)]
    weight_args += [params["proj_w"].T.astype(jnp.float32),          # (1, C)
                    params["proj_b"].reshape(1, 1).astype(jnp.float32)]

    def full_spec(a):
        nd = a.ndim
        return pl.BlockSpec(a.shape, lambda b, _nd=nd: (0,) * _nd)

    in_specs = ([pl.BlockSpec((Bb, T, 1), lambda b: (b, 0, 0))]
                + [full_spec(a) for a in weight_args])
    # Lane-dense flattened output: (G, 1, Bb*T) with block (1, 1, Bb*T)
    # (last two block dims equal the full array dims -> always legal tiling).
    out_spec = pl.BlockSpec((1, 1, M), lambda b: (b, 0, 0))

    # Advisory cost estimate so XLA can schedule/overlap around the call.
    rows = B_pad * T
    macs = vocab * emb_dim + channels * output_dim
    for lyr in params["layers"]:
        macs += int(np.prod(lyr["w1"].shape)) + int(np.prod(lyr["w2"].shape))
    bytes_accessed = int(tokens3.size) * 4 + rows * 4
    bytes_accessed += sum(int(a.size) * int(a.dtype.itemsize) for a in weight_args)
    cost = pl.CostEstimate(flops=2 * rows * macs,
                           transcendentals=rows * n_layers,
                           bytes_accessed=bytes_accessed)

    out = pl.pallas_call(
        make_kernel(n_layers, vocab, kernel_size, Bb, T, compute_dtype),
        out_shape=jax.ShapeDtypeStruct((G, 1, M), jnp.float32),
        grid=(G,),
        in_specs=in_specs,
        out_specs=out_spec,
        compiler_params=pltpu.CompilerParams(
            dimension_semantics=("parallel",),
            vmem_limit_bytes=32 * 1024 * 1024),
        cost_estimate=cost,
    )(tokens3, *weight_args)

    return out.reshape(B_pad, T)[:B]


def init_params(key, n_tokens, emb_dim, channels, kernel, output_dim, n_layers):
    """Deterministic synthetic parameters matching CnnPredictor.__init__ shapes."""
    vocab = n_tokens + 1
    ki = iter(jax.random.split(key, 8 + 6 * n_layers))

    emb = jax.random.normal(next(ki), (vocab, emb_dim), jnp.float32) * 0.1
    emb = emb.at[n_tokens].set(0.0)  # padding_idx row = zeros

    layers = []
    for i in range(n_layers):
        in1 = emb_dim if i == 0 else channels
        out1 = emb_dim if i == 0 else channels
        in2 = out1
        out2 = channels
        w1 = jax.random.normal(next(ki), (kernel, in1, out1), jnp.float32) / np.sqrt(in1 * kernel)
        b1 = jax.random.normal(next(ki), (1, out1), jnp.float32) * 0.01
        w2 = jax.random.normal(next(ki), (kernel - 2, in2, out2), jnp.float32) / np.sqrt(in2 * (kernel - 2))
        b2 = jax.random.normal(next(ki), (1, out2), jnp.float32) * 0.01
        g = jnp.ones((1, channels), jnp.float32)
        bln = jnp.zeros((1, channels), jnp.float32)
        layers.append(dict(w1=w1, b1=b1, w2=w2, b2=b2, g=g, b=bln))

    proj_w = jax.random.normal(next(ki), (channels, output_dim), jnp.float32) / np.sqrt(channels)
    proj_b = jnp.zeros((1, output_dim), jnp.float32)
    return dict(emb=emb, layers=layers, proj_w=proj_w, proj_b=proj_b)


def ref_forward(tokens, params):
    """Pure-JAX reference of CnnPredictor.forward (eval mode)."""
    x = params["emb"][tokens]                                        # (B, T, E)
    B, T, _ = x.shape

    def conv(x, w, b):                                               # w (K, Cin, Cout)
        K = w.shape[0]
        pad = (K - 1) // 2
        xp = jnp.pad(x, ((0, 0), (pad, pad), (0, 0)))
        y = sum(jnp.einsum("bti,io->bto", xp[:, k:k + T, :], w[k]) for k in range(K))
        return y + b[None]

    for lyr in params["layers"]:
        x = conv(x, lyr["w1"], lyr["b1"])
        x = conv(x, lyr["w2"], lyr["b2"])
        x = jnp.maximum(x, 0.0)
        mu = x.mean(-1, keepdims=True)
        var = ((x - mu) ** 2).mean(-1, keepdims=True)
        x = (x - mu) * jax.lax.rsqrt(var + 1e-5) * lyr["g"][None] + lyr["b"][None]

    y = jnp.einsum("btc,co->bto", x, params["proj_w"]) + params["proj_b"][None]
    return y[..., 0]


if __name__ == "__main__":
    n_tokens, emb_dim, channels = 11, 32, 32
    kernel, output_dim, n_layers = 5, 1, 2
    B, T = 12, 16                      # B=12 exercises batch padding + grid of 2 blocks

    key = jax.random.PRNGKey(0)
    kp, kt = jax.random.split(key)
    params = init_params(kp, n_tokens, emb_dim, channels, kernel, output_dim, n_layers)
    # token ids in [0, n_tokens]; index n_tokens is the padding token (zero embedding)
    tokens = jax.random.randint(kt, (B, T), 0, n_tokens + 1, dtype=jnp.int32)

    ref = np.asarray(ref_forward(tokens, params))

    # f32 MXU operands: strict check against the pure-JAX reference.
    out_f32 = jax.block_until_ready(
        cnn_predictor_forward(tokens, params, compute_dtype=jnp.float32))
    assert out_f32.shape == (B, T), out_f32.shape
    if not np.allclose(np.asarray(out_f32), ref, atol=1e-3, rtol=1e-3):
        raise AssertionError("f32 Pallas kernel output does not match JAX reference")

    # bf16 MXU operands (v6e/v7x fast path): loose tolerance covers bf16 operand
    # rounding only — accumulation, LayerNorm and the final projection stay f32.
    out_bf16 = jax.block_until_ready(
        cnn_predictor_forward(tokens, params, compute_dtype=jnp.bfloat16))
    assert out_bf16.shape == (B, T), out_bf16.shape
    if not np.allclose(np.asarray(out_bf16), ref, atol=1e-1, rtol=1e-1):
        raise AssertionError("bf16 Pallas kernel output does not match JAX reference")

    print("KERNEL_OK")
</pallas_src>

<mosaic_0001>
module attributes {stable_mosaic.version = 11 : i64} {
  func.func @kernel(%arg0: i32, %arg1: memref<8x16x1xi32, #tpu.memory_space<vmem>>, %arg2: memref<12x32xf32, #tpu.memory_space<vmem>>, %arg3: memref<160x32xf32, #tpu.memory_space<vmem>>, %arg4: memref<1x32xf32, #tpu.memory_space<vmem>>, %arg5: memref<96x32xf32, #tpu.memory_space<vmem>>, %arg6: memref<1x32xf32, #tpu.memory_space<vmem>>, %arg7: memref<1x32xf32, #tpu.memory_space<vmem>>, %arg8: memref<1x32xf32, #tpu.memory_space<vmem>>, %arg9: memref<160x32xf32, #tpu.memory_space<vmem>>, %arg10: memref<1x32xf32, #tpu.memory_space<vmem>>, %arg11: memref<96x32xf32, #tpu.memory_space<vmem>>, %arg12: memref<1x32xf32, #tpu.memory_space<vmem>>, %arg13: memref<1x32xf32, #tpu.memory_space<vmem>>, %arg14: memref<1x32xf32, #tpu.memory_space<vmem>>, %arg15: memref<1x32xf32, #tpu.memory_space<vmem>>, %arg16: memref<1x1xf32, #tpu.memory_space<vmem>>, %arg17: memref<1x1x128xf32, #tpu.memory_space<vmem>>) attributes {dimension_semantics = [#tpu.dimension_semantics<parallel>], iteration_bounds = array<i64: 2>, scalar_prefetch = 0 : i64, scratch_operands = 0 : i64, tpu.core_type = #tpu.core_type<tc>, window_params = [{transform_indices = @transform_0, window_bounds = array<i64: 8, 16, 1>}, {pipeline_mode = #tpu.pipeline_mode<synchronous>, transform_indices = @transform_1, window_bounds = array<i64: 12, 32>}, {pipeline_mode = #tpu.pipeline_mode<synchronous>, transform_indices = @transform_2, window_bounds = array<i64: 160, 32>}, {pipeline_mode = #tpu.pipeline_mode<synchronous>, transform_indices = @transform_3, window_bounds = array<i64: 1, 32>}, {pipeline_mode = #tpu.pipeline_mode<synchronous>, transform_indices = @transform_4, window_bounds = array<i64: 96, 32>}, {pipeline_mode = #tpu.pipeline_mode<synchronous>, transform_indices = @transform_5, window_bounds = array<i64: 1, 32>}, {pipeline_mode = #tpu.pipeline_mode<synchronous>, transform_indices = @transform_6, window_bounds = array<i64: 1, 32>}, {pipeline_mode = #tpu.pipeline_mode<synchronous>, transform_indices = @transform_7, window_bounds = array<i64: 1, 32>}, {pipeline_mode = #tpu.pipeline_mode<synchronous>, transform_indices = @transform_8, window_bounds = array<i64: 160, 32>}, {pipeline_mode = #tpu.pipeline_mode<synchronous>, transform_indices = @transform_9, window_bounds = array<i64: 1, 32>}, {pipeline_mode = #tpu.pipeline_mode<synchronous>, transform_indices = @transform_10, window_bounds = array<i64: 96, 32>}, {pipeline_mode = #tpu.pipeline_mode<synchronous>, transform_indices = @transform_11, window_bounds = array<i64: 1, 32>}, {pipeline_mode = #tpu.pipeline_mode<synchronous>, transform_indices = @transform_12, window_bounds = array<i64: 1, 32>}, {pipeline_mode = #tpu.pipeline_mode<synchronous>, transform_indices = @transform_13, window_bounds = array<i64: 1, 32>}, {pipeline_mode = #tpu.pipeline_mode<synchronous>, transform_indices = @transform_14, window_bounds = array<i64: 1, 32>}, {pipeline_mode = #tpu.pipeline_mode<synchronous>, transform_indices = @transform_15, window_bounds = array<i64: 1, 1>}, {transform_indices = @transform_16, window_bounds = array<i64: 1, 1, 128>}]} {
    %0 = tpu.iota {dimensions = array<i32: 0>} : vector<128x1xi32>
    %c16_i32 = arith.constant 16 : i32
    %1 = vector.broadcast %c16_i32 : i32 to vector<128x1xi32>
    %2 = arith.remsi %0, %1 : vector<128x1xi32>
    %c2_i32 = arith.constant 2 : i32
    %3 = vector.broadcast %c2_i32 : i32 to vector<128x1xi32>
    %4 = arith.cmpi sge, %2, %3 : vector<128x1xi32>
    %c1_i32 = arith.constant 1 : i32
    %5 = vector.broadcast %c1_i32 : i32 to vector<128x1xi32>
    %6 = arith.cmpi sge, %2, %5 : vector<128x1xi32>
    %c15_i32 = arith.constant 15 : i32
    %7 = vector.broadcast %c15_i32 : i32 to vector<128x1xi32>
    %8 = arith.cmpi slt, %2, %7 : vector<128x1xi32>
    %c14_i32 = arith.constant 14 : i32
    %9 = vector.broadcast %c14_i32 : i32 to vector<128x1xi32>
    %10 = arith.cmpi slt, %2, %9 : vector<128x1xi32>
    %c0 = arith.constant 0 : index
    %c0_0 = arith.constant 0 : index
    %c0_1 = arith.constant 0 : index
    %11 = vector.load %arg1[%c0, %c0_0, %c0_1] : memref<8x16x1xi32, #tpu.memory_space<vmem>>, vector<8x16x1xi32>
    %12 = vector.shape_cast %11 : vector<8x16x1xi32> to vector<128x1xi32>
    %13 = tpu.iota {dimensions = array<i32: 1>} : vector<128x12xi32>
    %14 = vector.broadcast %12 : vector<128x1xi32> to vector<128x12xi32>
    %15 = arith.cmpi eq, %14, %13 : vector<128x12xi32>
    %16 = arith.extui %15 : vector<128x12xi1> to vector<128x12xi32>
    %17 = arith.sitofp %16 : vector<128x12xi32> to vector<128x12xf32>
    %c0_2 = arith.constant 0 : index
    %c0_3 = arith.constant 0 : index
    %18 = vector.load %arg2[%c0_2, %c0_3] : memref<12x32xf32, #tpu.memory_space<vmem>>, vector<12x32xf32>
    %cst = arith.constant dense<0.000000e+00> : vector<128x32xf32>
    %19 = tpu.matmul %17, %18, %cst {dimension_numbers = #tpu.dot_dimension_numbers<[1], [0], [0], [1], [0, 0, 1, 1], [], []>} : vector<128x12xf32>, vector<12x32xf32>, vector<128x32xf32> -> vector<128x32xf32>
    %c2_i32_4 = arith.constant 2 : i32
    %20 = tpu.dynamic_rotate %19 by %c2_i32_4 dim 0 : vector<128x32xf32>, i32 -> vector<128x32xf32>
    %cst_5 = arith.constant 0.000000e+00 : f32
    %21 = vector.shape_cast %4 : vector<128x1xi1> to vector<128x1xi1>
    %22 = vector.broadcast %21 : vector<128x1xi1> to vector<128x32xi1>
    %23 = vector.broadcast %cst_5 : f32 to vector<128x32xf32>
    %24 = arith.select %22, %20, %23 : vector<128x32xi1>, vector<128x32xf32>
    %c1_i32_6 = arith.constant 1 : i32
    %25 = tpu.dynamic_rotate %19 by %c1_i32_6 dim 0 : vector<128x32xf32>, i32 -> vector<128x32xf32>
    %cst_7 = arith.constant 0.000000e+00 : f32
    %26 = vector.shape_cast %6 : vector<128x1xi1> to vector<128x1xi1>
    %27 = vector.broadcast %26 : vector<128x1xi1> to vector<128x32xi1>
    %28 = vector.broadcast %cst_7 : f32 to vector<128x32xf32>
    %29 = arith.select %27, %25, %28 : vector<128x32xi1>, vector<128x32xf32>
    %c127_i32 = arith.constant 127 : i32
    %30 = tpu.dynamic_rotate %19 by %c127_i32 dim 0 : vector<128x32xf32>, i32 -> vector<128x32xf32>
    %cst_8 = arith.constant 0.000000e+00 : f32
    %31 = vector.shape_cast %8 : vector<128x1xi1> to vector<128x1xi1>
    %32 = vector.broadcast %31 : vector<128x1xi1> to vector<128x32xi1>
    %33 = vector.broadcast %cst_8 : f32 to vector<128x32xf32>
    %34 = arith.select %32, %30, %33 : vector<128x32xi1>, vector<128x32xf32>
    %c126_i32 = arith.constant 126 : i32
    %35 = tpu.dynamic_rotate %19 by %c126_i32 dim 0 : vector<128x32xf32>, i32 -> vector<128x32xf32>
    %cst_9 = arith.constant 0.000000e+00 : f32
    %36 = vector.shape_cast %10 : vector<128x1xi1> to vector<128x1xi1>
    %37 = vector.broadcast %36 : vector<128x1xi1> to vector<128x32xi1>
    %38 = vector.broadcast %cst_9 : f32 to vector<128x32xf32>
    %39 = arith.select %37, %35, %38 : vector<128x32xi1>, vector<128x32xf32>
    %40 = tpu.concatenate %24, %29, %19, %34, %39 in 1 : vector<128x32xf32>, vector<128x32xf32>, vector<128x32xf32>, vector<128x32xf32>, vector<128x32xf32> -> vector<128x160xf32>
    %c0_10 = arith.constant 0 : index
    %c0_11 = arith.constant 0 : index
    %41 = vector.load %arg3[%c0_10, %c0_11] : memref<160x32xf32, #tpu.memory_space<vmem>>, vector<160x32xf32>
    %cst_12 = arith.constant dense<0.000000e+00> : vector<128x32xf32>
    %42 = tpu.matmul %40, %41, %cst_12 {dimension_numbers = #tpu.dot_dimension_numbers<[1], [0], [0], [1], [0, 0, 1, 1], [], []>} : vector<128x160xf32>, vector<160x32xf32>, vector<128x32xf32> -> vector<128x32xf32>
    %c0_13 = arith.constant 0 : index
    %c0_14 = arith.constant 0 : index
    %43 = vector.load %arg4[%c0_13, %c0_14] : memref<1x32xf32, #tpu.memory_space<vmem>>, vector<1x32xf32>
    %44 = vector.broadcast %43 : vector<1x32xf32> to vector<128x32xf32>
    %45 = arith.addf %42, %44 : vector<128x32xf32>
    %c1_i32_15 = arith.constant 1 : i32
    %46 = tpu.dynamic_rotate %45 by %c1_i32_15 dim 0 : vector<128x32xf32>, i32 -> vector<128x32xf32>
    %cst_16 = arith.constant 0.000000e+00 : f32
    %47 = vector.shape_cast %6 : vector<128x1xi1> to vector<128x1xi1>
    %48 = vector.broadcast %47 : vector<128x1xi1> to vector<128x32xi1>
    %49 = vector.broadcast %cst_16 : f32 to vector<128x32xf32>
    %50 = arith.select %48, %46, %49 : vector<128x32xi1>, vector<128x32xf32>
    %c127_i32_17 = arith.constant 127 : i32
    %51 = tpu.dynamic_rotate %45 by %c127_i32_17 dim 0 : vector<128x32xf32>, i32 -> vector<128x32xf32>
    %cst_18 = arith.constant 0.000000e+00 : f32
    %52 = vector.shape_cast %8 : vector<128x1xi1> to vector<128x1xi1>
    %53 = vector.broadcast %52 : vector<128x1xi1> to vector<128x32xi1>
    %54 = vector.broadcast %cst_18 : f32 to vector<128x32xf32>
    %55 = arith.select %53, %51, %54 : vector<128x32xi1>, vector<128x32xf32>
    %56 = tpu.concatenate %50, %45, %55 in 1 : vector<128x32xf32>, vector<128x32xf32>, vector<128x32xf32> -> vector<128x96xf32>
    %c0_19 = arith.constant 0 : index
    %c0_20 = arith.constant 0 : index
    %57 = vector.load %arg5[%c0_19, %c0_20] : memref<96x32xf32, #tpu.memory_space<vmem>>, vector<96x32xf32>
    %cst_21 = arith.constant dense<0.000000e+00> : vector<128x32xf32>
    %58 = tpu.matmul %56, %57, %cst_21 {dimension_numbers = #tpu.dot_dimension_numbers<[1], [0], [0], [1], [0, 0, 1, 1], [], []>} : vector<128x96xf32>, vector<96x32xf32>, vector<128x32xf32> -> vector<128x32xf32>
    %c0_22 = arith.constant 0 : index
    %c0_23 = arith.constant 0 : index
    %59 = vector.load %arg6[%c0_22, %c0_23] : memref<1x32xf32, #tpu.memory_space<vmem>>, vector<1x32xf32>
    %60 = vector.broadcast %59 : vector<1x32xf32> to vector<128x32xf32>
    %61 = arith.addf %58, %60 : vector<128x32xf32>
    %cst_24 = arith.constant 0.000000e+00 : f32
    %62 = vector.broadcast %cst_24 : f32 to vector<128x32xf32>
    %63 = arith.maximumf %61, %62 : vector<128x32xf32>
    %cst_25 = arith.constant dense<0.000000e+00> : vector<128xf32>
    %64 = vector.multi_reduction <add>, %63, %cst_25 [1] : vector<128x32xf32> to vector<128xf32>
    %65 = vector.shape_cast %64 : vector<128xf32> to vector<128x1xf32>
    %cst_26 = arith.constant 3.200000e+01 : f32
    %66 = vector.broadcast %cst_26 : f32 to vector<128x1xf32>
    %67 = arith.divf %65, %66 : vector<128x1xf32>
    %68 = arith.mulf %63, %63 : vector<128x32xf32>
    %cst_27 = arith.constant dense<0.000000e+00> : vector<128xf32>
    %69 = vector.multi_reduction <add>, %68, %cst_27 [1] : vector<128x32xf32> to vector<128xf32>
    %70 = vector.shape_cast %69 : vector<128xf32> to vector<128x1xf32>
    %cst_28 = arith.constant 3.200000e+01 : f32
    %71 = vector.broadcast %cst_28 : f32 to vector<128x1xf32>
    %72 = arith.divf %70, %71 : vector<128x1xf32>
    %73 = arith.mulf %67, %67 : vector<128x1xf32>
    %74 = arith.subf %72, %73 : vector<128x1xf32>
    %cst_29 = arith.constant 9.99999974E-6 : f32
    %75 = vector.broadcast %cst_29 : f32 to vector<128x1xf32>
    %76 = arith.addf %74, %75 : vector<128x1xf32>
    %77 = math.rsqrt %76 : vector<128x1xf32>
    %78 = vector.broadcast %67 : vector<128x1xf32> to vector<128x32xf32>
    %79 = arith.subf %63, %78 : vector<128x32xf32>
    %c0_30 = arith.constant 0 : index
    %c0_31 = arith.constant 0 : index
    %80 = vector.load %arg7[%c0_30, %c0_31] : memref<1x32xf32, #tpu.memory_space<vmem>>, vector<1x32xf32>
    %81 = vector.broadcast %77 : vector<128x1xf32> to vector<128x32xf32>
    %82 = vector.broadcast %80 : vector<1x32xf32> to vector<128x32xf32>
    %83 = arith.mulf %81, %82 : vector<128x32xf32>
    %84 = arith.mulf %79, %83 : vector<128x32xf32>
    %c0_32 = arith.constant 0 : index
    %c0_33 = arith.constant 0 : index
    %85 = vector.load %arg8[%c0_32, %c0_33] : memref<1x32xf32, #tpu.memory_space<vmem>>, vector<1x32xf32>
    %86 = vector.broadcast %85 : vector<1x32xf32> to vector<128x32xf32>
    %87 = arith.addf %84, %86 : vector<128x32xf32>
    %c2_i32_34 = arith.constant 2 : i32
    %88 = tpu.dynamic_rotate %87 by %c2_i32_34 dim 0 : vector<128x32xf32>, i32 -> vector<128x32xf32>
    %cst_35 = arith.constant 0.000000e+00 : f32
    %89 = vector.shape_cast %4 : vector<128x1xi1> to vector<128x1xi1>
    %90 = vector.broadcast %89 : vector<128x1xi1> to vector<128x32xi1>
    %91 = vector.broadcast %cst_35 : f32 to vector<128x32xf32>
    %92 = arith.select %90, %88, %91 : vector<128x32xi1>, vector<128x32xf32>
    %c1_i32_36 = arith.constant 1 : i32
    %93 = tpu.dynamic_rotate %87 by %c1_i32_36 dim 0 : vector<128x32xf32>, i32 -> vector<128x32xf32>
    %cst_37 = arith.constant 0.000000e+00 : f32
    %94 = vector.shape_cast %6 : vector<128x1xi1> to vector<128x1xi1>
    %95 = vector.broadcast %94 : vector<128x1xi1> to vector<128x32xi1>
    %96 = vector.broadcast %cst_37 : f32 to vector<128x32xf32>
    %97 = arith.select %95, %93, %96 : vector<128x32xi1>, vector<128x32xf32>
    %c127_i32_38 = arith.constant 127 : i32
    %98 = tpu.dynamic_rotate %87 by %c127_i32_38 dim 0 : vector<128x32xf32>, i32 -> vector<128x32xf32>
    %cst_39 = arith.constant 0.000000e+00 : f32
    %99 = vector.shape_cast %8 : vector<128x1xi1> to vector<128x1xi1>
    %100 = vector.broadcast %99 : vector<128x1xi1> to vector<128x32xi1>
    %101 = vector.broadcast %cst_39 : f32 to vector<128x32xf32>
    %102 = arith.select %100, %98, %101 : vector<128x32xi1>, vector<128x32xf32>
    %c126_i32_40 = arith.constant 126 : i32
    %103 = tpu.dynamic_rotate %87 by %c126_i32_40 dim 0 : vector<128x32xf32>, i32 -> vector<128x32xf32>
    %cst_41 = arith.constant 0.000000e+00 : f32
    %104 = vector.shape_cast %10 : vector<128x1xi1> to vector<128x1xi1>
    %105 = vector.broadcast %104 : vector<128x1xi1> to vector<128x32xi1>
    %106 = vector.broadcast %cst_41 : f32 to vector<128x32xf32>
    %107 = arith.select %105, %103, %106 : vector<128x32xi1>, vector<128x32xf32>
    %108 = tpu.concatenate %92, %97, %87, %102, %107 in 1 : vector<128x32xf32>, vector<128x32xf32>, vector<128x32xf32>, vector<128x32xf32>, vector<128x32xf32> -> vector<128x160xf32>
    %c0_42 = arith.constant 0 : index
    %c0_43 = arith.constant 0 : index
    %109 = vector.load %arg9[%c0_42, %c0_43] : memref<160x32xf32, #tpu.memory_space<vmem>>, vector<160x32xf32>
    %cst_44 = arith.constant dense<0.000000e+00> : vector<128x32xf32>
    %110 = tpu.matmul %108, %109, %cst_44 {dimension_numbers = #tpu.dot_dimension_numbers<[1], [0], [0], [1], [0, 0, 1, 1], [], []>} : vector<128x160xf32>, vector<160x32xf32>, vector<128x32xf32> -> vector<128x32xf32>
    %c0_45 = arith.constant 0 : index
    %c0_46 = arith.constant 0 : index
    %111 = vector.load %arg10[%c0_45, %c0_46] : memref<1x32xf32, #tpu.memory_space<vmem>>, vector<1x32xf32>
    %112 = vector.broadcast %111 : vector<1x32xf32> to vector<128x32xf32>
    %113 = arith.addf %110, %112 : vector<128x32xf32>
    %c1_i32_47 = arith.constant 1 : i32
    %114 = tpu.dynamic_rotate %113 by %c1_i32_47 dim 0 : vector<128x32xf32>, i32 -> vector<128x32xf32>
    %cst_48 = arith.constant 0.000000e+00 : f32
    %115 = vector.shape_cast %6 : vector<128x1xi1> to vector<128x1xi1>
    %116 = vector.broadcast %115 : vector<128x1xi1> to vector<128x32xi1>
    %117 = vector.broadcast %cst_48 : f32 to vector<128x32xf32>
    %118 = arith.select %116, %114, %117 : vector<128x32xi1>, vector<128x32xf32>
    %c127_i32_49 = arith.constant 127 : i32
    %119 = tpu.dynamic_rotate %113 by %c127_i32_49 dim 0 : vector<128x32xf32>, i32 -> vector<128x32xf32>
    %cst_50 = arith.constant 0.000000e+00 : f32
    %120 = vector.shape_cast %8 : vector<128x1xi1> to vector<128x1xi1>
    %121 = vector.broadcast %120 : vector<128x1xi1> to vector<128x32xi1>
    %122 = vector.broadcast %cst_50 : f32 to vector<128x32xf32>
    %123 = arith.select %121, %119, %122 : vector<128x32xi1>, vector<128x32xf32>
    %124 = tpu.concatenate %118, %113, %123 in 1 : vector<128x32xf32>, vector<128x32xf32>, vector<128x32xf32> -> vector<128x96xf32>
    %c0_51 = arith.constant 0 : index
    %c0_52 = arith.constant 0 : index
    %125 = vector.load %arg11[%c0_51, %c0_52] : memref<96x32xf32, #tpu.memory_space<vmem>>, vector<96x32xf32>
    %cst_53 = arith.constant dense<0.000000e+00> : vector<128x32xf32>
    %126 = tpu.matmul %124, %125, %cst_53 {dimension_numbers = #tpu.dot_dimension_numbers<[1], [0], [0], [1], [0, 0, 1, 1], [], []>} : vector<128x96xf32>, vector<96x32xf32>, vector<128x32xf32> -> vector<128x32xf32>
    %c0_54 = arith.constant 0 : index
    %c0_55 = arith.constant 0 : index
    %127 = vector.load %arg12[%c0_54, %c0_55] : memref<1x32xf32, #tpu.memory_space<vmem>>, vector<1x32xf32>
    %128 = vector.broadcast %127 : vector<1x32xf32> to vector<128x32xf32>
    %129 = arith.addf %126, %128 : vector<128x32xf32>
    %cst_56 = arith.constant 0.000000e+00 : f32
    %130 = vector.broadcast %cst_56 : f32 to vector<128x32xf32>
    %131 = arith.maximumf %129, %130 : vector<128x32xf32>
    %cst_57 = arith.constant dense<0.000000e+00> : vector<128xf32>
    %132 = vector.multi_reduction <add>, %131, %cst_57 [1] : vector<128x32xf32> to vector<128xf32>
    %133 = vector.shape_cast %132 : vector<128xf32> to vector<128x1xf32>
    %cst_58 = arith.constant 3.200000e+01 : f32
    %134 = vector.broadcast %cst_58 : f32 to vector<128x1xf32>
    %135 = arith.divf %133, %134 : vector<128x1xf32>
    %136 = arith.mulf %131, %131 : vector<128x32xf32>
    %cst_59 = arith.constant dense<0.000000e+00> : vector<128xf32>
    %137 = vector.multi_reduction <add>, %136, %cst_59 [1] : vector<128x32xf32> to vector<128xf32>
    %138 = vector.shape_cast %137 : vector<128xf32> to vector<128x1xf32>
    %cst_60 = arith.constant 3.200000e+01 : f32
    %139 = vector.broadcast %cst_60 : f32 to vector<128x1xf32>
    %140 = arith.divf %138, %139 : vector<128x1xf32>
    %141 = arith.mulf %135, %135 : vector<128x1xf32>
    %142 = arith.subf %140, %141 : vector<128x1xf32>
    %cst_61 = arith.constant 9.99999974E-6 : f32
    %143 = vector.broadcast %cst_61 : f32 to vector<128x1xf32>
    %144 = arith.addf %142, %143 : vector<128x1xf32>
    %145 = math.rsqrt %144 : vector<128x1xf32>
    %146 = vector.broadcast %135 : vector<128x1xf32> to vector<128x32xf32>
    %147 = arith.subf %131, %146 : vector<128x32xf32>
    %c0_62 = arith.constant 0 : index
    %c0_63 = arith.constant 0 : index
    %148 = vector.load %arg13[%c0_62, %c0_63] : memref<1x32xf32, #tpu.memory_space<vmem>>, vector<1x32xf32>
    %149 = vector.broadcast %145 : vector<128x1xf32> to vector<128x32xf32>
    %150 = vector.broadcast %148 : vector<1x32xf32> to vector<128x32xf32>
    %151 = arith.mulf %149, %150 : vector<128x32xf32>
    %152 = arith.mulf %147, %151 : vector<128x32xf32>
    %c0_64 = arith.constant 0 : index
    %c0_65 = arith.constant 0 : index
    %153 = vector.load %arg14[%c0_64, %c0_65] : memref<1x32xf32, #tpu.memory_space<vmem>>, vector<1x32xf32>
    %154 = vector.broadcast %153 : vector<1x32xf32> to vector<128x32xf32>
    %155 = arith.addf %152, %154 : vector<128x32xf32>
    %c0_66 = arith.constant 0 : index
    %c0_67 = arith.constant 0 : index
    %156 = vector.load %arg15[%c0_66, %c0_67] : memref<1x32xf32, #tpu.memory_space<vmem>>, vector<1x32xf32>
    %cst_68 = arith.constant dense<0.000000e+00> : vector<1x128xf32>
    %157 = tpu.matmul %156, %155, %cst_68 {dimension_numbers = #tpu.dot_dimension_numbers<[1], [1], [0], [0], [0, 0, 1, 0], [], []>} : vector<1x32xf32>, vector<128x32xf32>, vector<1x128xf32> -> vector<1x128xf32>
    %c0_69 = arith.constant 0 : index
    %c0_70 = arith.constant 0 : index
    %158 = vector.load %arg16[%c0_69, %c0_70] : memref<1x1xf32, #tpu.memory_space<vmem>>, vector<1x1xf32>
    %159 = vector.broadcast %158 : vector<1x1xf32> to vector<1x128xf32>
    %160 = arith.addf %157, %159 : vector<1x128xf32>
    %161 = vector.shape_cast %160 : vector<1x128xf32> to vector<1x1x128xf32>
    %c0_71 = arith.constant 0 : index
    %c0_72 = arith.constant 0 : index
    %c0_73 = arith.constant 0 : index
    %162 = vector.load %arg17[%c0_71, %c0_72, %c0_73] : memref<1x1x128xf32, #tpu.memory_space<vmem>>, vector<1x1x128xf32>
    tpu.vector_store %arg17[%c0_71, %c0_72, %c0_73], %161 {strides = array<i32>} : memref<1x1x128xf32, #tpu.memory_space<vmem>>, vector<1x1x128xf32>,
    return
  }
  func.func @transform_0(%arg0: i32) -> (i32, i32, i32) {
    %c0_i32 = arith.constant 0 : i32
    %c0_i32_0 = arith.constant 0 : i32
    %c0_i32_1 = arith.constant 0 : i32
    return %arg0, %c0_i32, %c0_i32_0 : i32, i32, i32
  }
  func.func @transform_1(%arg0: i32) -> (i32, i32) {
    %c0_i32 = arith.constant 0 : i32
    %c0_i32_0 = arith.constant 0 : i32
    %c0_i32_1 = arith.constant 0 : i32
    return %c0_i32, %c0_i32_0 : i32, i32
  }
  func.func @transform_2(%arg0: i32) -> (i32, i32) {
    %c0_i32 = arith.constant 0 : i32
    %c0_i32_0 = arith.constant 0 : i32
    %c0_i32_1 = arith.constant 0 : i32
    return %c0_i32, %c0_i32_0 : i32, i32
  }
  func.func @transform_3(%arg0: i32) -> (i32, i32) {
    %c0_i32 = arith.constant 0 : i32
    %c0_i32_0 = arith.constant 0 : i32
    %c0_i32_1 = arith.constant 0 : i32
    return %c0_i32, %c0_i32_0 : i32, i32
  }
  func.func @transform_4(%arg0: i32) -> (i32, i32) {
    %c0_i32 = arith.constant 0 : i32
    %c0_i32_0 = arith.constant 0 : i32
    %c0_i32_1 = arith.constant 0 : i32
    return %c0_i32, %c0_i32_0 : i32, i32
  }
  func.func @transform_5(%arg0: i32) -> (i32, i32) {
    %c0_i32 = arith.constant 0 : i32
    %c0_i32_0 = arith.constant 0 : i32
    %c0_i32_1 = arith.constant 0 : i32
    return %c0_i32, %c0_i32_0 : i32, i32
  }
  func.func @transform_6(%arg0: i32) -> (i32, i32) {
    %c0_i32 = arith.constant 0 : i32
    %c0_i32_0 = arith.constant 0 : i32
    %c0_i32_1 = arith.constant 0 : i32
    return %c0_i32, %c0_i32_0 : i32, i32
  }
  func.func @transform_7(%arg0: i32) -> (i32, i32) {
    %c0_i32 = arith.constant 0 : i32
    %c0_i32_0 = arith.constant 0 : i32
    %c0_i32_1 = arith.constant 0 : i32
    return %c0_i32, %c0_i32_0 : i32, i32
  }
  func.func @transform_8(%arg0: i32) -> (i32, i32) {
    %c0_i32 = arith.constant 0 : i32
    %c0_i32_0 = arith.constant 0 : i32
    %c0_i32_1 = arith.constant 0 : i32
    return %c0_i32, %c0_i32_0 : i32, i32
  }
  func.func @transform_9(%arg0: i32) -> (i32, i32) {
    %c0_i32 = arith.constant 0 : i32
    %c0_i32_0 = arith.constant 0 : i32
    %c0_i32_1 = arith.constant 0 : i32
    return %c0_i32, %c0_i32_0 : i32, i32
  }
  func.func @transform_10(%arg0: i32) -> (i32, i32) {
    %c0_i32 = arith.constant 0 : i32
    %c0_i32_0 = arith.constant 0 : i32
    %c0_i32_1 = arith.constant 0 : i32
    return %c0_i32, %c0_i32_0 : i32, i32
  }
  func.func @transform_11(%arg0: i32) -> (i32, i32) {
    %c0_i32 = arith.constant 0 : i32
    %c0_i32_0 = arith.constant 0 : i32
    %c0_i32_1 = arith.constant 0 : i32
    return %c0_i32, %c0_i32_0 : i32, i32
  }
  func.func @transform_12(%arg0: i32) -> (i32, i32) {
    %c0_i32 = arith.constant 0 : i32
    %c0_i32_0 = arith.constant 0 : i32
    %c0_i32_1 = arith.constant 0 : i32
    return %c0_i32, %c0_i32_0 : i32, i32
  }
  func.func @transform_13(%arg0: i32) -> (i32, i32) {
    %c0_i32 = arith.constant 0 : i32
    %c0_i32_0 = arith.constant 0 : i32
    %c0_i32_1 = arith.constant 0 : i32
    return %c0_i32, %c0_i32_0 : i32, i32
  }
  func.func @transform_14(%arg0: i32) -> (i32, i32) {
    %c0_i32 = arith.constant 0 : i32
    %c0_i32_0 = arith.constant 0 : i32
    %c0_i32_1 = arith.constant 0 : i32
    return %c0_i32, %c0_i32_0 : i32, i32
  }
  func.func @transform_15(%arg0: i32) -> (i32, i32) {
    %c0_i32 = arith.constant 0 : i32
    %c0_i32_0 = arith.constant 0 : i32
    %c0_i32_1 = arith.constant 0 : i32
    return %c0_i32, %c0_i32_0 : i32, i32
  }
  func.func @transform_16(%arg0: i32) -> (i32, i32, i32) {
    %c0_i32 = arith.constant 0 : i32
    %c0_i32_0 = arith.constant 0 : i32
    %c0_i32_1 = arith.constant 0 : i32
    return %arg0, %c0_i32, %c0_i32_0 : i32, i32, i32
  }
}

</mosaic_0001>

<bundles_post_ra>
// kernel: tpu_custom_call.1
= control target key start
LH: loop header
LB: loop body
LE: loop exit
PB: predicated region body
PF: predicated region fallthrough
CT: control target
= control target key end

     0   :  { %s8033_s0 = inlined_call_operand.vmem [shape: s32[16,16,1], index: 0, kind: input, shape index: {}]   ;;  %s8034_s1 = inlined_call_operand.vmem [shape: f32[12,32], index: 1, kind: input, shape index: {}]   ;;  %s8035_s2 = inlined_call_operand.vmem [shape: f32[160,32], index: 2, kind: input, shape index: {}]   ;;  %s8036_s3 = inlined_call_operand.vmem [shape: f32[1,32], index: 3, kind: input, shape index: {}]   ;;  %s8037_s4 = inlined_call_operand.vmem [shape: f32[96,32], index: 4, kind: input, shape index: {}]   ;;  %s8038_s5 = inlined_call_operand.vmem [shape: f32[1,32], index: 5, kind: input, shape index: {}]   ;;  %s8039_s6 = inlined_call_operand.vmem [shape: f32[1,32], index: 6, kind: input, shape index: {}]   ;;  %s8040_s7 = inlined_call_operand.vmem [shape: f32[1,32], index: 7, kind: input, shape index: {}]   ;;  %s8041_s8 = inlined_call_operand.vmem [shape: f32[160,32], index: 8, kind: input, shape index: {}]   ;;  %s8042_s9 = inlined_call_operand.vmem [shape: f32[1,32], index: 9, kind: input, shape index: {}]   ;;  %s8043_s10 = inlined_call_operand.vmem [shape: f32[96,32], index: 10, kind: input, shape index: {}]   ;;  %s8044_s11 = inlined_call_operand.vmem [shape: f32[1,32], index: 11, kind: input, shape index: {}]   ;;  %s8045_s12 = inlined_call_operand.vmem [shape: f32[1,32], index: 12, kind: input, shape index: {}]   ;;  %s8046_s13 = inlined_call_operand.vmem [shape: f32[1,32], index: 13, kind: input, shape index: {}]   ;;  %s8047_s14 = inlined_call_operand.vmem [shape: f32[1,32], index: 14, kind: input, shape index: {}]   ;;  %s8048_s15 = inlined_call_operand.<no memory space> [shape: f32[1,1], index: 15, kind: input, shape index: {}]   ;;  %s8049_s16 = inlined_call_operand.hbm [shape: f32[2,1,128], index: 16, kind: output, shape index: {}]  }
   0x1   :  { %8184 = sst [smem:[#allocation35_spill]] %s8033_s0  ;;  %v21_v0 = vstv %s8048_s15 }
   0x2   :  { %8185 = sst [smem:[#allocation36_spill]] %s8034_s1  ;;  %22 = vst [vmem:[#allocation2] sm:$0x1] %v21_v0 }
   0x3   :  { %8186 = sst [smem:[#allocation37_spill]] %s8035_s2 }
   0x4   :  { %8187 = sst [smem:[#allocation38_spill]] %s8036_s3 }
   0x5   :  { %8188 = sst [smem:[#allocation39_spill]] %s8037_s4 }
   0x6   :  { %23 = vsyncpa [#allocation4], 0 }
   0x7   :  { %25 = vsyncpa [#allocation4 + $0x1], 0  ;;  %s5222_s23 = smov 0   ;;  %s5224_s24 = smov 0  }
   0x8   :  { %s5226_s25 = smov 0   ;;  %s5228_s26 = smov 0  }
   0x9 LB: > { %s5243_s15 = sadd.s32 4294967295, %s5123_s26   ;;  %s4214_s27 = sadd.s32 4294967294, %s5123_s26   ;;  %s5123_s26 = sphi %s5228_s26, %s8803_s26   ;;  %s5119_s25 = sphi %s5226_s25, %s8802_s25   ;;  %s5115_s24 = sphi %s5224_s24, %s8801_s24   ;;  %s5111_s23 = sphi %s5222_s23, %s8800_s23  }
   0xa   : > { %s5247_s28 = sadd.s32 1, %s5123_s26   ;;  %s379_s29 = sadd.s32 1, %s5119_s25 }
   0xb   : > { %s376_s30 = ssub.s32 %s5123_s26, %s5247_s28  ;;  %p389_p0 = scmp.ne.s32.totalorder %s5119_s25, %s5115_s24 }
   0xc   : > { %p377_p1 = scmp.eq.s32.totalorder %s376_s30, 0  ;;  %p390_p2 = scmp.eq.s32.totalorder %s5243_s15, 1 }
   0xd   : > { %p395_p3 = scmp.ne.s32.totalorder %s5115_s24, %s5111_s23  ;;  %p396_p4 = scmp.eq.s32.totalorder %s4214_s27, 1 }
   0xe   : > { %s5258_s0 = scalar_select %p377_p1, %s5119_s25, %s379_s29  }
   0xf   : > { %p5260_p5 = por %p390_p2, %p389_p0  ;;  %p5264_p6 = por %p396_p4, %p395_p3 }
  0x10   : > { %8189 = sst [smem:[#allocation6_spill]] %s5258_s0  ;;  %p4217_p7 = scmp.ge.s32.totalorder %s5123_s26, 1 }
  0x11   : > { %p469_p8 = scmp.lt.s32.totalorder %s5123_s26, 3 }
  0x13   : > { %p470_p9 = pnand %p4217_p7, %p469_p8 }
  0x15   : > { %473 = sbr.rel (%p470_p9) target bundleno = 2482 (0x9b2), region = 84 }
  0x1c   : > { %s4218_s19 = sshll.u32 %s5243_s15, 3  ;;  %v5125_v1 = vmov 0   ;;  %s8192_s27 = sld [smem:[#allocation35_spill]]  ;;  %vm884_vm0 = vcmask 1043456   ;;  %vm5126_vm1 = vmmov 1   ;;  %v526_v21 = vlaneseq }
  0x1d   : > { %4791 = vset.pattern.permute.xlu1 %v5125_v1  ;;  %4790 = vset.pattern.permute.xlu0 %v5125_v1  ;;  %p520_p10 = scmp.lt.s32.totalorder %s4218_s19, 15  ;;  %s8193_s1 = sld [smem:[#allocation36_spill]]  ;;  %vm4598_vm2 = vmpackc.low %vm884_vm0, %vm5126_vm1  ;;  %vm835_vm3 = vcmask 97280   ;;  %v8050_v25 = vmov 0.0   ;;  %v8067_v58 = vmov 0.0|0.0  }
  0x1e   : > { %v5299_v22 = vand.u32 127, %v526_v21  ;;  %s8194_s2 = sld [smem:[#allocation37_spill]]  ;;  %v5358_v60 = vshrl.u32 %v526_v21, 7  ;;  %s8143_s22 = smov 64  }
  0x1f   : > { %s8805_s19 = smov (!%p520_p10, %s4218_s19), 15  ;;  %s8141_s21 = smov 96  }
  0x20   : > { %s4346_s20 = sshll.u32 %s8805_s19, 4  ;;  %v5361_v61 = vadd.s32 16, %v5358_v60  ;;  %v5373_v1 = vadd.s32 8, %v5358_v60  ;;  %s8407_s4 = sld [smem:[#allocation39_spill]] }
  0x21   : > { %s8408_s3 = sld [smem:[#allocation38_spill]]  ;;  %s8413_s0 = smov 64  }
  0x22   : > { %s5274_s29 = scalar_lea.vmem %s8192_s27, %s4346_s20  ;;  %s4343_s20 = sshll.u32 %s5243_s15, 4 }
  0x23   : > { %v721_v2 = vld [vmem:[%s5274_s29 + $0x10] sm:$0xff]  ;;  %v719_v3 = vld [vmem:[%s5274_s29] sm:$0xff]  ;;  %v722_v4 = vld [vmem:[%s5274_s29 + $0x18] sm:$0xff]  ;;  %s5133_s15 = smov [#allocation3]  }
  0x24   : > { %744 = vperm.xlu1 %4791, %v721_v2   ;;  %738 = vperm.xlu0 %4790, %v719_v3   ;;  %v720_v5 = vld [vmem:[%s5274_s29 + $0x8] sm:$0xff]  ;;  %v833_v6 = vld [vmem:[%s8193_s1] sm:$0xff]  ;;  %v726_v11 = vld [vmem:[%s5274_s29 + $0x38] sm:$0xff]  ;;  %s5065_s30 = sshll.u32 %s5133_s15, 4  ;;  %s5066_s30 = int_to_ptr.vmem [resolvable:$false] %s5065_s30 }
  0x25   : > { %v834_v7 = vld [vmem:[%s8193_s1 + $0x8] sm:$0xf]  ;;  %v723_v9 = vld [vmem:[%s5274_s29 + $0x20] sm:$0xff]  ;;  %v725_v12 = vld [vmem:[%s5274_s29 + $0x30] sm:$0xff]  ;;  %s5067_s1 = scalar_lea.vmem %s5066_s30, 32 }
  0x26   : > { %v724_v8 = vld [vmem:[%s5274_s29 + $0x28] sm:$0xff]  ;;  %v4597_v10 = vpack.c.bf16 %v834_v7, %v833_v6  ;;  %v727_v14 = vld [vmem:[%s5274_s29 + $0x40] sm:$0xff]  ;;  %v730_v15 = vld [vmem:[%s5274_s29 + $0x58] sm:$0xff]  ;;  %v8058_v6 = vand.u32 15, %v5361_v61  ;;  %v5383_v7 = vadd.s32 32, %v5358_v60 }
  0x27   : > { %v728_v13 = vld [vmem:[%s5274_s29 + $0x48] sm:$0xff]  ;;  %v729_v16 = vld [vmem:[%s5274_s29 + $0x50] sm:$0xff]  ;;  %v731_v18 = vld [vmem:[%s5274_s29 + $0x60] sm:$0xff] }
  0x28   : > { %747 = vperm.xlu1 %4791, %v722_v4   ;;  %741 = vperm.xlu0 %4790, %v720_v5   ;;  %v732_v17 = vld [vmem:[%s5274_s29 + $0x68] sm:$0xff]  ;;  %v734_v19 = vld [vmem:[%s5274_s29 + $0x78] sm:$0xff]  ;;  %v733_v20 = vld [vmem:[%s5274_s29 + $0x70] sm:$0xff]  ;;  %v5379_v4 = vadd.s32 24, %v5358_v60  ;;  %s8145_s29 = smov 32  }
  0x29   : > { %4599 = vmatprep.subr.msk.bf16.mxu1 %vm4598_vm2, %v4597_v10  ;;  %v1600_v56 = vld [vmem:[%s8194_s2] sm:$0xff]  ;;  %v1601_v57 = vld [vmem:[%s8194_s2 + $0x8] sm:$0xff]  ;;  %v1602_v62 = vld [vmem:[%s8194_s2 + $0x10] sm:$0xff] }
  0x2a   : > { %4602 = vmatpush3.bf16.msk.msra.mxu1 %vm4598_vm2, %v4597_v10  ;;  %v4604_v59 = vpack.c.bf16 %v1601_v57, %v1600_v56  ;;  %v1603_v63 = vld [vmem:[%s8194_s2 + $0x18] sm:$0xff]  ;;  %v1604_v0 = vld [vmem:[%s8194_s2 + $0x20] sm:$0xff]  ;;  %v1605_v3 = vld [vmem:[%s8194_s2 + $0x28] sm:$0xff]  ;;  %v5391_v10 = vadd.s32 40, %v5358_v60 }
  0x2b   : > { %4603 = vmatprep.subr.bf16.mxu1 %v8067_v58  ;;  %v4607_v2 = vpack.c.bf16 %v1603_v63, %v1602_v62  ;;  %v4610_v5 = vpack.c.bf16 %v1605_v3, %v1604_v0  ;;  %v1611_v3 = vld [vmem:[%s8194_s2 + $0x58] sm:$0xff] }
  0x2c   : > { %753 = vperm.xlu1 %4791, %v724_v8   ;;  %750 = vperm.xlu0 %4790, %v723_v9   ;;  %v5387_v8 = vadd.s32 48, %v5358_v60  ;;  %v8059_v9 = vand.u32 15, %v5373_v1 }
  0x30   : > { %759 = vperm.xlu1 %4791, %v726_v11   ;;  %756 = vperm.xlu0 %4790, %v725_v12   ;;  %v8056_v11 = vand.u32 15, %v5379_v4  ;;  %v8195_v12 = vmov 0 }
  0x34   : > { %765 = vperm.xlu1 %4791, %v728_v13   ;;  %762 = vperm.xlu0 %4790, %v727_v14   ;;  %v8054_v13 = vand.u32 15, %v5383_v7 }
  0x38   : > { %771 = vperm.xlu1 %4791, %v730_v15   ;;  %768 = vperm.xlu0 %4790, %v729_v16   ;;  %v8051_v15 = vand.u32 15, %v5387_v8  ;;  %v5410_v16 = vadd.s32 56, %v5358_v60 }
  0x3c   : > { %777 = vperm.xlu1 %4791, %v732_v17   ;;  %774 = vperm.xlu0 %4790, %v731_v18   ;;  %v8198_v17 = vmov 0  ;;  %v8053_v18 = vand.u32 15, %v5391_v10 }
  0x40   : > { %783 = vperm.xlu1 %4791, %v734_v19   ;;  %780 = vperm.xlu0 %4790, %v733_v20   ;;  %v1606_v19 = vld [vmem:[%s8194_s2 + $0x30] sm:$0xff]  ;;  %v1607_v20 = vld [vmem:[%s8194_s2 + $0x38] sm:$0xff] }
  0xa3   : > { %v745_v23 = vpop.permute.xlu1 %744  ;;  %v739_v24 = vpop.permute.xlu0 %738 }
  0xa4   : > { %vm785_vm4 = vcmp.eq.s32.totalorder %v739_v24, %v5299_v22  ;;  %vm787_vm5 = vcmp.eq.s32.totalorder %v745_v23, %v5299_v22 }
  0xa5   : > { %v4221_v26 = vsel %vm785_vm4, 1.0, %v8050_v25  ;;  %v4223_v29 = vsel %vm787_vm5, 1.0, %v8050_v25  ;;  %vm8098_vm5 = vcmp.lt.s32.totalorder %v5358_v60, 7 }
  0xa6   : > { %4442 = vmatprep.mubr.msk.f32.mxu1 %vm835_vm3, %v4221_v26 }
  0xa7   : > { %v748_v27 = vpop.permute.xlu1 %747  ;;  %v742_v28 = vpop.permute.xlu0 %741 }
  0xa8   : > { %vm786_vm6 = vcmp.eq.s32.totalorder %v742_v28, %v5299_v22  ;;  %vm788_vm7 = vcmp.eq.s32.totalorder %v748_v27, %v5299_v22 }
  0xa9   : > { %v4222_v30 = vsel %vm786_vm6, 1.0, %v8050_v25  ;;  %v4224_v33 = vsel %vm788_vm7, 1.0, %v8050_v25  ;;  %vm8071_vm6 = vcmp.lt.s32.totalorder %v5358_v60, 6  ;;  %vm8070_vm7 = vcmask 261120  }
  0xaa   : > { %4443 = vmatmul.mubr.msk.f32.vlgmr.msra.gmra.mrb[0].mxu1 %vm835_vm3, %v4222_v30 }
  0xab   : > { %v754_v31 = vpop.permute.xlu1 %753  ;;  %4445 = vmatprep.mubr.msk.f32.mxu1 %vm835_vm3, %v4223_v29  ;;  %v751_v32 = vpop.permute.xlu0 %750  ;;  %4605 = vmatpush1.bf16.msra.mxu1 %v4604_v59 }
  0xac   : > { %vm789_vm8 = vcmp.eq.s32.totalorder %v751_v32, %v5299_v22  ;;  %vm790_vm9 = vcmp.eq.s32.totalorder %v754_v31, %v5299_v22  ;;  %4606 = vmatprep.subr.bf16.mxu1 %v8067_v58  ;;  %v8201_v31 = vmov 0 }
  0xad   : > { %v4225_v34 = vsel %vm789_vm8, 1.0, %v8050_v25  ;;  %v4226_v37 = vsel %vm790_vm9, 1.0, %v8050_v25  ;;  %vm5399_vm8 = vcmp.ge.s32.totalorder %v8058_v6, 1  ;;  %vm8076_vm9 = vcmp.lt.s32.totalorder %v5358_v60, 2 }
  0xae   : > { %4446 = vmatmul.mubr.msk.f32.gmra.mrb[2].mxu1 %vm835_vm3, %v4224_v33  ;;  %v8196_v12 = vsel %vm5399_vm8, 4294967295, %v8195_v12  ;;  %v5444_v33 = vadd.s32 80, %v5358_v60 }
  0xaf   : > { %v760_v35 = vpop.permute.xlu1 %759  ;;  %4448 = vmatprep.mubr.msk.f32.mxu1 %vm835_vm3, %v4225_v34  ;;  %v757_v36 = vpop.permute.xlu0 %756  ;;  %4608 = vmatpush1.bf16.msra.mxu1 %v4607_v2  ;;  %8197 = vst [vmem:[#allocation7_spill] sm:$0xff] %v8196_v12  ;;  %v5447_v34 = vadd.s32 64, %v5358_v60  ;;  %v1610_v2 = vld [vmem:[%s8194_s2 + $0x50] sm:$0xff] }
  0xb0   : > { %vm791_vm10 = vcmp.eq.s32.totalorder %v757_v36, %v5299_v22  ;;  %vm792_vm11 = vcmp.eq.s32.totalorder %v760_v35, %v5299_v22  ;;  %4609 = vmatprep.subr.bf16.mxu1 %v8067_v58  ;;  %8204 = vst [vmem:[#allocation10_spill] sm:$0xff] %v5444_v33  ;;  %v4613_v35 = vpack.c.bf16 %v1607_v20, %v1606_v19 }
  0xb1   : > { %v4227_v38 = vsel %vm791_vm10, 1.0, %v8050_v25  ;;  %v4228_v41 = vsel %vm792_vm11, 1.0, %v8050_v25  ;;  %vm5414_vm10 = vcmp.lt.s32.totalorder %v8059_v9, 15  ;;  %vm5438_vm11 = vcmp.lt.s32.totalorder %v8056_v11, 15 }
  0xb2   : > { %4449 = vmatmul.mubr.msk.f32.gmra.mrb[4].mxu1 %vm835_vm3, %v4226_v37  ;;  %v8199_v17 = vsel %vm5414_vm10, 4294967295, %v8198_v17  ;;  %v8202_v31 = vsel %vm5438_vm11, 4294967295, %v8201_v31 }
  0xb3   : > { %v766_v39 = vpop.permute.xlu1 %765  ;;  %4451 = vmatprep.mubr.msk.f32.mxu1 %vm835_vm3, %v4227_v38  ;;  %v763_v40 = vpop.permute.xlu0 %762  ;;  %4611 = vmatpush1.bf16.msra.mxu1 %v4610_v5  ;;  %8200 = vst [vmem:[#allocation8_spill] sm:$0xff] %v8199_v17  ;;  %8203 = vst [vmem:[#allocation9_spill] sm:$0xff] %v8202_v31 }
  0xb4   : > { %vm793_vm12 = vcmp.eq.s32.totalorder %v763_v40, %v5299_v22  ;;  %vm794_vm13 = vcmp.eq.s32.totalorder %v766_v39, %v5299_v22  ;;  %4612 = vmatprep.subr.bf16.mxu1 %v8067_v58  ;;  %v8205_v39 = vmov 0  ;;  %v5469_v40 = vadd.s32 72, %v5358_v60 }
  0xb5   : > { %v4229_v42 = vsel %vm793_vm12, 1.0, %v8050_v25  ;;  %v4230_v45 = vsel %vm794_vm13, 1.0, %v8050_v25  ;;  %vm5464_vm12 = vcmp.ge.s32.totalorder %v8054_v13, 1  ;;  %vm5503_vm13 = vcmp.ge.s32.totalorder %v8051_v15, 1 }
  0xb6   : > { %4452 = vmatmul.mubr.msk.f32.gmra.mrb[6].mxu1 %vm835_vm3, %v4228_v41  ;;  %v8206_v39 = vsel %vm5464_vm12, 4294967295, %v8205_v39  ;;  %8208 = vst [vmem:[#allocation12_spill] sm:$0xff] %v5469_v40  ;;  %v1608_v41 = vld [vmem:[%s8194_s2 + $0x40] sm:$0xff] }
  0xb7   : > { %v772_v43 = vpop.permute.xlu1 %771  ;;  %4454 = vmatprep.mubr.msk.f32.mxu1 %vm835_vm3, %v4229_v42  ;;  %v769_v44 = vpop.permute.xlu0 %768  ;;  %8207 = vst [vmem:[#allocation11_spill] sm:$0xff] %v8206_v39  ;;  %v1609_v42 = vld [vmem:[%s8194_s2 + $0x48] sm:$0xff]  ;;  %4614 = vmatpush1.bf16.msra.mxu1 %v4613_v35 }
  0xb8   : > { %vm795_vm14 = vcmp.eq.s32.totalorder %v769_v44, %v5299_v22  ;;  %vm796_vm15 = vcmp.eq.s32.totalorder %v772_v43, %v5299_v22  ;;  %4615 = vmatprep.subr.bf16.mxu1 %v8067_v58  ;;  %v4616_v56 = vpack.c.bf16 %v1609_v42, %v1608_v41 }
  0xb9   : > { %v4231_v46 = vsel %vm795_vm14, 1.0, %v8050_v25  ;;  %v4232_v49 = vsel %vm796_vm15, 1.0, %v8050_v25  ;;  %vm5537_vm14 = vcmp.lt.s32.totalorder %v8053_v18, 15 }
  0xba   : > { %4455 = vmatmul.mubr.msk.f32.gmra.mrb[8].mxu1 %vm835_vm3, %v4230_v45 }
  0xbb   : > { %v778_v47 = vpop.permute.xlu1 %777  ;;  %4457 = vmatprep.mubr.msk.f32.mxu1 %vm835_vm3, %v4231_v46  ;;  %v775_v48 = vpop.permute.xlu0 %774  ;;  %4617 = vmatpush1.bf16.msra.mxu1 %v4616_v56 }
  0xbc   : > { %vm797_vm0 = vcmp.eq.s32.totalorder %v775_v48, %v5299_v22  ;;  %vm798_vm1 = vcmp.eq.s32.totalorder %v778_v47, %v5299_v22  ;;  %v5496_v48 = vadd.s32 88, %v5358_v60  ;;  %4618 = vmatprep.subr.bf16.mxu1 %v8067_v58 }
  0xbd   : > { %v4233_v50 = vsel %vm797_vm0, 1.0, %v8050_v25  ;;  %v4234_v53 = vsel %vm798_vm1, 1.0, %v8050_v25 }
  0xbe   : > { %4458 = vmatmul.mubr.msk.f32.gmra.mrb[10].mxu1 %vm835_vm3, %v4232_v49  ;;  %8209 = vst [vmem:[#allocation13_spill] sm:$0xff] %v5496_v48 }
  0xbf   : > { %v784_v51 = vpop.permute.xlu1 %783  ;;  %4460 = vmatprep.mubr.msk.f32.mxu1 %vm835_vm3, %v4233_v50  ;;  %v781_v52 = vpop.permute.xlu0 %780 }
  0xc0   : > { %vm799_vm2 = vcmp.eq.s32.totalorder %v781_v52, %v5299_v22  ;;  %vm800_vm4 = vcmp.eq.s32.totalorder %v784_v51, %v5299_v22  ;;  %v8210_v51 = vmov 0  ;;  %v8052_v52 = vand.u32 15, %v5410_v16 }
  0xc1   : > { %v4235_v54 = vsel %vm799_vm2, 1.0, %v8050_v25  ;;  %v4236_v55 = vsel %vm800_vm4, 1.0, %v8050_v25  ;;  %v8211_v51 = vsel %vm5503_vm13, 4294967295, %v8210_v51  ;;  %v4619_v25 = vpack.c.bf16 %v1611_v3, %v1610_v2 }
  0xc2   : > { %4461 = vmatmul.mubr.msk.f32.gmra.mrb[12].mxu1 %vm835_vm3, %v4234_v53  ;;  %8212 = vst [vmem:[#allocation14_spill] sm:$0xff] %v8211_v51  ;;  %v8057_v53 = vand.u32 15, %v5444_v33  ;;  %vm5547_vm15 = vcmp.lt.s32.totalorder %v8052_v52, 15 }
  0xc3   : > { %4463 = vmatprep.mubr.msk.f32.mxu1 %vm835_vm3, %v4235_v54  ;;  %4620 = vmatpush1.bf16.msra.mxu1 %v4619_v25 }
  0xc4   : > { %vm5589_vm1 = vcmp.ge.s32.totalorder %v8057_v53, 1  ;;  %4621 = vmatprep.subr.bf16.mxu1 %v8067_v58 }
  0xc6   : > { %4464 = vmatmul.mubr.msk.f32.gmra.mrb[14].mxu1 %vm835_vm3, %v4236_v55  ;;  %vm8097_vm3 = vcmp.lt.s32.totalorder %v5358_v60, 1  ;;  %v8055_v55 = vand.u32 15, %v5447_v34 }
  0xc8   : > { %vm5571_vm0 = vcmp.ge.s32.totalorder %v8055_v55, 1  ;;  %v5595_v55 = vadd.s32 104, %v5358_v60 }
  0xca   : > { %8226 = vst [vmem:[#allocation20_spill] sm:$0xff] %v5595_v55 }
 0x17d   : > { %v5406_v14 = vpop.f32.mrb[0].mxu1 }
 0x17e   : > { %v8061_v21 = vrot.slane %v5406_v14, 6  ;;  %v1115_v22 = vrot.slane %v5406_v14, 7  ;;  %v1196_v23 = vrot.slane %v5406_v14, 1  ;;  %v5428_v24 = vpop.f32.mrb[1].mxu1  ;;  %v8062_v26 = vrot.slane %v5406_v14, 2 }
 0x17f   : > { %v8063_v27 = vrot.slane %v5428_v24, 6  ;;  %v8066_v28 = vrot.slane %v5428_v24, 7  ;;  %v8065_v29 = vrot.slane %v5428_v24, 1  ;;  %v4792_v30 = vpack.i.bf16 %v5406_v14, %v5428_v24 }
 0x180   : > { %v8060_v32 = vrot.slane %v5428_v24, 2 }
 0x181   : > { %4793 = vrot.lane.b32.xlu1 %v4792_v30, %s8143_s22  ;;  %v5450_v36 = vpop.f32.mrb[2].mxu1  ;;  %v5456_v37 = vsel %vm8097_vm3, %v8066_v28, %v1115_v22  ;;  %v1226_v38 = vsel %vm8098_vm5, %v8065_v29, %v1196_v23  ;;  %v5483_v43 = vsel %vm8076_vm9, %v8063_v27, %v8061_v21  ;;  %v8064_v30 = vand.u32 15, %v5469_v40 }
 0x182   : > { %v1117_v44 = vrot.slane %v5450_v36, 7  ;;  %v1198_v45 = vrot.slane %v5450_v36, 1  ;;  %v5487_v46 = vpop.f32.mrb[3].mxu1  ;;  %v1307_v47 = vsel %vm8071_vm6, %v8060_v32, %v8062_v26 }
 0x183   : > { %v1116_v49 = vrot.slane %v5487_v46, 7  ;;  %v1197_v50 = vrot.slane %v5487_v46, 1  ;;  %4255 = vmatprep.mubr.msk.f32.mxu1 %vm8070_vm7, %v1307_v47  ;;  %v8216_v47 = vmov 0  ;;  %vm5630_vm2 = vcmp.lt.s32.totalorder %v8064_v30, 15 }
 0x184   : > { %v8217_v47 = vsel %vm5547_vm15, 4294967295, %v8216_v47  ;;  %v8234_v30 = vmov 0 }
 0x185   : > { %v5513_v57 = vpop.f32.mrb[4].mxu1  ;;  %v1143_v59 = vsel %vm8097_vm3, %v1116_v49, %v1117_v44  ;;  %v1144_v62 = vsel %vm8097_vm3, %v1115_v22, %v1116_v49  ;;  %v1224_v63 = vsel %vm8098_vm5, %v1197_v50, %v1198_v45  ;;  %v1225_v0 = vsel %vm8098_vm5, %v1196_v23, %v1197_v50  ;;  %8218 = vst [vmem:[#allocation16_spill] sm:$0xff] %v8217_v47 }
 0x186   : > { %v1119_v5 = vrot.slane %v5513_v57, 7  ;;  %v5530_v19 = vpop.f32.mrb[5].mxu1  ;;  %v1181_v20 = vsel %vm5399_vm8, %v1144_v62, 0.0  ;;  %v8069_v22 = vand.u32 15, %v5496_v48  ;;  %v8213_v23 = vmov 0 }
 0x187   : > { %v8214_v23 = vsel %vm5537_vm14, 4294967295, %v8213_v23  ;;  %v1200_v35 = vrot.slane %v5513_v57, 1  ;;  %v1118_v41 = vrot.slane %v5530_v19, 7  ;;  %v1199_v42 = vrot.slane %v5530_v19, 1 }
 0x188   : > { %8215 = vst [vmem:[#allocation15_spill] sm:$0xff] %v8214_v23  ;;  %v5552_v49 = vadd.s32 96, %v5358_v60  ;;  %v4807_v50 = vpack.i.bf16 %v1143_v59, %v1181_v20  ;;  %v4827_v56 = vpack.i.bf16 %v5513_v57, %v5530_v19  ;;  %v1261_v62 = vsel %vm5414_vm10, %v1225_v0, 0.0 }
 0x189   : > { %v5559_v15 = vpop.f32.mrb[6].mxu1  ;;  %v1223_v52 = vsel %vm8098_vm5, %v1198_v45, %v1199_v42  ;;  %v5563_v18 = vpack.i.bf16 %v1261_v62, %v1226_v38  ;;  %v1141_v13 = vsel %vm8097_vm3, %v1118_v41, %v1119_v5  ;;  %v1142_v59 = vsel %vm8097_vm3, %v1117_v44, %v1118_v41 }
 0x18a   : > { %8219 = vst [vmem:[#allocation17_spill] sm:$0xff] %v5552_v49  ;;  %v8220_v20 = vmov 0  ;;  %4808 = vrot.lane.b32.xlu1 %v4807_v50, %s8145_s29  ;;  %v1121_v0 = vrot.slane %v5559_v15, 7  ;;  %v1202_v38 = vrot.slane %v5559_v15, 1  ;;  %v5578_v45 = vpop.f32.mrb[7].mxu1  ;;  %v1263_v2 = vsel %vm5438_vm11, %v1223_v52, 0.0 }
 0x18b   : > { %v8221_v20 = vsel %vm5571_vm0, 4294967295, %v8220_v20  ;;  %v5583_v44 = vadd.s32 112, %v5358_v60  ;;  %v1120_v3 = vrot.slane %v5578_v45, 7  ;;  %v1201_v41 = vrot.slane %v5578_v45, 1 }
 0x18c   : > { %8222 = vst [vmem:[#allocation18_spill] sm:$0xff] %v8221_v20  ;;  %v8223_v50 = vmov 0  ;;  %v4817_v52 = vpack.i.bf16 %v1263_v2, %v1224_v63  ;;  %v1183_v25 = vsel %vm5464_vm12, %v1142_v59, 0.0  ;;  %v1222_v11 = vsel %vm8098_vm5, %v1199_v42, %v1200_v35  ;;  %v1612_v42 = vld [vmem:[%s8194_s2 + $0x60] sm:$0xff]  ;;  %v1613_v59 = vld [vmem:[%s8194_s2 + $0x68] sm:$0xff] }
 0x18d   : > { %v8224_v50 = vsel %vm5589_vm1, 4294967295, %v8223_v50  ;;  %v5604_v6 = vpop.f32.mrb[8].mxu1  ;;  %v1139_v9 = vsel %vm8097_vm3, %v1120_v3, %v1121_v0  ;;  %v1140_v32 = vsel %vm8097_vm3, %v1119_v5, %v1120_v3  ;;  %v1220_v63 = vsel %vm8098_vm5, %v1201_v41, %v1202_v38 }
 0x18e   : > { %8225 = vst [vmem:[#allocation19_spill] sm:$0xff] %v8224_v50  ;;  %v5612_v2 = vpack.i.bf16 %v1141_v13, %v1183_v25  ;;  %4818 = vrot.lane.b32.xlu1 %v4817_v52, %s8141_s21  ;;  %v1123_v53 = vrot.slane %v5604_v6, 7  ;;  %v5622_v54 = vpop.f32.mrb[9].mxu1  ;;  %v1185_v5 = vsel %vm5503_vm13, %v1140_v32, 0.0  ;;  %v8227_v25 = vmov 0 }
 0x18f   : > { %v8228_v25 = vsel %vm5630_vm2, 4294967295, %v8227_v25  ;;  %v1204_v21 = vrot.slane %v5604_v6, 1  ;;  %v1122_v52 = vrot.slane %v5622_v54, 7  ;;  %v1203_v26 = vrot.slane %v5622_v54, 1 }
 0x190   : > { %8229 = vst [vmem:[#allocation21_spill] sm:$0xff] %v8228_v25  ;;  %vm5639_vm4 = vcmp.lt.s32.totalorder %v8069_v22, 15  ;;  %v8230_v32 = vmov 0  ;;  %v4837_v27 = vpack.i.bf16 %v1139_v9, %v1185_v5  ;;  %v1221_v29 = vsel %vm8098_vm5, %v1200_v35, %v1201_v41 }
 0x191   : > { %v8231_v32 = vsel %vm5639_vm4, 4294967295, %v8230_v32  ;;  %v4622_v28 = vpack.c.bf16 %v1613_v59, %v1612_v42  ;;  %v5648_v58 = vpop.f32.mrb[10].mxu1  ;;  %v1219_v13 = vsel %vm8098_vm5, %v1202_v38, %v1203_v26  ;;  %v1265_v22 = vsel %vm5537_vm14, %v1221_v29, 0.0 }
 0x192   : > { %8232 = vst [vmem:[#allocation22_spill] sm:$0xff] %v8231_v32  ;;  %v1137_v62 = vsel %vm8097_vm3, %v1122_v52, %v1123_v53  ;;  %v1138_v9 = vsel %vm8097_vm3, %v1121_v0, %v1122_v52  ;;  %v8233_v5 = vand.u32 15, %v5552_v49  ;;  %4828 = vrot.lane.b32.xlu1 %v4827_v56, %s8143_s22  ;;  %v1125_v38 = vrot.slane %v5648_v58, 7  ;;  %v5668_v41 = vpop.f32.mrb[11].mxu1 }
 0x193   : > { %v1206_v29 = vrot.slane %v5648_v58, 1  ;;  %v1267_v42 = vsel %vm5547_vm15, %v1219_v13, 0.0  ;;  %v8237_v0 = vand.u32 15, %v5358_v60  ;;  %v8238_v59 = vmov 0  ;;  %4623 = vmatpush1.bf16.msra.mxu1 %v4622_v28 }
 0x194   : > { %vm5660_vm7 = vcmp.ge.s32.totalorder %v8233_v5, 1  ;;  %v1124_v5 = vrot.slane %v5668_v41, 7  ;;  %v1205_v35 = vrot.slane %v5668_v41, 1  ;;  %v8241_v3 = vmov 0.0|0.0  }
 0x195   : > { %v8235_v30 = vsel %vm5660_vm7, 4294967295, %v8234_v30  ;;  %vm5674_vm6 = vcmp.ge.s32.totalorder %v8237_v0, 1  ;;  %4624 = vmatprep.subr.bf16.mxu1 %v8241_v3  ;;  %v4847_v51 = vpack.i.bf16 %v1267_v42, %v1220_v63  ;;  %v5683_v39 = vpack.i.bf16 %v1265_v22, %v1222_v11  ;;  %v5695_v56 = vpop.f32.mrb[12].mxu1 }
 0x196   : > { %8236 = vst [vmem:[#allocation23_spill] sm:$0xff] %v8235_v30  ;;  %v8239_v59 = vsel %vm5674_vm6, 4294967295, %v8238_v59  ;;  %v1187_v13 = vsel %vm5571_vm0, %v1138_v9, 0.0  ;;  %v1218_v0 = vsel %vm8098_vm5, %v1203_v26, %v1204_v21  ;;  %v8242_v28 = vand.u32 15, %v5595_v55  ;;  %4838 = vrot.lane.b32.xlu1 %v4837_v27, %s8145_s29  ;;  %v5707_v9 = vpop.f32.mrb[13].mxu1 }
 0x197   : > { %8240 = vst [vmem:[#allocation24_spill] sm:$0xff] %v8239_v59  ;;  %v8243_v52 = vmov 0  ;;  %v1135_v12 = vsel %vm8097_vm3, %v1124_v5, %v1125_v38  ;;  %v1136_v11 = vsel %vm8097_vm3, %v1123_v53, %v1124_v5  ;;  %v1216_v22 = vsel %vm8098_vm5, %v1205_v35, %v1206_v29 }
 0x198   : > { %vm5691_vm9 = vcmp.lt.s32.totalorder %v8242_v28, 15  ;;  %v5703_v63 = vpack.i.bf16 %v1137_v62, %v1187_v13  ;;  %v1189_v42 = vsel %vm5589_vm1, %v1136_v11, 0.0  ;;  %v1127_v28 = vrot.slane %v5695_v56, 7 }
 0x199   : > { %v8244_v52 = vsel %vm5691_vm9, 4294967295, %v8243_v52  ;;  %v1208_v5 = vrot.slane %v5695_v56, 1  ;;  %v1126_v62 = vrot.slane %v5707_v9, 7  ;;  %v1207_v13 = vrot.slane %v5707_v9, 1  ;;  %v5723_v47 = vpop.f32.mrb[14].mxu1 }
 0x19a   : > { %8245 = vst [vmem:[#allocation25_spill] sm:$0xff] %v8244_v52  ;;  %v4867_v26 = vpack.i.bf16 %v1135_v12, %v1189_v42  ;;  %v1217_v50 = vsel %vm8098_vm5, %v1204_v21, %v1205_v35  ;;  %v1280_v27 = vrot.slane %v5530_v19, 2  ;;  %4848 = vrot.lane.b32.xlu1 %v4847_v51, %s8141_s21  ;;  %v1129_v21 = vrot.slane %v5723_v47, 7  ;;  %v5736_v35 = vpop.f32.mrb[15].mxu1 }
 0x19b   : > { %v1215_v53 = vsel %vm8098_vm5, %v1206_v29, %v1207_v13  ;;  %v1269_v20 = vsel %vm5630_vm2, %v1217_v50, 0.0  ;;  %v1133_v12 = vsel %vm8097_vm3, %v1126_v62, %v1127_v28  ;;  %v1134_v42 = vsel %vm8097_vm3, %v1125_v38, %v1126_v62  ;;  %v1614_v50 = vld [vmem:[%s8194_s2 + $0x70] sm:$0xff] }
 0x19c   : > { %v1271_v29 = vsel %vm5639_vm4, %v1215_v53, 0.0  ;;  %v1210_v11 = vrot.slane %v5723_v47, 1  ;;  %v1128_v38 = vrot.slane %v5736_v35, 7  ;;  %v8246_v62 = vrot.slane %v5428_v24, 7 }
 0x19d   : > { %v4877_v23 = vpack.i.bf16 %v1271_v29, %v1216_v22  ;;  %v1209_v31 = vrot.slane %v5736_v35, 1  ;;  %v5749_v17 = vpack.i.bf16 %v1269_v20, %v1218_v0  ;;  %v1191_v53 = vsel %vm5660_vm7, %v1134_v42, 0.0  ;;  %v1615_v22 = vld [vmem:[%s8194_s2 + $0x78] sm:$0xff] }
 0x19e   : > { %v1146_v51 = vsel %vm8097_vm3, %v1129_v21, %v8246_v62  ;;  %v5763_v62 = vsel %vm8097_vm3, %v1127_v28, %v1128_v38  ;;  %v5765_v20 = vpack.i.bf16 %v1133_v12, %v1191_v53  ;;  %v1214_v0 = vsel %vm8098_vm5, %v1207_v13, %v1208_v5  ;;  %v1616_v13 = vld [vmem:[%s8194_s2 + $0x80] sm:$0xff]  ;;  %v1617_v12 = vld [vmem:[%s8194_s2 + $0x88] sm:$0xff] }
 0x19f   : > { %v1179_v29 = vsel %vm5674_vm6, %v1146_v51, 0.0  ;;  %v8247_v25 = vpack.i.bf16 %v5604_v6, %v5622_v54  ;;  %v5777_v51 = vsel %vm8098_vm5, %v1209_v31, %v1210_v11  ;;  %v1213_v28 = vsel %vm8098_vm5, %v1208_v5, %v1209_v31 }
 0x1a0   : > { %v4797_v30 = vpack.i.bf16 %v5456_v37, %v1179_v29  ;;  %v5791_v37 = vsel %vm8097_vm3, %v1128_v38, %v1129_v21  ;;  %v8248_v53 = vrot.slane %v5428_v24, 1  ;;  %v4625_v5 = vpack.c.bf16 %v1615_v22, %v1614_v50 }
 0x1a1   : > { %4858 = vrot.lane.b32.xlu1 %v8247_v25, %s8143_s22  ;;  %v1273_v25 = vsel %vm5691_vm9, %v1213_v28, 0.0  ;;  %v1039_v29 = vrot.slane %v5578_v45, 6  ;;  %v1046_v42 = vrot.slane %v5695_v56, 6  ;;  %v8249_v28 = vrot.slane %v5428_v24, 6 }
 0x1a2   : > { %v5797_v31 = vsel %vm8098_vm5, %v1210_v11, %v8248_v53  ;;  %4798 = vrot.lane.b32.xlu0 %v4797_v30, %s8145_s29  ;;  %v5802_v59 = vpack.i.bf16 %v1273_v25, %v1214_v0  ;;  %v8250_v21 = vrot.slane %v5723_v47, 6  ;;  %vm8251_vm3 = vcmp.lt.s32.totalorder %v5358_v60, 2  ;;  %4626 = vmatpush1.bf16.msra.mxu1 %v4625_v5  ;;  %v1618_v30 = vld [vmem:[%s8194_s2 + $0x90] sm:$0xff]  ;;  %v1619_v0 = vld [vmem:[%s8194_s2 + $0x98] sm:$0xff]  ;;  %s8409_s2 = smov 32  }
 0x1a3   : > { %v1282_v11 = vrot.slane %v5578_v45, 2  ;;  %v1042_v50 = vrot.slane %v5604_v6, 6  ;;  %v1041_v22 = vrot.slane %v5622_v54, 6  ;;  %v4628_v53 = vpack.c.bf16 %v1617_v12, %v1616_v13  ;;  %4627 = vmatprep.subr.bf16.mxu1 %v8241_v3 }
 0x1a4   : > { %v5810_v38 = vsel %vm8251_vm3, %v8250_v21, %v8249_v28  ;;  %v8252_v25 = vrot.slane %v5487_v46, 2  ;;  %v8253_v28 = vrot.slane %v5406_v14, 2  ;;  %vm8254_vm3 = vcmp.lt.s32.totalorder %v5358_v60, 6 }
 0x1a5   : > { %4868 = vrot.lane.b32.xlu1 %v4867_v26, %s8145_s29  ;;  %v8255_v13 = vrot.slane %v5450_v36, 2  ;;  %vm8257_vm5 = vmmov %vm8254_vm3  ;;  %v8258_v26 = vrot.slane %v5736_v35, 6  ;;  %vm8259_vm7 = vcmp.lt.s32.totalorder %v5358_v60, 2  ;;  %v1281_v32 = vrot.slane %v5513_v57, 2 }
 0x1a6   : > { %v5829_v5 = vsel %vm8254_vm3, %v8253_v28, %v8252_v25  ;;  %v8256_v12 = vmov %v8252_v25  ;;  %v1284_v55 = vrot.slane %v5622_v54, 2  ;;  %v1043_v25 = vrot.slane %v5668_v41, 6  ;;  %vm8263_vm3 = vmmov %vm8259_vm7  ;;  %4803 = vrot.lane.b32.xlu0 %v5563_v18, %s8141_s21  ;;  %4629 = vmatpush1.bf16.msra.mxu1 %v4628_v53 }
 0x1a7   : > { %v5837_v21 = vsel %vm8257_vm5, %v8256_v12, %v8255_v13  ;;  %v5843_v52 = vsel %vm8259_vm7, %v1046_v42, %v8258_v26  ;;  %v8261_v28 = vrot.slane %v5487_v46, 6  ;;  %v8262_v49 = vrot.slane %v5406_v14, 6  ;;  %vm8267_vm7 = vmmov %vm8263_vm3  ;;  %4630 = vmatprep.subr.bf16.mxu1 %v8241_v3 }
 0x1a8   : > { %8260 = vst [vmem:[#allocation26_spill] sm:$0xff] %v5843_v52  ;;  %v8264_v12 = vrot.slane %v5450_v36, 2  ;;  %v1286_v52 = vrot.slane %v5668_v41, 2  ;;  %v4631_v54 = vpack.c.bf16 %v1619_v0, %v1618_v30  ;;  %v8265_v48 = vrot.slane %v5450_v36, 6 }
 0x1a9   : > { %v5854_v13 = vsel %vm8263_vm3, %v8262_v49, %v8261_v28  ;;  %v8266_v14 = vmov %v8261_v28  ;;  %vm8268_vm3 = vmmov %vm8257_vm5  ;;  %v1283_v53 = vrot.slane %v5559_v15, 2  ;;  %v1045_v40 = vrot.slane %v5707_v9, 6  ;;  %4878 = vrot.lane.b32.xlu1 %v4877_v23, %s8141_s21 }
 0x1aa   : > { %v5860_v26 = vsel %vm8257_vm5, %v8264_v12, %v1280_v27  ;;  %v5871_v49 = vsel %vm8267_vm7, %v8266_v14, %v8265_v48  ;;  %v5875_v28 = vsel %vm8268_vm3, %v1280_v27, %v1281_v32  ;;  %v8269_v12 = vrot.slane %v5530_v19, 6  ;;  %vm8271_vm5 = vmmov %vm8267_vm7  ;;  %4632 = vmatpush1.bf16.msra.mxu1 %v4631_v54 }
 0x1ab   : > { %v8270_v33 = vmov %v8265_v48  ;;  %vm8272_vm1 = vmmov %vm8268_vm3  ;;  %v8273_v48 = vrot.slane %v5513_v57, 6  ;;  %v1044_v14 = vrot.slane %v5648_v58, 6  ;;  %v8278_v19 = vrot.slane %v5559_v15, 6 }
 0x1ac   : > { %v5883_v18 = vsel %vm8271_vm5, %v8270_v33, %v8269_v12  ;;  %v5887_v30 = vsel %vm8272_vm1, %v1281_v32, %v1282_v11  ;;  %v8274_v0 = vmov %v8269_v12  ;;  %vm8275_vm7 = vmmov %vm8271_vm5  ;;  %v1285_v57 = vrot.slane %v5604_v6, 2 }
 0x1ad   : > { %v5895_v27 = vsel %vm8275_vm7, %v8274_v0, %v8273_v48  ;;  %v8276_v33 = vmov %v8273_v48  ;;  %vm8277_vm1 = vmmov %vm8271_vm5  ;;  %v1288_v48 = vrot.slane %v5707_v9, 2  ;;  %vm8280_vm5 = vcmp.lt.s32.totalorder %v5358_v60, 6 }
 0x1ae   : > { %v5906_v32 = vsel %vm8277_vm1, %v8276_v33, %v1039_v29  ;;  %vm8279_vm3 = vmmov %vm8277_vm1  ;;  %v5917_v0 = vsel %vm8280_vm5, %v1282_v11, %v1283_v53  ;;  %v8282_v33 = vpack.i.bf16 %v5450_v36, %v5487_v46  ;;  %v1290_v3 = vrot.slane %v5736_v35, 2 }
 0x1af   : > { %v5912_v12 = vsel %vm8279_vm3, %v1039_v29, %v8278_v19  ;;  %vm8281_vm7 = vmmov %vm8280_vm5  ;;  %v8283_v29 = vmov %v8278_v19  ;;  %v5942_v6 = vsel %vm8280_vm5, %v1284_v55, %v1285_v57  ;;  %v5950_v46 = vsel %vm8277_vm1, %v1042_v50, %v1043_v25 }
 0x1b0   : > { %v5921_v23 = vsel %vm8281_vm7, %v1283_v53, %v1284_v55  ;;  %4813 = vrot.lane.b32.xlu0 %v8282_v33, %s8143_s22  ;;  %v5932_v19 = vsel %vm8277_vm1, %v8283_v29, %v1041_v22  ;;  %vm8284_vm3 = vmmov %vm8277_vm1  ;;  %v1287_v53 = vrot.slane %v5648_v58, 2  ;;  %v8287_v33 = vand.u32 15, %v5583_v44 }
 0x1b1   : > { %v5936_v11 = vsel %vm8284_vm3, %v1041_v22, %v1042_v50  ;;  %vm8285_vm7 = vmmov %vm8280_vm5  ;;  %v8286_v22 = vpack.i.bf16 %v5695_v56, %v5707_v9  ;;  %v8288_v54 = vmov 0  ;;  %v8292_v50 = vrot.slane %v5736_v35, 6 }
 0x1b2   : > { %v5946_v36 = vsel %vm8285_vm7, %v1285_v57, %v1286_v52  ;;  %vm5958_vm3 = vcmp.ge.s32.totalorder %v8287_v33, 1  ;;  %v5964_v55 = vsel %vm8280_vm5, %v1286_v52, %v1287_v53  ;;  %v8291_v57 = vrot.slane %v5723_v47, 6  ;;  %vm8293_vm7 = vmmov %vm8277_vm1 }
 0x1b3   : > { %4888 = vrot.lane.b32.xlu1 %v8286_v22, %s8143_s22  ;;  %v8289_v54 = vsel %vm5958_vm3, 4294967295, %v8288_v54  ;;  %vm8294_vm1 = vmmov %vm8280_vm5  ;;  %v1289_v33 = vrot.slane %v5695_v56, 2  ;;  %vm8318_vm12 = vcmask 523264  }
 0x1b4   : > { %8290 = vst [vmem:[#allocation27_spill] sm:$0xff] %v8289_v54  ;;  %v5972_v29 = vsel %vm8293_vm7, %v8292_v50, %v8291_v57  ;;  %v5976_v9 = vsel %vm8294_vm1, %v1287_v53, %v1288_v48  ;;  %vm8295_vm0 = vmmov %vm8293_vm7  ;;  %4823 = vrot.lane.b32.xlu0 %v5612_v2, %s8145_s29  ;;  %v1291_v53 = vrot.slane %v5723_v47, 2  ;;  %v8301_v2 = vrot.slane %v5428_v24, 2 }
 0x1b5   : > { %v5980_v22 = vsel %vm8295_vm0, %v1043_v25, %v1044_v14  ;;  %vm8296_vm5 = vmmov %vm8295_vm0  ;;  %v1193_v25 = vsel %vm5958_vm3, %v5763_v62, 0.0  ;;  %v8303_v62 = vpack.i.bf16 %v5559_v15, %v5578_v45  ;;  %v8304_v24 = vpack.i.bf16 %v5648_v58, %v5668_v41 }
 0x1b6   : > { %v5985_v52 = vsel %vm8296_vm5, %v1044_v14, %v1045_v40  ;;  %vm8297_vm7 = vmmov %vm8295_vm0  ;;  %v6039_v15 = vadd.s32 120, %v5358_v60  ;;  %v8305_v58 = vmov 0  ;;  %v8308_v41 = vmov 0 }
 0x1b7   : > { %v5991_v57 = vsel %vm8297_vm7, %v1045_v40, %v1046_v42  ;;  %vm8298_vm0 = vmmov %vm8294_vm1  ;;  %1401 = vrot.lane.b32.xlu1 %v1193_v25, %s8145_s29  ;;  %vm8135_vm3 = vcmask 785408  }
 0x1b8   : > { %v5999_v56 = vsel %vm8298_vm0, %v1288_v48, %v1289_v33  ;;  %vm8299_vm1 = vmmov %vm8298_vm0  ;;  %4833 = vrot.lane.b32.xlu0 %v5683_v39, %s8141_s21  ;;  %v652_v39 = vand.u32 15, %v6039_v15 }
 0x1b9   : > { %v6003_v14 = vsel %vm8299_vm1, %v1289_v33, %v1290_v3  ;;  %vm8300_vm5 = vmmov %vm8298_vm0  ;;  %v8311_v33 = vand.u32 15, %v5373_v1 }
 0x1ba   : > { %v6008_v40 = vsel %vm8300_vm5, %v1290_v3, %v1291_v53  ;;  %vm8302_vm7 = vmmov %vm8298_vm0  ;;  %vm6048_vm0 = vcmp.lt.s32.totalorder %v652_v39, 15  ;;  %v8307_v3 = vand.u32 15, %v5358_v60  ;;  %vm8310_vm5 = vcmask 261120  }
 0x1bb   : > { %v6014_v42 = vsel %vm8302_vm7, %v1291_v53, %v8301_v2  ;;  %1529 = vrot.lane.b32.xlu1 %v5777_v51, %s8141_s21  ;;  %v8306_v58 = vsel %vm6048_vm0, 4294967295, %v8305_v58  ;;  %vm8120_vm7 = vcmask 523264   ;;  %vm6068_vm13 = vcmp.lt.s32.totalorder %v8311_v33, 14  ;;  %vm8319_vm8 = vmmov %vm8318_vm12 }
 0x1bc   : > { %4843 = vrot.lane.b32.xlu0 %v8303_v62, %s8143_s22  ;;  %vm6058_vm1 = vcmp.ge.s32.totalorder %v8307_v3, 2  ;;  %v8312_v53 = vmov 0  ;;  %v8314_v2 = vand.u32 15, %v5361_v61 }
 0x1bd   : > { %v8309_v41 = vsel %vm6058_vm1, 4294967295, %v8308_v41  ;;  %v8313_v53 = vsel %vm6068_vm13, 4294967295, %v8312_v53 }
 0x1bf   : > { %1467 = vrot.lane.b32.xlu1 %v5723_v47, %s8143_s22 }
 0x1c0   : > { %4853 = vrot.lane.b32.xlu0 %v5703_v63, %s8145_s29 }
 0x1c4   : > { %4863 = vrot.lane.b32.xlu0 %v5749_v17, %s8141_s21  ;;  %v1275_v17 = vsel %vm6048_vm0, %v5797_v31, 0.0 }
 0x1c8   : > { %4873 = vrot.lane.b32.xlu0 %v8304_v24, %s8143_s22 }
 0x1cc   : > { %4883 = vrot.lane.b32.xlu0 %v5765_v20, %s8145_s29 }
 0x1d0   : > { %4893 = vrot.lane.b32.xlu0 %v5802_v59, %s8141_s21 }
 0x1d4   : > { %1465 = vrot.lane.b32.xlu0 %v5736_v35, %s8143_s22  ;;  %v1098_v35 = vsel %vm6058_vm1, %v5810_v38, 0.0  ;;  %vm6075_vm1 = vcmp.ge.s32.totalorder %v8314_v2, 2  ;;  %v8315_v38 = vmov 0  ;;  %v8322_v2 = vmov 0  ;;  %s8527_s22 = smov 96  }
 0x1d5   : > { %v8316_v38 = vsel %vm6075_vm1, 4294967295, %v8315_v38 }
 0x1d8   : > { %1403 = vrot.lane.b32.xlu0 %v5791_v37, %s8145_s29 }
 0x1dc   : > { %1531 = vrot.lane.b32.xlu0 %v1275_v17, %s8141_s21  ;;  %s517_s21 = sand.u32 1, %s5115_s24  }
 0x1dd   : > { %s4147_s27 = scalar_lea.sflag [#allocation4], %s517_s21 }
 0x1f3   : > { %v4794_v47 = vpop.permute.xlu1 %4793 }
 0x1f4   : > { %v4795_v37 = vunpack.i.l.bf16 %v4794_v47  ;;  %v4796_v1 = vunpack.i.h.bf16 %v4794_v47 }
 0x1fc   : > { %v4809_v45 = vpop.permute.xlu1 %4808 }
 0x1fd   : > { %v4810_v62 = vunpack.i.l.bf16 %v4809_v45 }
 0x200   : > { %v4819_v48 = vpop.permute.xlu1 %4818 }
 0x201   : > { %v4820_v33 = vunpack.i.l.bf16 %v4819_v48 }
 0x214   : > { %v4799_v59 = vpop.permute.xlu0 %4798 }
 0x215   : > { %v4800_v63 = vunpack.i.l.bf16 %v4799_v59  ;;  %v4801_v20 = vunpack.i.h.bf16 %v4799_v59 }
 0x217   : > { %v1550_v51 = vsel %vm8310_vm5, %v1098_v35, %v4800_v63  ;;  %v1551_v3 = vsel %vm8310_vm5, %v5483_v43, %v4801_v20  ;;  %v1342_v63 = vsel %vm6068_vm13, %v5829_v5, 0.0 }
 0x218   : > { %v4804_v31 = vpop.permute.xlu0 %4803  ;;  %v1567_v25 = vsel %vm8120_vm7, %v1550_v51, %v4795_v37  ;;  %vm8317_vm7 = vmmov %vm8310_vm5  ;;  %v1568_v61 = vsel %vm8318_vm12, %v1551_v3, %v4796_v1  ;;  %v1100_v51 = vsel %vm6075_vm1, %v5854_v13, 0.0  ;;  %v4811_v37 = vunpack.i.h.bf16 %v4809_v45 }
 0x219   : > { %v4805_v50 = vunpack.i.l.bf16 %v4804_v31  ;;  %v4806_v24 = vunpack.i.h.bf16 %v4804_v31  ;;  %v4829_v31 = vpop.permute.xlu1 %4828  ;;  %v1552_v47 = vsel %vm8310_vm5, %v1100_v51, %v4810_v62  ;;  %v4821_v1 = vunpack.i.h.bf16 %v4819_v48 }
 0x21a   : > { %v1553_v62 = vsel %vm8310_vm5, %v5871_v49, %v4811_v37  ;;  %v4830_v51 = vunpack.i.l.bf16 %v4829_v31  ;;  %v8332_v48 = vmov 0 }
 0x21b   : > { %v1584_v17 = vsel %vm8135_vm3, %v1567_v25, %v4805_v50  ;;  %v1585_v43 = vsel %vm8135_vm3, %v1568_v61, %v4806_v24  ;;  %v8321_v25 = vand.u32 15, %v5379_v4  ;;  %v8325_v24 = vand.u32 15, %v5383_v7 }
 0x21c   : > { %1740 = vmatmul.mubr.f32.vlgmr.msra.gmra.mrb[16].mxu1 %v1584_v17  ;;  %v8326_v17 = vmov 0 }
 0x21d   : > { %4256 = vmatprep.mubr.msk.f32.mxu1 %vm8317_vm7, %v1342_v63  ;;  %vm8320_vm7 = vmmov %vm8310_vm5  ;;  %vm6097_vm12 = vcmp.lt.s32.totalorder %v8321_v25, 14  ;;  %vm6106_vm1 = vcmp.ge.s32.totalorder %v8325_v24, 2 }
 0x21e   : > { %v8323_v2 = vsel %vm6097_vm12, 4294967295, %v8322_v2  ;;  %v8327_v17 = vsel %vm6106_vm1, 4294967295, %v8326_v17  ;;  %v1344_v4 = vsel %vm6097_vm12, %v5860_v26, 0.0  ;;  %v1102_v7 = vsel %vm6106_vm1, %v5883_v18, 0.0  ;;  %vm8330_vm12 = vmmov %vm8310_vm5 }
 0x21f   : > { %8324 = vst [vmem:[#allocation28_spill] sm:$0xff] %v8323_v2  ;;  %8328 = vst [vmem:[#allocation29_spill] sm:$0xff] %v8327_v17  ;;  %v8331_v26 = vand.u32 15, %v5391_v10 }
 0x220   : > { %1745 = vmatmul.mubr.f32.gmra.mrb[18].mxu1 %v1585_v43  ;;  %v8336_v43 = vand.u32 15, %v5387_v8 }
 0x221   : > { %4257 = vmatprep.mubr.msk.f32.mxu1 %vm8320_vm7, %v5837_v21  ;;  %vm8329_vm7 = vmmov %vm8310_vm5 }
 0x222   : > { %v4814_v59 = vpop.permute.xlu0 %4813  ;;  %vm6131_vm1 = vcmp.ge.s32.totalorder %v8336_v43, 2 }
 0x223   : > { %v4815_v35 = vunpack.i.l.bf16 %v4814_v59  ;;  %v4816_v20 = vunpack.i.h.bf16 %v4814_v59  ;;  %v4839_v59 = vpop.permute.xlu1 %4838 }
 0x224   : > { %v4841_v24 = vunpack.i.h.bf16 %v4839_v59 }
 0x225   : > { %v1569_v5 = vsel %vm8319_vm8, %v1552_v47, %v4815_v35  ;;  %v1570_v21 = vsel %vm8319_vm8, %v1553_v62, %v4816_v20  ;;  %vm6124_vm8 = vcmp.lt.s32.totalorder %v8331_v26, 14  ;;  %v8337_v47 = vmov 0 }
 0x226   : > { %v4824_v50 = vpop.permute.xlu0 %4823  ;;  %v1586_v45 = vsel %vm8135_vm3, %v1569_v5, %v4820_v33  ;;  %v1587_v35 = vsel %vm8135_vm3, %v1570_v21, %v4821_v1  ;;  %v8333_v48 = vsel %vm6124_vm8, 4294967295, %v8332_v48  ;;  %v8338_v47 = vsel %vm6131_vm1, 4294967295, %v8337_v47 }
 0x227   : > { %v4825_v13 = vunpack.i.l.bf16 %v4824_v50  ;;  %1750 = vmatmul.mubr.f32.gmra.mrb[20].mxu1 %v1586_v45  ;;  %v4826_v49 = vunpack.i.h.bf16 %v4824_v50  ;;  %8334 = vst [vmem:[#allocation30_spill] sm:$0xff] %v8333_v48  ;;  %8339 = vst [vmem:[#allocation31_spill] sm:$0xff] %v8338_v47  ;;  %v4840_v20 = vunpack.i.l.bf16 %v4839_v59  ;;  %v4849_v50 = vpop.permute.xlu1 %4848  ;;  %v1346_v8 = vsel %vm6124_vm8, %v5887_v30, 0.0 }
 0x228   : > { %4258 = vmatprep.mubr.msk.f32.mxu1 %vm8329_vm7, %v1344_v4  ;;  %vm8335_vm7 = vcmask 523264   ;;  %v1104_v62 = vsel %vm6131_vm1, %v5906_v32, 0.0  ;;  %v4850_v1 = vunpack.i.l.bf16 %v4849_v50 }
 0x229   : > { %v1554_v61 = vsel %vm8310_vm5, %v1102_v7, %v4825_v13  ;;  %vm8342_vm13 = vmmov %vm8335_vm7  ;;  %v8343_v7 = vand.u32 15, %v5410_v16 }
 0x22a   : > { %v4834_v3 = vpop.permute.xlu0 %4833  ;;  %v1571_v18 = vsel %vm8335_vm7, %v1554_v61, %v4830_v51  ;;  %v8349_v61 = vmov 0  ;;  %v4851_v51 = vunpack.i.h.bf16 %v4849_v50 }
 0x22b   : > { %v4835_v63 = vunpack.i.l.bf16 %v4834_v3  ;;  %1755 = vmatmul.mubr.f32.gmra.mrb[22].mxu1 %v1587_v35  ;;  %v4836_v5 = vunpack.i.h.bf16 %v4834_v3  ;;  %v4859_v30 = vpop.permute.xlu1 %4858  ;;  %v8348_v35 = vand.u32 15, %v5447_v34 }
 0x22c   : > { %4259 = vmatprep.mubr.msk.f32.mxu1 %vm8330_vm12, %v5875_v28  ;;  %vm8340_vm12 = vmmov %vm8310_vm5  ;;  %v4831_v28 = vunpack.i.h.bf16 %v4829_v31 }
 0x22d   : > { %v1588_v33 = vsel %vm8135_vm3, %v1571_v18, %v4835_v63  ;;  %v1555_v10 = vsel %vm8340_vm12, %v5895_v27, %v4826_v49  ;;  %vm8341_vm12 = vmmov %vm8310_vm5  ;;  %v8344_v49 = vmov 0 }
 0x22e   : > { %v4844_v37 = vpop.permute.xlu0 %4843  ;;  %v1572_v45 = vsel %vm8335_vm7, %v1555_v10, %v4831_v28  ;;  %v1556_v27 = vsel %vm8341_vm12, %v1104_v62, %v4840_v20  ;;  %vm6153_vm7 = vcmp.lt.s32.totalorder %v8343_v7, 14  ;;  %vm8347_vm12 = vmmov %vm8310_vm5  ;;  %v8361_v10 = vld [vmem:[#allocation10_spill] sm:$0xff]  ;;  %v4861_v62 = vunpack.i.h.bf16 %v4859_v30 }
 0x22f   : > { %v4845_v25 = vunpack.i.l.bf16 %v4844_v37  ;;  %1760 = vmatmul.mubr.f32.gmra.mrb[24].mxu1 %v1588_v33  ;;  %v1589_v3 = vsel %vm8135_vm3, %v1572_v45, %v4836_v5  ;;  %v4846_v31 = vunpack.i.h.bf16 %v4844_v37  ;;  %v8345_v49 = vsel %vm6153_vm7, 4294967295, %v8344_v49  ;;  %vm8353_vm1 = vmmov %vm8347_vm12  ;;  %v4869_v34 = vpop.permute.xlu1 %4868 }
 0x230   : > { %4260 = vmatprep.mubr.msk.f32.mxu1 %vm8310_vm5, %v1346_v8  ;;  %8346 = vst [vmem:[#allocation32_spill] sm:$0xff] %v8345_v49  ;;  %v1557_v63 = vsel %vm8347_vm12, %v5912_v12, %v4841_v24  ;;  %v1348_v16 = vsel %vm6153_vm7, %v5921_v23, 0.0  ;;  %vm8354_vm12 = vmmov %vm8353_vm1  ;;  %v4860_v5 = vunpack.i.l.bf16 %v4859_v30  ;;  %v8356_v23 = vld [vmem:[#allocation12_spill] sm:$0xff]  ;;  %v8358_v33 = vmov 0 }
 0x231   : > { %v1573_v21 = vsel %vm8342_vm13, %v1556_v27, %v4845_v25  ;;  %vm6162_vm13 = vcmp.ge.s32.totalorder %v8348_v35, 2  ;;  %vm8355_vm7 = vmmov %vm8353_vm1  ;;  %v8357_v50 = vand.u32 15, %v8356_v23  ;;  %v8362_v28 = vand.u32 15, %v8361_v10 }
 0x232   : > { %v4854_v13 = vpop.permute.xlu0 %4853  ;;  %v1590_v59 = vsel %vm8135_vm3, %v1573_v21, %v4850_v1  ;;  %v8350_v61 = vsel %vm6162_vm13, 4294967295, %v8349_v61  ;;  %v1106_v12 = vsel %vm6162_vm13, %v5932_v19, 0.0  ;;  %v8363_v25 = vmov 0 }
 0x233   : > { %1765 = vmatmul.mubr.f32.gmra.mrb[26].mxu1 %v1589_v3  ;;  %v4855_v32 = vunpack.i.l.bf16 %v4854_v13  ;;  %8351 = vst [vmem:[#allocation33_spill] sm:$0xff] %v8350_v61  ;;  %v4856_v26 = vunpack.i.h.bf16 %v4854_v13  ;;  %vm6187_vm13 = vcmp.ge.s32.totalorder %v8362_v28, 2  ;;  %v4870_v13 = vunpack.i.l.bf16 %v4869_v34 }
 0x234   : > { %4261 = vmatprep.mubr.msk.f32.mxu1 %vm8310_vm5, %v5917_v0  ;;  %vm8352_vm5 = vcmask 523264   ;;  %v8364_v25 = vsel %vm6187_vm13, 4294967295, %v8363_v25  ;;  %v4871_v1 = vunpack.i.h.bf16 %v4869_v34  ;;  %v8371_v35 = vmov 0 }
 0x235   : > { %v1574_v0 = vsel %vm8352_vm5, %v1557_v63, %v4846_v31  ;;  %v1558_v20 = vsel %vm8354_vm12, %v1106_v12, %v4855_v32  ;;  %8365 = vst [vmem:[#allocation10_spill] sm:$0xff] %v8364_v25  ;;  %v4879_v31 = vpop.permute.xlu1 %4878  ;;  %vm8366_vm12 = vmmov %vm8355_vm7  ;;  %v8375_v12 = vld [vmem:[#allocation17_spill] sm:$0xff] }
 0x236   : > { %v4864_v4 = vpop.permute.xlu0 %4863  ;;  %v1591_v43 = vsel %vm8135_vm3, %v1574_v0, %v4851_v51  ;;  %v1575_v19 = vsel %vm8352_vm5, %v1558_v20, %v4860_v5  ;;  %vm8367_vm8 = vmmov %vm8352_vm5  ;;  %v8376_v34 = vand.u32 15, %v8375_v12 }
 0x237   : > { %1770 = vmatmul.mubr.f32.gmra.mrb[28].mxu1 %v1590_v59  ;;  %v4865_v18 = vunpack.i.l.bf16 %v4864_v4  ;;  %v4866_v8 = vunpack.i.h.bf16 %v4864_v4  ;;  %v1108_v4 = vsel %vm6187_vm13, %v5950_v46, 0.0  ;;  %v4880_v59 = vunpack.i.l.bf16 %v4879_v31 }
 0x238   : > { %4262 = vmatprep.mubr.msk.f32.mxu1 %vm8353_vm1, %v1348_v16  ;;  %vm6180_vm1 = vcmp.lt.s32.totalorder %v8357_v50, 14  ;;  %v1560_v30 = vsel %vm8355_vm7, %v1108_v4, %v4870_v13 }
 0x239   : > { %v8359_v33 = vsel %vm6180_vm1, 4294967295, %v8358_v33  ;;  %v1592_v45 = vsel %vm8135_vm3, %v1575_v19, %v4865_v18  ;;  %v1350_v27 = vsel %vm6180_vm1, %v5946_v36, 0.0  ;;  %vm8368_vm1 = vmmov %vm8355_vm7  ;;  %v8369_v36 = vld [vmem:[#allocation13_spill] sm:$0xff]  ;;  %v4889_v16 = vpop.permute.xlu1 %4888 }
 0x23a   : > { %v4874_v37 = vpop.permute.xlu0 %4873  ;;  %8360 = vst [vmem:[#allocation12_spill] sm:$0xff] %v8359_v33  ;;  %v8370_v63 = vand.u32 15, %v8369_v36  ;;  %v4890_v19 = vunpack.i.l.bf16 %v4889_v16 }
 0x23b   : > { %1775 = vmatmul.mubr.f32.gmra.mrb[30].mxu1 %v1591_v43  ;;  %v4875_v24 = vunpack.i.l.bf16 %v4874_v37  ;;  %v4876_v7 = vunpack.i.h.bf16 %v4874_v37  ;;  %v4881_v43 = vunpack.i.h.bf16 %v4879_v31  ;;  %v8396_v31 = vld [vmem:[#allocation26_spill] sm:$0xff] }
 0x23c   : > { %4263 = vmatprep.mubr.msk.f32.mxu1 %vm8355_vm7, %v5942_v6  ;;  %v1559_v6 = vsel %vm8355_vm7, %v5936_v11, %v4856_v26  ;;  %v8377_v26 = vmov 0 }
 0x23d   : > { %v1576_v21 = vsel %vm8352_vm5, %v1559_v6, %v4861_v62  ;;  %v1577_v32 = vsel %vm8367_vm8, %v1560_v30, %v4875_v24  ;;  %vm8374_vm5 = vmmov %vm8368_vm1  ;;  %vm6218_vm8 = vcmp.ge.s32.totalorder %v8376_v34, 2  ;;  %v1402_v28 = vpop.permute.xlu1 %1401  ;;  %v8390_v6 = vmov 0  ;;  %v2082_v34 = vld [vmem:[%s8407_s4 + $0x30] sm:$0xff] }
 0x23e   : > { %v4884_v3 = vpop.permute.xlu0 %4883  ;;  %v1593_v11 = vsel %vm8135_vm3, %v1576_v21, %v4866_v8  ;;  %v1594_v51 = vsel %vm8135_vm3, %v1577_v32, %v4880_v59  ;;  %v1561_v37 = vsel %vm8374_vm5, %v5980_v22, %v4871_v1  ;;  %v8378_v26 = vsel %vm6218_vm8, 4294967295, %v8377_v26  ;;  %vm8381_vm7 = vmmov %vm8374_vm5 }
 0x23f   : > { %1780 = vmatmul.mubr.f32.gmra.mrb[32].mxu1 %v1592_v45  ;;  %v4885_v0 = vunpack.i.l.bf16 %v4884_v3  ;;  %8379 = vst [vmem:[#allocation17_spill] sm:$0xff] %v8378_v26  ;;  %v1110_v22 = vsel %vm6218_vm8, %v5985_v52, 0.0  ;;  %v4886_v20 = vunpack.i.h.bf16 %v4884_v3  ;;  %v8385_v8 = vmov 0 }
 0x240   : > { %4264 = vmatprep.mubr.msk.f32.mxu1 %vm8366_vm12, %v1350_v27  ;;  %vm6209_vm12 = vcmp.lt.s32.totalorder %v8370_v63, 14  ;;  %v8389_v45 = vand.u32 15, %v5583_v44  ;;  %v4891_v3 = vunpack.i.h.bf16 %v4889_v16  ;;  %v2079_v16 = vld [vmem:[%s8407_s4 + $0x18] sm:$0xff] }
 0x241   : > { %v8372_v35 = vsel %vm6209_vm12, 4294967295, %v8371_v35  ;;  %v1562_v50 = vsel %vm8374_vm5, %v1110_v22, %v4885_v0  ;;  %v2085_v22 = vld [vmem:[%s8407_s4 + $0x48] sm:$0xff] }
 0x242   : > { %8373 = vst [vmem:[#allocation13_spill] sm:$0xff] %v8372_v35  ;;  %v4894_v46 = vpop.permute.xlu0 %4893 }
 0x243   : > { %1785 = vmatmul.mubr.f32.gmra.mrb[34].mxu1 %v1593_v11  ;;  %v4895_v5 = vunpack.i.l.bf16 %v4894_v46  ;;  %v4896_v62 = vunpack.i.h.bf16 %v4894_v46  ;;  %v1530_v11 = vpop.permute.xlu1 %1529 }
 0x244   : > { %4265 = vmatprep.mubr.msk.f32.mxu1 %vm8368_vm1, %v5964_v55  ;;  %v1352_v55 = vsel %vm6209_vm12, %v5976_v9, 0.0  ;;  %vm8380_vm1 = vcmask 523264   ;;  %vm8382_vm12 = vmmov %vm8374_vm5  ;;  %v8383_v9 = vld [vmem:[#allocation20_spill] sm:$0xff]  ;;  %vm8393_vm5 = vcmask 785408  }
 0x245   : > { %v1578_v18 = vsel %vm8380_vm1, %v1561_v37, %v4876_v7  ;;  %v8384_v13 = vand.u32 15, %v8383_v9  ;;  %vm8394_vm8 = vmmov %vm8382_vm12  ;;  %v2081_v37 = vld [vmem:[%s8407_s4 + $0x28] sm:$0xff] }
 0x246   : > { %v1595_v23 = vsel %vm8135_vm3, %v1578_v18, %v4881_v43  ;;  %v1466_v10 = vpop.permute.xlu0 %1465  ;;  %vm6243_vm3 = vcmp.ge.s32.totalorder %v8389_v45, 2  ;;  %vm8397_vm13 = vmmov %vm8394_vm8  ;;  %v2084_v43 = vld [vmem:[%s8407_s4 + $0x40] sm:$0xff] }
 0x247   : > { %1790 = vmatmul.mubr.f32.gmra.mrb[36].mxu1 %v1594_v51  ;;  %vm6236_vm1 = vcmp.lt.s32.totalorder %v8384_v13, 14  ;;  %v8391_v6 = vsel %vm6243_vm3, 4294967295, %v8390_v6  ;;  %v1112_v44 = vsel %vm6243_vm3, %v8396_v31, 0.0  ;;  %v1468_v63 = vpop.permute.xlu1 %1467  ;;  %v2080_v51 = vld [vmem:[%s8407_s4 + $0x20] sm:$0xff]  ;;  %v8410_v13 = vmov 0.0|0.0  }
 0x248   : > { %4266 = vmatprep.mubr.msk.f32.mxu1 %vm8381_vm7, %v1352_v55  ;;  %v8386_v8 = vsel %vm6236_vm1, 4294967295, %v8385_v8  ;;  %vm8388_vm7 = vcmask 523264   ;;  %8392 = vst [vmem:[#allocation34_spill] sm:$0xff] %v8391_v6  ;;  %v1354_v27 = vsel %vm6236_vm1, %v6003_v14, 0.0  ;;  %v1564_v1 = vsel %vm8397_vm13, %v1112_v44, %v1402_v28  ;;  %v2083_v55 = vld [vmem:[%s8407_s4 + $0x38] sm:$0xff] }
 0x249   : > { %8387 = vst [vmem:[#allocation20_spill] sm:$0xff] %v8386_v8  ;;  %v1579_v52 = vsel %vm8388_vm7, %v1562_v50, %v4890_v19  ;;  %v8400_v14 = vmov 0  ;;  %v4641_v12 = vpack.c.bf16 %v2081_v37, %v2080_v51  ;;  %v4645_v18 = vpack.c.bf16 %v2083_v55, %v2082_v34  ;;  %v2087_v50 = vld [vmem:[%s8407_s4 + $0x58] sm:$0xff] }
 0x24a   : > { %v1596_v24 = vsel %vm8393_vm5, %v1579_v52, %v4895_v5  ;;  %v1404_v21 = vpop.permute.xlu0 %1403  ;;  %v6311_v5 = vld [vmem:[%s8408_s3] ss:$0 sm:$0xff] }
 0x24b   : > { %1795 = vmatmul.mubr.f32.gmra.mrb[38].mxu1 %v1595_v23  ;;  %v2086_v23 = vld [vmem:[%s8407_s4 + $0x50] sm:$0xff] }
 0x24c   : > { %4267 = vmatprep.mubr.msk.f32.mxu1 %vm8382_vm12, %v5999_v56  ;;  %v1563_v56 = vsel %vm8394_vm8, %v5991_v57, %v4886_v20  ;;  %vm8395_vm12 = vmmov %vm8394_vm8  ;;  %v4649_v20 = vpack.c.bf16 %v2085_v22, %v2084_v43  ;;  %v4653_v19 = vpack.c.bf16 %v2087_v50, %v2086_v23 }
 0x24d   : > { %v1580_v4 = vsel %vm8388_vm7, %v1563_v56, %v4891_v3  ;;  %vm8398_vm8 = vmmov %vm8388_vm7 }
 0x24e   : > { %v1597_v57 = vsel %vm8393_vm5, %v1580_v4, %v4896_v62  ;;  %v1581_v30 = vsel %vm8398_vm8, %v1564_v1, %v1466_v10  ;;  %vm8399_vm6 = vmmov %vm8395_vm12  ;;  %v1532_v59 = vpop.permute.xlu0 %1531 }
 0x24f   : > { %1800 = vmatmul.mubr.f32.gmra.mrb[40].mxu1 %v1596_v24  ;;  %vm8403_vm3 = vmmov %vm8399_vm6 }
 0x250   : > { %4268 = vmatprep.mubr.msk.f32.mxu1 %vm8395_vm12, %v1354_v27  ;;  %vm6265_vm12 = vcmp.lt.s32.totalorder %v652_v39, 14  ;;  %v1565_v7 = vsel %vm8403_vm3, %v5972_v29, %v1404_v21  ;;  %vm8404_vm7 = vmmov %vm8393_vm5  ;;  %v2076_v29 = vld [vmem:[%s8407_s4] sm:$0xff]  ;;  %v2077_v39 = vld [vmem:[%s8407_s4 + $0x8] sm:$0xff] }
 0x251   : > { %v8401_v14 = vsel %vm6265_vm12, 4294967295, %v8400_v14  ;;  %v1598_v32 = vsel %vm8404_vm7, %v1581_v30, %v1530_v11  ;;  %v1356_v36 = vsel %vm6265_vm12, %v6014_v42, 0.0  ;;  %vm8405_vm13 = vmmov %vm8403_vm3  ;;  %v2078_v42 = vld [vmem:[%s8407_s4 + $0x10] sm:$0xff]  ;;  %v4633_v46 = vpack.c.bf16 %v2077_v39, %v2076_v29  ;;  %s7991_s4 = scalar_lea.hbm %s8049_s16, %s4343_s20 }
 0x252   : > { %8402 = vst [vmem:[#allocation26_spill] sm:$0xff] %v8401_v14  ;;  %v4637_v0 = vpack.c.bf16 %v2079_v16, %v2078_v42  ;;  %vm8411_vm3 = vcmp.lt.s32.totalorder %v5358_v60, 7 }
 0x253   : > { %1805 = vmatmul.mubr.f32.gmra.mrb[42].mxu1 %v1597_v57  ;;  %4634 = vmatprep.subr.bf16.mxu0 %v4633_v46  ;;  %vm8414_vm7 = vmmov %vm8411_vm3 }
 0x254   : > { %4269 = vmatprep.mubr.msk.f32.mxu1 %vm8399_vm6, %v6008_v40  ;;  %vm8406_vm6 = vmmov %vm8398_vm8  ;;  %4636 = vmatpush3.bf16.msra.mxu0 %v4633_v46  ;;  %vm8412_vm8 = vcmp.lt.s32.totalorder %v5358_v60, 1 }
 0x255   : > { %v1582_v40 = vsel %vm8406_vm6, %v1565_v7, %v1468_v63  ;;  %4638 = vmatprep.subr.bf16.mxu0 %v4637_v0  ;;  %vm8417_vm6 = vmmov %vm8411_vm3 }
 0x256   : > { %v1599_v15 = vsel %vm8393_vm5, %v1582_v40, %v1532_v59  ;;  %vm8418_vm5 = vmmov %vm8412_vm8 }
 0x257   : > { %1810 = vmatmul.mubr.f32.gmra.mrb[44].mxu1 %v1598_v32 }
 0x258   : > { %4270 = vmatprep.mubr.msk.f32.mxu1 %vm8405_vm13, %v1356_v36  ;;  %4640 = vmatpush3.bf16.msra.mxu0 %v4637_v0  ;;  %vm8415_vm13 = vmmov %vm8412_vm8 }
 0x259   : > { %4642 = vmatprep.subr.bf16.mxu0 %v4641_v12 }
 0x25b   : > { %1815 = vmatmul.mubr.f32.gmra.mrb[46].mxu1 %v1599_v15 }
 0x25c   : > { %4644 = vmatpush3.bf16.msra.mxu0 %v4641_v12 }
 0x25d   : > { %4646 = vmatprep.subr.bf16.mxu0 %v4645_v18 }
 0x260   : > { %4648 = vmatpush3.bf16.msra.mxu0 %v4645_v18 }
 0x261   : > { %4650 = vmatprep.subr.bf16.mxu0 %v4649_v20 }
 0x264   : > { %4652 = vmatpush3.bf16.msra.mxu0 %v4649_v20 }
 0x265   : > { %4654 = vmatprep.subr.bf16.mxu0 %v4653_v19 }
 0x268   : > { %4656 = vmatpush3.bf16.msra.mxu0 %v4653_v19 }
 0x269   : > { %4657 = vmatprep.subr.bf16.mxu0 %v8410_v13 }
 0x2ef   : > { %v1741_v10 = vpop.f32.mrb[16].mxu1 }
 0x2f0   : > { %v6320_v28 = vadd.f32 %v6311_v5, %v1741_v10  ;;  %v1743_v9 = vpop.f32.mrb[17].mxu1 }
 0x2f2   : > { %1932 = vrot.lane.b32.xlu1 %v6320_v28, %s8409_s2  ;;  %v1820_v24 = vrot.slane %v6320_v28, 7  ;;  %v1868_v56 = vrot.slane %v6320_v28, 1 }
 0x2f3   : > { %v1746_v52 = vpop.f32.mrb[18].mxu1 }
 0x2f4   : > { %v1747_v45 = vadd.f32 %v6311_v5, %v1746_v52  ;;  %v1748_v62 = vpop.f32.mrb[19].mxu1 }
 0x2f6   : > { %v1821_v3 = vrot.slane %v1747_v45, 7  ;;  %v1869_v27 = vrot.slane %v1747_v45, 1  ;;  %1934 = vrot.lane.b32.xlu0 %v1747_v45, %s8409_s2 }
 0x2f8   : > { %v1898_v4 = vsel %vm8411_vm3, %v1868_v56, %v1869_v27  ;;  %v6338_v1 = vsel %vm8412_vm8, %v1820_v24, %v1821_v3  ;;  %vm8419_vm8 = vmmov %vm8418_vm5 }
 0x2f9   : > { %1996 = vrot.lane.b32.xlu1 %v1898_v4, %s8413_s0 }
 0x2fa   : > { %v1751_v31 = vpop.f32.mrb[20].mxu1 }
 0x2fb   : > { %v1752_v44 = vadd.f32 %v6311_v5, %v1751_v31  ;;  %v1753_v21 = vpop.f32.mrb[21].mxu1 }
 0x2fd   : > { %v1822_v11 = vrot.slane %v1752_v44, 7  ;;  %v1870_v57 = vrot.slane %v1752_v44, 1  ;;  %1936 = vrot.lane.b32.xlu1 %v1752_v44, %s8409_s2 }
 0x2fe   : > { %v1756_v30 = vpop.f32.mrb[22].mxu1 }
 0x2ff   : > { %v1757_v7 = vadd.f32 %v6311_v5, %v1756_v30  ;;  %v1758_v32 = vpop.f32.mrb[23].mxu1  ;;  %v1897_v59 = vsel %vm8414_vm7, %v1869_v27, %v1870_v57  ;;  %v6346_v36 = vsel %vm8415_vm13, %v1821_v3, %v1822_v11  ;;  %vm8421_vm7 = vmmov %vm8411_vm3 }
 0x300   : > { %v1901_v40 = vsel %vm5414_vm10, %v1897_v59, 0.0  ;;  %vm8422_vm13 = vmmov %vm8418_vm5 }
 0x301   : > { %v1823_v15 = vrot.slane %v1757_v7, 7  ;;  %v1871_v29 = vrot.slane %v1757_v7, 1  ;;  %1998 = vrot.lane.b32.xlu0 %v1901_v40, %s8413_s0 }
 0x302   : > { %v1761_v39 = vpop.f32.mrb[24].mxu1 }
 0x303   : > { %v1762_v42 = vadd.f32 %v6311_v5, %v1761_v39  ;;  %v1763_v46 = vpop.f32.mrb[25].mxu1  ;;  %v1896_v16 = vsel %vm8417_vm6, %v1870_v57, %v1871_v29  ;;  %v6357_v0 = vsel %vm8418_vm5, %v1822_v11, %v1823_v15  ;;  %vm8423_vm6 = vmmov %vm8411_vm3 }
 0x304   : > { %2000 = vrot.lane.b32.xlu1 %v1896_v16, %s8413_s0 }
 0x305   : > { %v1824_v51 = vrot.slane %v1762_v42, 7  ;;  %v1872_v37 = vrot.slane %v1762_v42, 1  ;;  %1938 = vrot.lane.b32.xlu0 %v1757_v7, %s8409_s2 }
 0x306   : > { %v1766_v12 = vpop.f32.mrb[26].mxu1 }
 0x307   : > { %v1767_v34 = vadd.f32 %v6311_v5, %v1766_v12  ;;  %v1768_v55 = vpop.f32.mrb[27].mxu1  ;;  %v1895_v18 = vsel %vm8411_vm3, %v1871_v29, %v1872_v37  ;;  %v6366_v43 = vsel %vm8419_vm8, %v1823_v15, %v1824_v51  ;;  %vm8425_vm8 = vmmov %vm8418_vm5 }
 0x308   : > { %1940 = vrot.lane.b32.xlu1 %v1762_v42, %s8409_s2  ;;  %v1903_v20 = vsel %vm5438_vm11, %v1895_v18, 0.0 }
 0x309   : > { %v1825_v23 = vrot.slane %v1767_v34, 7  ;;  %v1873_v50 = vrot.slane %v1767_v34, 1  ;;  %2002 = vrot.lane.b32.xlu0 %v1903_v20, %s8413_s0 }
 0x30a   : > { %v1771_v19 = vpop.f32.mrb[28].mxu1 }
 0x30b   : > { %v1772_v10 = vadd.f32 %v6311_v5, %v1771_v19  ;;  %v1773_v9 = vpop.f32.mrb[29].mxu1  ;;  %v1894_v52 = vsel %vm8421_vm7, %v1872_v37, %v1873_v50  ;;  %v6377_v45 = vsel %vm8422_vm13, %v1824_v51, %v1825_v23  ;;  %vm8426_vm7 = vmmov %vm8411_vm3 }
 0x30c   : > { %2004 = vrot.lane.b32.xlu1 %v1894_v52, %s8413_s0  ;;  %vm8427_vm13 = vmmov %vm8418_vm5 }
 0x30d   : > { %v1826_v62 = vrot.slane %v1772_v10, 7  ;;  %v1874_v3 = vrot.slane %v1772_v10, 1  ;;  %1942 = vrot.lane.b32.xlu0 %v1767_v34, %s8409_s2 }
 0x30e   : > { %v1776_v27 = vpop.f32.mrb[30].mxu1 }
 0x30f   : > { %v1777_v31 = vadd.f32 %v6311_v5, %v1776_v27  ;;  %v1778_v44 = vpop.f32.mrb[31].mxu1  ;;  %v1893_v21 = vsel %vm8423_vm6, %v1873_v50, %v1874_v3  ;;  %v6386_v4 = vsel %vm8418_vm5, %v1825_v23, %v1826_v62  ;;  %vm8429_vm6 = vmmov %vm8411_vm3 }
 0x310   : > { %1944 = vrot.lane.b32.xlu1 %v1772_v10, %s8409_s2  ;;  %v1905_v57 = vsel %vm5537_vm14, %v1893_v21, 0.0 }
 0x311   : > { %v1827_v30 = vrot.slane %v1777_v31, 7  ;;  %v1875_v7 = vrot.slane %v1777_v31, 1  ;;  %2006 = vrot.lane.b32.xlu0 %v1905_v57, %s8413_s0  ;;  %v8431_v57 = vld [vmem:[#allocation21_spill] sm:$0xff] }
 0x312   : > { %v1781_v32 = vpop.f32.mrb[32].mxu1 }
 0x313   : > { %v1782_v59 = vadd.f32 %v6311_v5, %v1781_v32  ;;  %v1783_v40 = vpop.f32.mrb[33].mxu1  ;;  %v1892_v15 = vsel %vm8411_vm3, %v1874_v3, %v1875_v7  ;;  %v6397_v29 = vsel %vm8425_vm8, %v1826_v62, %v1827_v30  ;;  %vm8430_vm8 = vmmov %vm8418_vm5 }
 0x314   : > { %2008 = vrot.lane.b32.xlu1 %v1892_v15, %s8413_s0 }
 0x315   : > { %v1828_v39 = vrot.slane %v1782_v59, 7  ;;  %v1876_v42 = vrot.slane %v1782_v59, 1  ;;  %1946 = vrot.lane.b32.xlu0 %v1777_v31, %s8409_s2 }
 0x316   : > { %v1786_v46 = vpop.f32.mrb[34].mxu1 }
 0x317   : > { %v1787_v16 = vadd.f32 %v6311_v5, %v1786_v46  ;;  %v1788_v51 = vpop.f32.mrb[35].mxu1  ;;  %v1891_v37 = vsel %vm8426_vm7, %v1875_v7, %v1876_v42  ;;  %v6406_v12 = vsel %vm8427_vm13, %v1827_v30, %v1828_v39  ;;  %vm8432_vm7 = vmmov %vm8411_vm3 }
 0x318   : > { %1948 = vrot.lane.b32.xlu1 %v1782_v59, %s8409_s2  ;;  %v1907_v55 = vsel %vm5547_vm15, %v1891_v37, 0.0  ;;  %vm8433_vm13 = vmmov %vm8418_vm5 }
 0x319   : > { %v1829_v18 = vrot.slane %v1787_v16, 7  ;;  %v1877_v20 = vrot.slane %v1787_v16, 1  ;;  %2010 = vrot.lane.b32.xlu0 %v1907_v55, %s8413_s0 }
 0x31a   : > { %v1791_v23 = vpop.f32.mrb[36].mxu1 }
 0x31b   : > { %v1792_v50 = vadd.f32 %v6311_v5, %v1791_v23  ;;  %v1793_v19 = vpop.f32.mrb[37].mxu1  ;;  %v1890_v10 = vsel %vm8429_vm6, %v1876_v42, %v1877_v20  ;;  %v6417_v9 = vsel %vm8418_vm5, %v1828_v39, %v1829_v18  ;;  %vm8434_vm6 = vmmov %vm8411_vm3  ;;  %v8435_v23 = vld [vmem:[#allocation22_spill] sm:$0xff] }
 0x31c   : > { %2012 = vrot.lane.b32.xlu1 %v1890_v10, %s8413_s0 }
 0x31d   : > { %v1830_v52 = vrot.slane %v1792_v50, 7  ;;  %v1878_v62 = vrot.slane %v1792_v50, 1  ;;  %1950 = vrot.lane.b32.xlu0 %v1787_v16, %s8409_s2 }
 0x31e   : > { %v1796_v3 = vpop.f32.mrb[38].mxu1 }
 0x31f   : > { %v1797_v27 = vadd.f32 %v6311_v5, %v1796_v3  ;;  %v1798_v31 = vpop.f32.mrb[39].mxu1  ;;  %v1889_v44 = vsel %vm8411_vm3, %v1877_v20, %v1878_v62  ;;  %v6426_v21 = vsel %vm8430_vm8, %v1829_v18, %v1830_v52  ;;  %vm8436_vm8 = vmmov %vm8418_vm5 }
 0x320   : > { %1952 = vrot.lane.b32.xlu1 %v1792_v50, %s8409_s2  ;;  %v1909_v30 = vsel %vm5630_vm2, %v1889_v44, 0.0 }
 0x321   : > { %v1831_v7 = vrot.slane %v1797_v27, 7  ;;  %v1879_v32 = vrot.slane %v1797_v27, 1  ;;  %2014 = vrot.lane.b32.xlu0 %v1909_v30, %s8413_s0 }
 0x322   : > { %v1801_v59 = vpop.f32.mrb[40].mxu1 }
 0x323   : > { %v1802_v40 = vadd.f32 %v6311_v5, %v1801_v59  ;;  %v1803_v15 = vpop.f32.mrb[41].mxu1  ;;  %v1888_v39 = vsel %vm8432_vm7, %v1878_v62, %v1879_v32  ;;  %v6437_v42 = vsel %vm8433_vm13, %v1830_v52, %v1831_v7  ;;  %vm8437_vm7 = vmmov %vm8411_vm3 }
 0x324   : > { %2016 = vrot.lane.b32.xlu1 %v1888_v39, %s8413_s0  ;;  %vm8438_vm13 = vmmov %vm8418_vm5  ;;  %v8439_v39 = vld [vmem:[#allocation25_spill] sm:$0xff] }
 0x325   : > { %v1832_v46 = vrot.slane %v1802_v40, 7  ;;  %v1880_v16 = vrot.slane %v1802_v40, 1  ;;  %1954 = vrot.lane.b32.xlu0 %v1797_v27, %s8409_s2 }
 0x326   : > { %v1806_v51 = vpop.f32.mrb[42].mxu1 }
 0x327   : > { %v1807_v37 = vadd.f32 %v6311_v5, %v1806_v51  ;;  %v1808_v55 = vpop.f32.mrb[43].mxu1  ;;  %v1887_v18 = vsel %vm8434_vm6, %v1879_v32, %v1880_v16  ;;  %v6446_v20 = vsel %vm8418_vm5, %v1831_v7, %v1832_v46  ;;  %vm8440_vm6 = vmmov %vm8411_vm3 }
 0x328   : > { %1956 = vrot.lane.b32.xlu1 %v1802_v40, %s8409_s2  ;;  %v1911_v50 = vsel %vm5639_vm4, %v1887_v18, 0.0  ;;  %vm8441_vm5 = vmmov %vm8411_vm3 }
 0x329   : > { %v1833_v19 = vrot.slane %v1807_v37, 7  ;;  %v1881_v10 = vrot.slane %v1807_v37, 1  ;;  %2018 = vrot.lane.b32.xlu0 %v1911_v50, %s8413_s0 }
 0x32a   : > { %v1811_v52 = vpop.f32.mrb[44].mxu1 }
 0x32b   : > { %v1812_v62 = vadd.f32 %v6311_v5, %v1811_v52  ;;  %v1813_v3 = vpop.f32.mrb[45].mxu1  ;;  %v1886_v27 = vsel %vm8411_vm3, %v1880_v16, %v1881_v10  ;;  %v6457_v31 = vsel %vm8436_vm8, %v1832_v46, %v1833_v19  ;;  %vm8442_vm3 = vmmov %vm8436_vm8 }
 0x32c   : > { %2020 = vrot.lane.b32.xlu1 %v1886_v27, %s8413_s0  ;;  %vm8443_vm8 = vmmov %vm8442_vm3 }
 0x32d   : > { %v1834_v44 = vrot.slane %v1812_v62, 7  ;;  %v1882_v30 = vrot.slane %v1812_v62, 1  ;;  %1958 = vrot.lane.b32.xlu0 %v1807_v37, %s8409_s2 }
 0x32e   : > { %v1816_v7 = vpop.f32.mrb[46].mxu1 }
 0x32f   : > { %v1817_v32 = vadd.f32 %v6311_v5, %v1816_v7  ;;  %v1818_v59 = vpop.f32.mrb[47].mxu1  ;;  %v1885_v40 = vsel %vm8437_vm7, %v1881_v10, %v1882_v30  ;;  %v6466_v15 = vsel %vm8438_vm13, %v1833_v19, %v1834_v44  ;;  %vm8446_vm13 = vcmask 261120   ;;  %v8451_v7 = vld [vmem:[#allocation7_spill] sm:$0xff] }
 0x330   : > { %1960 = vrot.lane.b32.xlu1 %v1812_v62, %s8409_s2  ;;  %v1913_v46 = vsel %vm5691_vm9, %v1885_v40, 0.0  ;;  %vm8452_vm12 = vnez %v8451_v7 }
 0x331   : > { %v1835_v16 = vrot.slane %v1817_v32, 7  ;;  %v1883_v51 = vrot.slane %v1817_v32, 1  ;;  %2022 = vrot.lane.b32.xlu0 %v1913_v46, %s8413_s0 }
 0x333   : > { %v1884_v5 = vsel %vm8440_vm6, %v1882_v30, %v1883_v51  ;;  %v1899_v37 = vsel %vm8441_vm5, %v1883_v51, %v1868_v56  ;;  %v1851_v55 = vsel %vm8442_vm3, %v1835_v16, %v1820_v24  ;;  %v6484_v18 = vsel %vm8443_vm8, %v1834_v44, %v1835_v16  ;;  %v8444_v56 = vld [vmem:[#allocation24_spill] sm:$0xff]  ;;  %vm8449_vm3 = vmmov %vm8446_vm13 }
 0x334   : > { %2024 = vrot.lane.b32.xlu1 %v1884_v5, %s8413_s0  ;;  %v1915_v50 = vsel %vm6048_vm0, %v1899_v37, 0.0  ;;  %vm8445_vm7 = vnez %v8444_v56  ;;  %vm8447_vm6 = vcmask 523264   ;;  %vm8448_vm5 = vcmask 785408  }
 0x335   : > { %1962 = vrot.lane.b32.xlu0 %v1817_v32, %s8409_s2  ;;  %v1852_v28 = vsel %vm8445_vm7, %v1851_v55, 0.0  ;;  %vm8450_vm8 = vmmov %vm8447_vm6  ;;  %v1854_v32 = vsel %vm8452_vm12, %v6346_v36, 0.0  ;;  %v8459_v55 = vld [vmem:[#allocation11_spill] sm:$0xff] }
 0x336   : > { %vm8453_vm1 = vmmov %vm8448_vm5 }
 0x337   : > { %vm8455_vm0 = vmmov %vm8447_vm6 }
 0x339   : > { %2026 = vrot.lane.b32.xlu0 %v1915_v50, %s8413_s0 }
 0x364   : > { %v1933_v19 = vpop.permute.xlu1 %1932 }
 0x365   : > { %v2044_v10 = vsel %vm8446_vm13, %v1852_v28, %v1933_v19  ;;  %vm8454_vm13 = vmmov %vm8449_vm3 }
 0x368   : > { %v1935_v52 = vpop.permute.xlu0 %1934 }
 0x369   : > { %v2045_v27 = vsel %vm8449_vm3, %v6338_v1, %v1935_v52 }
 0x36b   : > { %v1997_v24 = vpop.permute.xlu1 %1996 }
 0x36c   : > { %v2060_v62 = vsel %vm8447_vm6, %v2044_v10, %v1997_v24  ;;  %vm8456_vm6 = vmmov %vm8453_vm1 }
 0x36d   : > { %4490 = vmatprep.mubr.msk.f32.mxu0 %vm8448_vm5, %v2060_v62  ;;  %vm8457_vm5 = vmmov %vm8449_vm3 }
 0x36e   : > { %vm8458_vm3 = vmmov %vm8455_vm0 }
 0x36f   : > { %v1937_v3 = vpop.permute.xlu1 %1936 }
 0x370   : > { %v2046_v59 = vsel %vm8454_vm13, %v1854_v32, %v1937_v3  ;;  %vm8461_vm13 = vmmov %vm8457_vm5  ;;  %v8464_v3 = vld [vmem:[#allocation14_spill] sm:$0xff] }
 0x371   : > { %vm8465_vm9 = vnez %v8464_v3 }
 0x373   : > { %v1999_v44 = vpop.permute.xlu0 %1998 }
 0x374   : > { %v2061_v30 = vsel %vm8450_vm8, %v2045_v27, %v1999_v44  ;;  %vm8460_vm8 = vnez %v8459_v55 }
 0x375   : > { %4491 = vmatmul.mubr.msk.f32.vlgmr.msra.gmra.mrb[0].mxu0 %vm8453_vm1, %v2061_v30  ;;  %v1856_v36 = vsel %vm8460_vm8, %v6366_v43, 0.0  ;;  %v1858_v43 = vsel %vm8465_vm9, %v6386_v4, 0.0 }
 0x376   : > { %v2001_v40 = vpop.permute.xlu1 %2000 }
 0x377   : > { %v2062_v46 = vsel %vm8455_vm0, %v2046_v59, %v2001_v40  ;;  %v1939_v16 = vpop.permute.xlu0 %1938 }
 0x378   : > { %4493 = vmatprep.mubr.msk.f32.mxu0 %vm8456_vm6, %v2062_v46  ;;  %v2047_v1 = vsel %vm8457_vm5, %v6357_v0, %v1939_v16  ;;  %vm8462_vm6 = vmmov %vm8453_vm1  ;;  %v8469_v16 = vld [vmem:[#allocation18_spill] sm:$0xff] }
 0x379   : > { %vm8470_vm4 = vnez %v8469_v16 }
 0x37a   : > { %v1941_v51 = vpop.permute.xlu1 %1940  ;;  %v1860_v4 = vsel %vm8470_vm4, %v6406_v12, 0.0  ;;  %vm8487_vm4 = vmmov %vm8457_vm5 }
 0x37b   : > { %v2003_v5 = vpop.permute.xlu0 %2002  ;;  %v2048_v50 = vsel %vm8461_vm13, %v1856_v36, %v1941_v51  ;;  %vm8466_vm13 = vmmov %vm8457_vm5 }
 0x37c   : > { %v2063_v37 = vsel %vm8458_vm3, %v2047_v1, %v2003_v5  ;;  %vm8463_vm3 = vmmov %vm8455_vm0 }
 0x37d   : > { %4494 = vmatmul.mubr.msk.f32.gmra.mrb[2].mxu0 %vm8453_vm1, %v2063_v37 }
 0x37e   : > { %v2005_v19 = vpop.permute.xlu1 %2004 }
 0x37f   : > { %v2064_v28 = vsel %vm8455_vm0, %v2048_v50, %v2005_v19  ;;  %v1943_v10 = vpop.permute.xlu0 %1942 }
 0x380   : > { %4496 = vmatprep.mubr.msk.f32.mxu0 %vm8462_vm6, %v2064_v28  ;;  %v2049_v0 = vsel %vm8457_vm5, %v6377_v45, %v1943_v10  ;;  %vm8467_vm6 = vmmov %vm8453_vm1  ;;  %v8474_v28 = vld [vmem:[#allocation19_spill] sm:$0xff] }
 0x381   : > { %vm8475_vm2 = vnez %v8474_v28 }
 0x382   : > { %v1945_v24 = vpop.permute.xlu1 %1944  ;;  %v1862_v12 = vsel %vm8475_vm2, %v6426_v21, 0.0 }
 0x383   : > { %v2007_v52 = vpop.permute.xlu0 %2006  ;;  %v2050_v27 = vsel %vm8466_vm13, %v1858_v43, %v1945_v24  ;;  %vm8471_vm13 = vmmov %vm8457_vm5 }
 0x384   : > { %v2065_v62 = vsel %vm8463_vm3, %v2049_v0, %v2007_v52  ;;  %vm8468_vm3 = vmmov %vm8455_vm0 }
 0x385   : > { %4497 = vmatmul.mubr.msk.f32.gmra.mrb[4].mxu0 %vm8453_vm1, %v2065_v62 }
 0x386   : > { %v2009_v44 = vpop.permute.xlu1 %2008 }
 0x387   : > { %v2066_v30 = vsel %vm8455_vm0, %v2050_v27, %v2009_v44  ;;  %v1947_v32 = vpop.permute.xlu0 %1946  ;;  %v8479_v44 = vld [vmem:[#allocation23_spill] sm:$0xff] }
 0x388   : > { %4499 = vmatprep.mubr.msk.f32.mxu0 %vm8467_vm6, %v2066_v30  ;;  %v2051_v45 = vsel %vm8457_vm5, %v6397_v29, %v1947_v32  ;;  %vm8472_vm6 = vmmov %vm8453_vm1  ;;  %vm8480_vm2 = vnez %v8479_v44 }
 0x389   : > { %v1864_v21 = vsel %vm8480_vm2, %v6446_v20, 0.0  ;;  %vm8484_vm2 = vnez %v8289_v54 }
 0x38a   : > { %v1949_v59 = vpop.permute.xlu1 %1948  ;;  %v1866_v20 = vsel %vm8484_vm2, %v6466_v15, 0.0  ;;  %v4271_v15 = vld [vmem:[%s8038_s5] ss:$0 sm:$0xff] }
 0x38b   : > { %v2011_v40 = vpop.permute.xlu0 %2010  ;;  %v2052_v51 = vsel %vm8471_vm13, %v1860_v4, %v1949_v59  ;;  %vm8476_vm13 = vmmov %vm8457_vm5 }
 0x38c   : > { %v2067_v46 = vsel %vm8468_vm3, %v2051_v45, %v2011_v40  ;;  %vm8473_vm3 = vmmov %vm8455_vm0 }
 0x38d   : > { %4500 = vmatmul.mubr.msk.f32.gmra.mrb[6].mxu0 %vm8453_vm1, %v2067_v46 }
 0x38e   : > { %v2013_v1 = vpop.permute.xlu1 %2012 }
 0x38f   : > { %v2068_v5 = vsel %vm8455_vm0, %v2052_v51, %v2013_v1  ;;  %v1951_v37 = vpop.permute.xlu0 %1950 }
 0x390   : > { %4502 = vmatprep.mubr.msk.f32.mxu0 %vm8472_vm6, %v2068_v5  ;;  %v2053_v29 = vsel %vm8457_vm5, %v6417_v9, %v1951_v37  ;;  %vm8477_vm6 = vmmov %vm8453_vm1 }
 0x392   : > { %v1953_v36 = vpop.permute.xlu1 %1952 }
 0x393   : > { %v2015_v50 = vpop.permute.xlu0 %2014  ;;  %v2054_v10 = vsel %vm8476_vm13, %v1862_v12, %v1953_v36  ;;  %vm8481_vm13 = vmmov %vm8457_vm5 }
 0x394   : > { %v2069_v19 = vsel %vm8473_vm3, %v2053_v29, %v2015_v50  ;;  %vm8478_vm3 = vmmov %vm8455_vm0 }
 0x395   : > { %4503 = vmatmul.mubr.msk.f32.gmra.mrb[8].mxu0 %vm8453_vm1, %v2069_v19 }
 0x396   : > { %v2017_v24 = vpop.permute.xlu1 %2016 }
 0x397   : > { %v2070_v0 = vsel %vm8455_vm0, %v2054_v10, %v2017_v24  ;;  %v1955_v52 = vpop.permute.xlu0 %1954 }
 0x398   : > { %4505 = vmatprep.mubr.msk.f32.mxu0 %vm8477_vm6, %v2070_v0  ;;  %v2055_v9 = vsel %vm8457_vm5, %v6437_v42, %v1955_v52  ;;  %vm8482_vm6 = vmmov %vm8453_vm1 }
 0x39a   : > { %v1957_v62 = vpop.permute.xlu1 %1956 }
 0x39b   : > { %v2019_v43 = vpop.permute.xlu0 %2018  ;;  %v2056_v30 = vsel %vm8481_vm13, %v1864_v21, %v1957_v62  ;;  %vm8485_vm13 = vmmov %vm8457_vm5 }
 0x39c   : > { %v2071_v27 = vsel %vm8478_vm3, %v2055_v9, %v2019_v43  ;;  %vm8483_vm3 = vmmov %vm8455_vm0 }
 0x39d   : > { %4506 = vmatmul.mubr.msk.f32.gmra.mrb[10].mxu0 %vm8453_vm1, %v2071_v27 }
 0x39e   : > { %v2021_v32 = vpop.permute.xlu1 %2020 }
 0x39f   : > { %v2072_v59 = vsel %vm8455_vm0, %v2056_v30, %v2021_v32  ;;  %v1959_v45 = vpop.permute.xlu0 %1958 }
 0x3a0   : > { %4508 = vmatprep.mubr.msk.f32.mxu0 %vm8482_vm6, %v2072_v59  ;;  %v2057_v42 = vsel %vm8457_vm5, %v6457_v31, %v1959_v45  ;;  %vm8486_vm6 = vmmov %vm8453_vm1 }
 0x3a1   : > { %vm8488_vm5 = vmmov %vm8455_vm0 }
 0x3a2   : > { %v1961_v40 = vpop.permute.xlu1 %1960 }
 0x3a3   : > { %v2023_v46 = vpop.permute.xlu0 %2022  ;;  %v2058_v51 = vsel %vm8485_vm13, %v1866_v20, %v1961_v40 }
 0x3a4   : > { %v2073_v4 = vsel %vm8483_vm3, %v2057_v42, %v2023_v46  ;;  %vm8489_vm3 = vmmov %vm8453_vm1 }
 0x3a5   : > { %4509 = vmatmul.mubr.msk.f32.gmra.mrb[12].mxu0 %vm8453_vm1, %v2073_v4  ;;  %vm8490_vm1 = vmmov %vm8487_vm4 }
 0x3a6   : > { %v2025_v1 = vpop.permute.xlu1 %2024  ;;  %vm8492_vm13 = vmmov %vm8490_vm1 }
 0x3a7   : > { %v2074_v5 = vsel %vm8455_vm0, %v2058_v51, %v2025_v1  ;;  %v1963_v37 = vpop.permute.xlu0 %1962  ;;  %vm8493_vm0 = vmmov %vm8490_vm1 }
 0x3a8   : > { %4511 = vmatprep.mubr.msk.f32.mxu0 %vm8486_vm6, %v2074_v5  ;;  %v2059_v31 = vsel %vm8487_vm4, %v6484_v18, %v1963_v37  ;;  %vm8491_vm4 = vmmov %vm8490_vm1 }
 0x3a9   : > { %vm8494_vm6 = vmmov %vm8493_vm0 }
 0x3ab   : > { %v2027_v36 = vpop.permute.xlu0 %2026 }
 0x3ac   : > { %v2075_v29 = vsel %vm8488_vm5, %v2059_v31, %v2027_v36  ;;  %vm8495_vm5 = vmmov %vm8493_vm0 }
 0x3ad   : > { %4512 = vmatmul.mubr.msk.f32.gmra.mrb[14].mxu0 %vm8489_vm3, %v2075_v29  ;;  %vm8496_vm3 = vmmov %vm8493_vm0 }
 0x448   : > { %v4492_v50 = vpop.f32.mrb[0].mxu0 }
 0x449   : > { %v2209_v19 = vpop.f32.mrb[1].mxu0 }
 0x44a   : > { %v2210_v12 = vadd.f32 %v4271_v15, %v2209_v19 }
 0x44c   : > { %v6573_v10 = vmax.f32 %v2210_v12, 0.0  ;;  %v2215_v12 = vadd.f32 %v4492_v50, %v4271_v15 }
 0x44e   : > { %v2304_v24 = vsel %vm8490_vm1, %v6573_v10, 0.0  ;;  %v2369_v18 = vmul.f32 %v6573_v10, %v6573_v10  ;;  %vm8497_vm1 = vmmov %vm8493_vm0 }
 0x44f   : > { %2305 = vadd.xlane.f32.xlu1 %v2304_v24 }
 0x450   : > { %v4495_v0 = vpop.f32.mrb[2].mxu0  ;;  %v2385_v52 = vsel %vm8491_vm4, %v2369_v18, 0.0  ;;  %vm8498_vm4 = vmmov %vm8493_vm0 }
 0x451   : > { %v2225_v62 = vadd.f32 %v4495_v0, %v4271_v15  ;;  %v2219_v9 = vpop.f32.mrb[3].mxu0  ;;  %2386 = vadd.xlane.f32.xlu0 %v2385_v52 }
 0x458   : > { %v4498_v43 = vpop.f32.mrb[4].mxu0 }
 0x459   : > { %v2235_v27 = vadd.f32 %v4498_v43, %v4271_v15  ;;  %v2229_v21 = vpop.f32.mrb[5].mxu0  ;;  %v6592_v43 = vmax.f32 %v2215_v12, 0.0 }
 0x45a   : > { %v2230_v30 = vadd.f32 %v4271_v15, %v2229_v21  ;;  %v2220_v21 = vadd.f32 %v4271_v15, %v2219_v9  ;;  %v6607_v9 = vmax.f32 %v2225_v62, 0.0 }
 0x45c   : > { %v6614_v12 = vmax.f32 %v2230_v30, 0.0  ;;  %v2313_v62 = vsel %vm8498_vm4, %v6607_v9, 0.0  ;;  %vm8504_vm4 = vmmov %vm8493_vm0 }
 0x45e   : > { %v2316_v30 = vsel %vm8493_vm0, %v6614_v12, 0.0 }
 0x460   : > { %v4501_v32 = vpop.f32.mrb[6].mxu0 }
 0x461   : > { %v2245_v59 = vadd.f32 %v4501_v32, %v4271_v15  ;;  %v2239_v45 = vpop.f32.mrb[7].mxu0 }
 0x462   : > { %v2240_v40 = vadd.f32 %v4271_v15, %v2239_v45 }
 0x468   : > { %v4504_v42 = vpop.f32.mrb[8].mxu0 }
 0x469   : > { %v6580_v46 = vadd.f32 %v4504_v42, %v4271_v15  ;;  %v2249_v4 = vpop.f32.mrb[9].mxu0 }
 0x46a   : > { %v2250_v20 = vadd.f32 %v4271_v15, %v2249_v4  ;;  %v6600_v4 = vmax.f32 %v2220_v21, 0.0 }
 0x470   : > { %v4507_v51 = vpop.f32.mrb[10].mxu0 }
 0x471   : > { %v6582_v1 = vadd.f32 %v4507_v51, %v4271_v15  ;;  %v2259_v5 = vpop.f32.mrb[11].mxu0  ;;  %v2370_v51 = vmul.f32 %v6592_v43, %v6592_v43 }
 0x472   : > { %v6584_v37 = vadd.f32 %v4271_v15, %v2259_v5 }
 0x473   : > { %v2388_v5 = vsel %vm8495_vm5, %v2370_v51, 0.0  ;;  %vm8501_vm5 = vmmov %vm8493_vm0 }
 0x478   : > { %v4510_v31 = vpop.f32.mrb[12].mxu0 }
 0x479   : > { %v6586_v36 = vadd.f32 %v4510_v31, %v4271_v15  ;;  %v2269_v29 = vpop.f32.mrb[13].mxu0  ;;  %v2371_v31 = vmul.f32 %v6600_v4, %v6600_v4 }
 0x47a   : > { %v6588_v19 = vadd.f32 %v4271_v15, %v2269_v29  ;;  %v2310_v29 = vsel %vm8496_vm3, %v6600_v4, 0.0  ;;  %vm8502_vm3 = vmmov %vm8493_vm0 }
 0x480   : > { %v4513_v24 = vpop.f32.mrb[14].mxu0 }
 0x481   : > { %v2285_v18 = vadd.f32 %v4513_v24, %v4271_v15  ;;  %v2279_v0 = vpop.f32.mrb[15].mxu0  ;;  %v2391_v24 = vsel %vm8497_vm1, %v2371_v31, 0.0  ;;  %vm8503_vm1 = vmmov %vm8493_vm0 }
 0x482   : > { %v6590_v52 = vadd.f32 %v4271_v15, %v2279_v0  ;;  %v2307_v15 = vsel %vm8494_vm6, %v6592_v43, 0.0  ;;  %v6621_v0 = vmax.f32 %v2235_v27, 0.0  ;;  %vm8500_vm6 = vmmov %vm8493_vm0 }
 0x483   : > { %v6594_v32 = vmax.f32 %v2285_v18, 0.0  ;;  %v2372_v18 = vmul.f32 %v6607_v9, %v6607_v9 }
 0x484   : > { %v2374_v51 = vmul.f32 %v6621_v0, %v6621_v0  ;;  %v2319_v27 = vsel %vm8501_vm5, %v6621_v0, 0.0  ;;  %vm8507_vm5 = vmmov %vm8493_vm0 }
 0x485   : > { %v2349_v45 = vsel %vm8492_vm13, %v6594_v32, 0.0  ;;  %v2384_v42 = vmul.f32 %v6594_v32, %v6594_v32  ;;  %vm8499_vm13 = vmmov %vm8493_vm0 }
 0x486   : > { %2350 = vadd.xlane.f32.xlu0 %v2349_v45  ;;  %v2394_v21 = vsel %vm8499_vm13, %v2372_v18, 0.0  ;;  %v2373_v45 = vmul.f32 %v6614_v12, %v6614_v12  ;;  %vm8505_vm13 = vmmov %vm8493_vm0 }
 0x487   : > { %v2430_v50 = vsel %vm8493_vm0, %v2384_v42, 0.0  ;;  %v6628_v42 = vmax.f32 %v2240_v40, 0.0 }
 0x488   : > { %2431 = vadd.xlane.f32.xlu1 %v2430_v50  ;;  %v2397_v50 = vsel %vm8500_vm6, %v2373_v45, 0.0  ;;  %vm8506_vm6 = vmmov %vm8493_vm0 }
 0x489   : > { %v2375_v31 = vmul.f32 %v6628_v42, %v6628_v42  ;;  %v2322_v40 = vsel %vm8503_vm1, %v6628_v42, 0.0  ;;  %vm8509_vm1 = vmmov %vm8493_vm0 }
 0x48a   : > { %2308 = vadd.xlane.f32.xlu0 %v2307_v15  ;;  %v6635_v15 = vmax.f32 %v2245_v59, 0.0 }
 0x48c   : > { %2389 = vadd.xlane.f32.xlu1 %v2388_v5  ;;  %v2400_v5 = vsel %vm8502_vm3, %v2374_v51, 0.0  ;;  %v2376_v18 = vmul.f32 %v6635_v15, %v6635_v15  ;;  %v2325_v59 = vsel %vm8505_vm13, %v6635_v15, 0.0  ;;  %vm8508_vm3 = vmmov %vm8493_vm0 }
 0x48d   : > { %vm8511_vm13 = vmmov %vm8493_vm0 }
 0x48e   : > { %2311 = vadd.xlane.f32.xlu0 %v2310_v29  ;;  %v6642_v29 = vmax.f32 %v2250_v20, 0.0 }
 0x490   : > { %2392 = vadd.xlane.f32.xlu1 %v2391_v24  ;;  %v2403_v24 = vsel %vm8504_vm4, %v2375_v31, 0.0  ;;  %v2377_v45 = vmul.f32 %v6642_v29, %v6642_v29  ;;  %v2328_v20 = vsel %vm8506_vm6, %v6642_v29, 0.0  ;;  %vm8510_vm4 = vmmov %vm8493_vm0 }
 0x491   : > { %vm8512_vm6 = vmmov %vm8493_vm0 }
 0x492   : > { %2314 = vadd.xlane.f32.xlu0 %v2313_v62  ;;  %v6650_v62 = vmax.f32 %v6580_v46, 0.0 }
 0x494   : > { %2395 = vadd.xlane.f32.xlu1 %v2394_v21  ;;  %v2406_v21 = vsel %vm8493_vm0, %v2376_v18, 0.0  ;;  %v2378_v51 = vmul.f32 %v6650_v62, %v6650_v62  ;;  %v2331_v46 = vsel %vm8508_vm3, %v6650_v62, 0.0  ;;  %vm8514_vm3 = vmmov %vm8493_vm0 }
 0x496   : > { %2317 = vadd.xlane.f32.xlu0 %v2316_v30  ;;  %v6658_v30 = vmax.f32 %v6584_v37, 0.0 }
 0x498   : > { %2398 = vadd.xlane.f32.xlu1 %v2397_v50  ;;  %v2409_v50 = vsel %vm8507_vm5, %v2377_v45, 0.0  ;;  %v2379_v31 = vmul.f32 %v6658_v30, %v6658_v30  ;;  %v2334_v37 = vsel %vm8510_vm4, %v6658_v30, 0.0  ;;  %vm8513_vm5 = vmmov %vm8493_vm0 }
 0x499   : > { %vm8516_vm4 = vmmov %vm8493_vm0 }
 0x49a   : > { %2320 = vadd.xlane.f32.xlu0 %v2319_v27  ;;  %v6666_v27 = vmax.f32 %v6582_v1, 0.0 }
 0x49c   : > { %2401 = vadd.xlane.f32.xlu1 %v2400_v5  ;;  %v2412_v5 = vsel %vm8509_vm1, %v2378_v51, 0.0  ;;  %v2380_v18 = vmul.f32 %v6666_v27, %v6666_v27  ;;  %v2337_v1 = vsel %vm8493_vm0, %v6666_v27, 0.0  ;;  %vm8515_vm1 = vmmov %vm8493_vm0 }
 0x49e   : > { %2323 = vadd.xlane.f32.xlu0 %v2322_v40  ;;  %v6674_v40 = vmax.f32 %v6588_v19, 0.0 }
 0x4a0   : > { %2404 = vadd.xlane.f32.xlu1 %v2403_v24  ;;  %v2415_v24 = vsel %vm8511_vm13, %v2379_v31, 0.0  ;;  %v2381_v45 = vmul.f32 %v6674_v40, %v6674_v40  ;;  %v2340_v19 = vsel %vm8513_vm5, %v6674_v40, 0.0  ;;  %vm8517_vm13 = vmmov %vm8493_vm0  ;;  %vm8520_vm5 = vcmp.lt.s32.totalorder %v5358_v60, 6 }
 0x4a2   : > { %2326 = vadd.xlane.f32.xlu0 %v2325_v59  ;;  %v6682_v59 = vmax.f32 %v6586_v36, 0.0 }
 0x4a4   : > { %2407 = vadd.xlane.f32.xlu1 %v2406_v21  ;;  %v2418_v21 = vsel %vm8512_vm6, %v2380_v18, 0.0  ;;  %v2382_v51 = vmul.f32 %v6682_v59, %v6682_v59  ;;  %v2343_v36 = vsel %vm8515_vm1, %v6682_v59, 0.0  ;;  %v3025_v18 = vld [vmem:[%s8041_s8 + $0x10] sm:$0xff]  ;;  %vm8518_vm6 = vcmp.lt.s32.totalorder %v5358_v60, 1  ;;  %vm8522_vm1 = vmmov %vm8493_vm0 }
 0x4a6   : > { %2329 = vadd.xlane.f32.xlu0 %v2328_v20  ;;  %v6690_v20 = vmax.f32 %v6590_v52, 0.0 }
 0x4a8   : > { %2410 = vadd.xlane.f32.xlu1 %v2409_v50  ;;  %v2421_v50 = vsel %vm8514_vm3, %v2381_v45, 0.0  ;;  %v2346_v52 = vsel %vm8517_vm13, %v6690_v20, 0.0  ;;  %vm8521_vm3 = vmmov %vm8518_vm6 }
 0x4aa   : > { %2332 = vadd.xlane.f32.xlu0 %v2331_v46  ;;  %v2424_v46 = vsel %vm8516_vm4, %v2382_v51, 0.0  ;;  %vm8523_vm4 = vcmp.lt.s32.totalorder %v5358_v60, 7 }
 0x4ab   : > { %vm8525_vm13 = vmmov %vm8523_vm4 }
 0x4ac   : > { %2413 = vadd.xlane.f32.xlu1 %v2412_v5  ;;  %v2383_v5 = vmul.f32 %v6690_v20, %v6690_v20 }
 0x4ae   : > { %2335 = vadd.xlane.f32.xlu0 %v2334_v37  ;;  %v2427_v31 = vsel %vm8493_vm0, %v2383_v5, 0.0  ;;  %v3023_v37 = vld [vmem:[%s8041_s8] sm:$0xff]  ;;  %vm8526_vm0 = vmmov %vm8521_vm3 }
 0x4b0   : > { %2416 = vadd.xlane.f32.xlu1 %v2415_v24  ;;  %v3024_v24 = vld [vmem:[%s8041_s8 + $0x8] sm:$0xff] }
 0x4b2   : > { %2338 = vadd.xlane.f32.xlu0 %v2337_v1  ;;  %v4658_v1 = vpack.c.bf16 %v3024_v24, %v3023_v37  ;;  %v3032_v37 = vld [vmem:[%s8041_s8 + $0x48] sm:$0xff] }
 0x4b4   : > { %2419 = vadd.xlane.f32.xlu1 %v2418_v21  ;;  %v3026_v21 = vld [vmem:[%s8041_s8 + $0x18] sm:$0xff]  ;;  %4659 = vmatpush1.bf16.msra.mxu0 %v4658_v1 }
 0x4b5   : > { %v4661_v45 = vpack.c.bf16 %v3026_v21, %v3025_v18  ;;  %4660 = vmatprep.subr.bf16.mxu0 %v8410_v13  ;;  %v3033_v21 = vld [vmem:[%s8041_s8 + $0x50] sm:$0xff] }
 0x4b6   : > { %2341 = vadd.xlane.f32.xlu0 %v2340_v19  ;;  %v3027_v19 = vld [vmem:[%s8041_s8 + $0x20] sm:$0xff] }
 0x4b8   : > { %2422 = vadd.xlane.f32.xlu1 %v2421_v50  ;;  %v3028_v50 = vld [vmem:[%s8041_s8 + $0x28] sm:$0xff]  ;;  %4662 = vmatpush1.bf16.msra.mxu0 %v4661_v45  ;;  %v3034_v45 = vld [vmem:[%s8041_s8 + $0x58] sm:$0xff] }
 0x4b9   : > { %v4664_v51 = vpack.c.bf16 %v3028_v50, %v3027_v19  ;;  %4663 = vmatprep.subr.bf16.mxu0 %v8410_v13 }
 0x4ba   : > { %2344 = vadd.xlane.f32.xlu0 %v2343_v36  ;;  %v3029_v36 = vld [vmem:[%s8041_s8 + $0x30] sm:$0xff] }
 0x4bc   : > { %2425 = vadd.xlane.f32.xlu1 %v2424_v46  ;;  %v3030_v46 = vld [vmem:[%s8041_s8 + $0x38] sm:$0xff]  ;;  %4665 = vmatpush1.bf16.msra.mxu0 %v4664_v51  ;;  %v4673_v51 = vpack.c.bf16 %v3034_v45, %v3033_v21 }
 0x4bd   : > { %4666 = vmatprep.subr.bf16.mxu0 %v8410_v13 }
 0x4be   : > { %2347 = vadd.xlane.f32.xlu0 %v2346_v52  ;;  %v4667_v52 = vpack.c.bf16 %v3030_v46, %v3029_v36  ;;  %v3035_v36 = vld [vmem:[%s8041_s8 + $0x60] sm:$0xff]  ;;  %v3036_v46 = vld [vmem:[%s8041_s8 + $0x68] sm:$0xff] }
 0x4c0   : > { %2428 = vadd.xlane.f32.xlu1 %v2427_v31  ;;  %v3031_v31 = vld [vmem:[%s8041_s8 + $0x40] sm:$0xff]  ;;  %4668 = vmatpush1.bf16.msra.mxu0 %v4667_v52  ;;  %v4676_v52 = vpack.c.bf16 %v3036_v46, %v3035_v36 }
 0x4c1   : > { %v4670_v1 = vpack.c.bf16 %v3032_v37, %v3031_v31  ;;  %4669 = vmatprep.subr.bf16.mxu0 %v8410_v13 }
 0x4c4   : > { %4671 = vmatpush1.bf16.msra.mxu0 %v4670_v1 }
 0x4c5   : > { %4672 = vmatprep.subr.bf16.mxu0 %v8410_v13 }
 0x4c8   : > { %4674 = vmatpush1.bf16.msra.mxu0 %v4673_v51 }
 0x4c9   : > { %4675 = vmatprep.subr.bf16.mxu0 %v8410_v13 }
 0x4cc   : > { %4677 = vmatpush1.bf16.msra.mxu0 %v4676_v52 }
 0x4cd   : > { %4678 = vmatprep.subr.bf16.mxu0 %v8410_v13 }
 0x4dc   : > { %v2306_v5 = vpop.xlane.xlu1 %2305 }
 0x4dd   : > { %v2353_v24 = vmul.f32 0.03125, %v2306_v5 }
 0x4de   : > { %v2387_v18 = vpop.xlane.xlu0 %2386 }
 0x4df   : > { %v2449_v19 = vmul.f32 %v2353_v24, %v2353_v24  ;;  %v2433_v50 = vmul.f32 0.03125, %v2387_v18  ;;  %v2513_v25 = vsub.f32 %v6573_v10, %v2353_v24  ;;  %v3037_v10 = vld [vmem:[%s8041_s8 + $0x70] sm:$0xff] }
 0x4e1   : > { %v2465_v5 = vsub.f32 %v2433_v50, %v2449_v19 }
 0x4e3   : > { %v2481_v31 = vadd.f32 1e-05, %v2465_v5 }
 0x4e5   : > { %4997 = vrsqrt.f32 %v2481_v31 }
 0x4ef   : > { %v4998_v31 = vpop.eup %4997 }
 0x513   : > { %v2351_v37 = vpop.xlane.xlu0 %2350 }
 0x514   : > { %v2368_v18 = vmul.f32 0.03125, %v2351_v37  ;;  %v6761_v37 = vld [vmem:[%s8039_s6] ss:$0 sm:$0xff] }
 0x515   : > { %v2432_v1 = vpop.xlane.xlu1 %2431 }
 0x516   : > { %v2464_v21 = vmul.f32 %v2368_v18, %v2368_v18  ;;  %v2448_v45 = vmul.f32 0.03125, %v2432_v1  ;;  %v2528_v24 = vsub.f32 %v6594_v32, %v2368_v18 }
 0x517   : > { %v2309_v14 = vpop.xlane.xlu0 %2308 }
 0x518   : > { %v2480_v6 = vsub.f32 %v2448_v45, %v2464_v21  ;;  %v6752_v8 = vmul.f32 0.03125, %v2309_v14 }
 0x519   : > { %v2390_v26 = vpop.xlane.xlu1 %2389 }
 0x51a   : > { %v2496_v19 = vadd.f32 1e-05, %v2480_v6  ;;  %v2450_v50 = vmul.f32 %v6752_v8, %v6752_v8  ;;  %v2434_v51 = vmul.f32 0.03125, %v2390_v26 }
 0x51b   : > { %v2312_v36 = vpop.xlane.xlu0 %2311 }
 0x51c   : > { %4999 = vrsqrt.f32 %v2496_v19  ;;  %v2466_v46 = vsub.f32 %v2434_v51, %v2450_v50  ;;  %v6756_v5 = vmul.f32 0.03125, %v2312_v36  ;;  %v2536_v19 = vmul.f32 %v4998_v31, %v6761_v37 }
 0x51d   : > { %v2393_v52 = vpop.xlane.xlu1 %2392 }
 0x51e   : > { %v2482_v14 = vadd.f32 1e-05, %v2466_v46  ;;  %v2451_v6 = vmul.f32 %v6756_v5, %v6756_v5  ;;  %v2435_v1 = vmul.f32 0.03125, %v2393_v52  ;;  %v6776_v52 = vld [vmem:[%s8040_s7] ss:$0 sm:$0xff] }
 0x51f   : > { %v2315_v21 = vpop.xlane.xlu0 %2314 }
 0x520   : > { %5001 = vrsqrt.f32 %v2482_v14  ;;  %v2467_v26 = vsub.f32 %v2435_v1, %v2451_v6  ;;  %v6765_v45 = vmul.f32 0.03125, %v2315_v21  ;;  %v2552_v14 = vmul.f32 %v2536_v19, %v2513_v25 }
 0x521   : > { %v2396_v50 = vpop.xlane.xlu1 %2395 }
 0x522   : > { %v2483_v51 = vadd.f32 1e-05, %v2467_v26  ;;  %v2452_v36 = vmul.f32 %v6765_v45, %v6765_v45  ;;  %v2436_v35 = vmul.f32 0.03125, %v2396_v50 }
 0x523   : > { %v2318_v46 = vpop.xlane.xlu0 %2317 }
 0x524   : > { %5003 = vrsqrt.f32 %v2483_v51  ;;  %v2468_v33 = vsub.f32 %v2436_v35, %v2452_v36  ;;  %v6771_v61 = vmul.f32 0.03125, %v2318_v46  ;;  %v3038_v35 = vld [vmem:[%s8041_s8 + $0x78] sm:$0xff]  ;;  %v6791_v36 = vadd.f32 %v6776_v52, %v2552_v14 }
 0x525   : > { %v2399_v31 = vpop.xlane.xlu1 %2398  ;;  %v4679_v19 = vpack.c.bf16 %v3038_v35, %v3037_v10 }
 0x526   : > { %v5000_v6 = vpop.eup %4999  ;;  %v2484_v1 = vadd.f32 1e-05, %v2468_v33  ;;  %v2453_v21 = vmul.f32 %v6771_v61, %v6771_v61  ;;  %v2437_v26 = vmul.f32 0.03125, %v2399_v31 }
 0x527   : > { %v2551_v50 = vmul.f32 %v5000_v6, %v6761_v37  ;;  %v2321_v25 = vpop.xlane.xlu0 %2320  ;;  %4680 = vmatpush1.bf16.msra.mxu0 %v4679_v19  ;;  %v2514_v6 = vsub.f32 %v6592_v43, %v6752_v8 }
 0x528   : > { %5005 = vrsqrt.f32 %v2484_v1  ;;  %v2469_v33 = vsub.f32 %v2437_v26, %v2453_v21  ;;  %v6788_v51 = vmul.f32 0.03125, %v2321_v25  ;;  %4681 = vmatprep.subr.bf16.mxu0 %v8410_v13  ;;  %v3039_v21 = vld [vmem:[%s8041_s8 + $0x80] sm:$0xff]  ;;  %v3040_v26 = vld [vmem:[%s8041_s8 + $0x88] sm:$0xff] }
 0x529   : > { %v2567_v46 = vmul.f32 %v2551_v50, %v2528_v24  ;;  %v2402_v31 = vpop.xlane.xlu1 %2401  ;;  %v4682_v24 = vpack.c.bf16 %v3040_v26, %v3039_v21  ;;  %v2516_v21 = vsub.f32 %v6607_v9, %v6765_v45 }
 0x52a   : > { %v5002_v49 = vpop.eup %5001  ;;  %v2485_v47 = vadd.f32 1e-05, %v2469_v33  ;;  %v2454_v48 = vmul.f32 %v6788_v51, %v6788_v51  ;;  %v2438_v32 = vmul.f32 0.03125, %v2402_v31  ;;  %v2518_v2 = vsub.f32 %v6621_v0, %v6788_v51 }
 0x52b   : > { %v6797_v18 = vadd.f32 %v6776_v52, %v2567_v46  ;;  %v2537_v14 = vmul.f32 %v5002_v49, %v6761_v37  ;;  %v2324_v1 = vpop.xlane.xlu0 %2323  ;;  %v2639_v49 = vrot.slane %v6791_v36, 7  ;;  %4683 = vmatpush1.bf16.msra.mxu0 %v4682_v24 }
 0x52c   : > { %5007 = vrsqrt.f32 %v2485_v47  ;;  %v2470_v10 = vsub.f32 %v2438_v32, %v2454_v48  ;;  %v6808_v35 = vmul.f32 0.03125, %v2324_v1  ;;  %v2515_v32 = vsub.f32 %v6600_v4, %v6756_v5  ;;  %4684 = vmatprep.subr.bf16.mxu0 %v8410_v13 }
 0x52d   : > { %v2553_v50 = vmul.f32 %v2537_v14, %v2514_v6  ;;  %v2405_v25 = vpop.xlane.xlu1 %2404  ;;  %v8168_v43 = vrot.slane %v6797_v18, 7 }
 0x52e   : > { %v5004_v19 = vpop.eup %5003  ;;  %v2486_v33 = vadd.f32 1e-05, %v2470_v10  ;;  %v2455_v46 = vmul.f32 %v6808_v35, %v6808_v35  ;;  %v2439_v31 = vmul.f32 0.03125, %v2405_v25 }
 0x52f   : > { %v6817_v48 = vadd.f32 %v6776_v52, %v2553_v50  ;;  %v2538_v6 = vmul.f32 %v5004_v19, %v6761_v37  ;;  %v2327_v14 = vpop.xlane.xlu0 %2326  ;;  %v2670_v1 = vsel %vm8518_vm6, %v8168_v43, %v2639_v49  ;;  %vm8528_vm6 = vmmov %vm8526_vm0 }
 0x530   : > { %5009 = vrsqrt.f32 %v2486_v33  ;;  %v2471_v26 = vsub.f32 %v2439_v31, %v2455_v46  ;;  %v6829_v10 = vmul.f32 0.03125, %v2327_v14  ;;  %v2671_v9 = vsel %vm8445_vm7, %v2670_v1, 0.0 }
 0x531   : > { %v2554_v24 = vmul.f32 %v2538_v6, %v2515_v32  ;;  %v2408_v50 = vpop.xlane.xlu1 %2407  ;;  %v4902_v4 = vpack.i.bf16 %v6817_v48, %v6791_v36  ;;  %v8171_v5 = vrot.slane %v6817_v48, 2  ;;  %v2640_v25 = vrot.slane %v6817_v48, 7 }
 0x532   : > { %v5006_v19 = vpop.eup %5005  ;;  %v2487_v43 = vadd.f32 1e-05, %v2471_v26  ;;  %v2456_v47 = vmul.f32 %v6829_v10, %v6829_v10  ;;  %v2440_v8 = vmul.f32 0.03125, %v2408_v50  ;;  %v8519_v31 = vrot.slane %v6791_v36, 2 }
 0x533   : > { %v6840_v45 = vadd.f32 %v6776_v52, %v2554_v24  ;;  %v2539_v33 = vmul.f32 %v5006_v19, %v6761_v37  ;;  %v2330_v46 = vpop.xlane.xlu0 %2329  ;;  %4903 = vrot.lane.b32.xlu1 %v4902_v4, %s8413_s0  ;;  %v2669_v6 = vsel %vm8521_vm3, %v2639_v49, %v2640_v25  ;;  %v2688_v4 = vrot.slane %v6817_v48, 1  ;;  %vm8530_vm3 = vmmov %vm8523_vm4 }
 0x534   : > { %v2765_v32 = vsel %vm8520_vm5, %v8519_v31, %v8171_v5  ;;  %5011 = vrsqrt.f32 %v2487_v43  ;;  %v2472_v14 = vsub.f32 %v2440_v8, %v2456_v47  ;;  %v6852_v1 = vmul.f32 0.03125, %v2330_v46  ;;  %vm8529_vm5 = vmmov %vm8523_vm4 }
 0x535   : > { %4291 = vmatprep.mubr.msk.f32.mxu0 %vm8522_vm1, %v2765_v32  ;;  %v4897_v26 = vpack.i.bf16 %v2669_v6, %v2671_v9  ;;  %v2555_v24 = vmul.f32 %v2539_v33, %v2516_v21  ;;  %v2411_v50 = vpop.xlane.xlu1 %2410  ;;  %v2689_v19 = vrot.slane %v6840_v45, 1  ;;  %v2641_v56 = vrot.slane %v6840_v45, 7  ;;  %vm8531_vm1 = vmmov %vm8526_vm0 }
 0x536   : > { %v5008_v17 = vpop.eup %5007  ;;  %v2517_v31 = vsub.f32 %v6614_v12, %v6771_v61  ;;  %v2488_v49 = vadd.f32 1e-05, %v2472_v14  ;;  %v2457_v8 = vmul.f32 %v6852_v1, %v6852_v1  ;;  %v2441_v43 = vmul.f32 0.03125, %v2411_v50 }
 0x537   : > { %4898 = vrot.lane.b32.xlu0 %v4897_v26, %s8409_s2  ;;  %v6864_v47 = vadd.f32 %v6776_v52, %v2555_v24  ;;  %v2540_v21 = vmul.f32 %v5008_v17, %v6761_v37  ;;  %v2333_v9 = vpop.xlane.xlu0 %2332  ;;  %v2716_v33 = vsel %vm8523_vm4, %v2688_v4, %v2689_v19  ;;  %v8524_v46 = vrot.slane %v6791_v36, 1  ;;  %vm8532_vm4 = vmmov %vm8526_vm0 }
 0x538   : > { %5013 = vrsqrt.f32 %v2488_v49  ;;  %v2473_v12 = vsub.f32 %v2441_v43, %v2457_v8  ;;  %v6873_v32 = vmul.f32 0.03125, %v2333_v9  ;;  %v2720_v6 = vsel %vm5414_vm10, %v2716_v33, 0.0 }
 0x539   : > { %v2717_v61 = vsel %vm8525_vm13, %v8524_v46, %v2688_v4  ;;  %v2556_v14 = vmul.f32 %v2540_v21, %v2517_v31  ;;  %v2414_v26 = vpop.xlane.xlu1 %2413  ;;  %v2642_v17 = vrot.slane %v6864_v47, 7  ;;  %v2668_v50 = vsel %vm8526_vm0, %v2640_v25, %v2641_v56  ;;  %vm8533_vm13 = vmmov %vm8530_vm3 }
 0x53a   : > { %v4907_v24 = vpack.i.bf16 %v2720_v6, %v2717_v61  ;;  %v5010_v5 = vpop.eup %5009  ;;  %v2489_v4 = vadd.f32 1e-05, %v2473_v12  ;;  %v2458_v49 = vmul.f32 %v6873_v32, %v6873_v32  ;;  %v2442_v8 = vmul.f32 0.03125, %v2414_v26  ;;  %vm8534_vm0 = vmmov %vm8530_vm3 }
 0x53b   : > { %v6885_v43 = vadd.f32 %v6776_v52, %v2556_v14  ;;  %v2541_v31 = vmul.f32 %v5010_v5, %v6761_v37  ;;  %v2336_v21 = vpop.xlane.xlu0 %2335  ;;  %v2667_v25 = vsel %vm8528_vm6, %v2641_v56, %v2642_v17  ;;  %v2673_v9 = vsel %vm8452_vm12, %v2668_v50, 0.0  ;;  %vm8535_vm6 = vmmov %vm8531_vm1 }
 0x53c   : > { %4908 = vrot.lane.b32.xlu1 %v4907_v24, %s8527_s22  ;;  %5015 = vrsqrt.f32 %v2489_v4  ;;  %v2474_v0 = vsub.f32 %v2442_v8, %v2458_v49  ;;  %v6893_v51 = vmul.f32 0.03125, %v2336_v21  ;;  %v4912_v33 = vpack.i.bf16 %v2667_v25, %v2673_v9 }
 0x53d   : > { %v2557_v46 = vmul.f32 %v2541_v31, %v2518_v2  ;;  %v2417_v61 = vpop.xlane.xlu1 %2416  ;;  %v4917_v12 = vpack.i.bf16 %v6864_v47, %v6840_v45  ;;  %v2690_v5 = vrot.slane %v6864_v47, 1  ;;  %v2691_v6 = vrot.slane %v6885_v43, 1 }
 0x53e   : > { %v5012_v14 = vpop.eup %5011  ;;  %v2519_v56 = vsub.f32 %v6628_v42, %v6808_v35  ;;  %v2490_v26 = vadd.f32 1e-05, %v2474_v0  ;;  %v2459_v24 = vmul.f32 %v6893_v51, %v6893_v51  ;;  %v2443_v50 = vmul.f32 0.03125, %v2417_v61  ;;  %4913 = vrot.lane.b32.xlu0 %v4912_v33, %s8409_s2 }
 0x53f   : > { %v6905_v2 = vadd.f32 %v6776_v52, %v2557_v46  ;;  %v2542_v4 = vmul.f32 %v5012_v14, %v6761_v37  ;;  %v2339_v49 = vpop.xlane.xlu0 %2338  ;;  %v2714_v42 = vsel %vm8529_vm5, %v2690_v5, %v2691_v6  ;;  %v2715_v35 = vsel %vm8530_vm3, %v2689_v19, %v2690_v5  ;;  %vm8536_vm5 = vmmov %vm8531_vm1 }
 0x540   : > { %4918 = vrot.lane.b32.xlu1 %v4917_v12, %s8413_s0  ;;  %5017 = vrsqrt.f32 %v2490_v26  ;;  %v2475_v8 = vsub.f32 %v2443_v50, %v2459_v24  ;;  %v6915_v31 = vmul.f32 0.03125, %v2339_v49  ;;  %v2722_v21 = vsel %vm5438_vm11, %v2714_v42, 0.0  ;;  %vm8537_vm3 = vmmov %vm8534_vm0 }
 0x541   : > { %v2558_v25 = vmul.f32 %v2542_v4, %v2519_v56  ;;  %v2420_v9 = vpop.xlane.xlu1 %2419  ;;  %v4922_v0 = vpack.i.bf16 %v2722_v21, %v2715_v35  ;;  %v2643_v33 = vrot.slane %v6885_v43, 7  ;;  %v2644_v46 = vrot.slane %v6905_v2, 7 }
 0x542   : > { %v5014_v61 = vpop.eup %5013  ;;  %v2520_v12 = vsub.f32 %v6635_v15, %v6829_v10  ;;  %v2491_v14 = vadd.f32 1e-05, %v2475_v8  ;;  %v2460_v19 = vmul.f32 %v6915_v31, %v6915_v31  ;;  %v2444_v5 = vmul.f32 0.03125, %v2420_v9 }
 0x543   : > { %v6926_v26 = vadd.f32 %v6776_v52, %v2558_v25  ;;  %v2543_v56 = vmul.f32 %v5014_v61, %v6761_v37  ;;  %v2342_v24 = vpop.xlane.xlu0 %2341  ;;  %4923 = vrot.lane.b32.xlu0 %v4922_v0, %s8527_s22  ;;  %v2665_v50 = vsel %vm8531_vm1, %v2643_v33, %v2644_v46  ;;  %v2666_v4 = vsel %vm8532_vm4, %v2642_v17, %v2643_v33  ;;  %vm8538_vm1 = vmmov %vm8534_vm0 }
 0x544   : > { %5019 = vrsqrt.f32 %v2491_v14  ;;  %v2476_v15 = vsub.f32 %v2444_v5, %v2460_v19  ;;  %v6934_v10 = vmul.f32 0.03125, %v2342_v24  ;;  %v2675_v49 = vsel %vm8460_vm8, %v2666_v4, 0.0 }
 0x545   : > { %v2559_v42 = vmul.f32 %v2543_v56, %v2520_v12  ;;  %v2521_v35 = vsub.f32 %v6642_v29, %v6852_v1  ;;  %v2423_v8 = vpop.xlane.xlu1 %2422  ;;  %v4927_v21 = vpack.i.bf16 %v2665_v50, %v2675_v49  ;;  %v4932_v25 = vpack.i.bf16 %v6905_v2, %v6885_v43 }
 0x546   : > { %v5016_v9 = vpop.eup %5015  ;;  %v2492_v0 = vadd.f32 1e-05, %v2476_v15  ;;  %v2461_v17 = vmul.f32 %v6934_v10, %v6934_v10  ;;  %v2445_v33 = vmul.f32 0.03125, %v2423_v8  ;;  %v2692_v61 = vrot.slane %v6905_v2, 1 }
 0x547   : > { %v6946_v14 = vadd.f32 %v6776_v52, %v2559_v42  ;;  %v2544_v12 = vmul.f32 %v5016_v9, %v6761_v37  ;;  %v2522_v29 = vsub.f32 %v6650_v62, %v6873_v32  ;;  %4928 = vrot.lane.b32.xlu1 %v4927_v21, %s8409_s2  ;;  %v2345_v1 = vpop.xlane.xlu0 %2344  ;;  %4933 = vrot.lane.b32.xlu0 %v4932_v25, %s8413_s0  ;;  %v2693_v19 = vrot.slane %v6926_v26, 1 }
 0x548   : > { %v2523_v5 = vsub.f32 %v6658_v30, %v6893_v51  ;;  %5021 = vrsqrt.f32 %v2492_v0  ;;  %v2477_v56 = vsub.f32 %v2445_v33, %v2461_v17  ;;  %v6956_v24 = vmul.f32 0.03125, %v2345_v1 }
 0x549   : > { %v2560_v50 = vmul.f32 %v2544_v12, %v2521_v35  ;;  %v2426_v4 = vpop.xlane.xlu1 %2425  ;;  %v2712_v15 = vsel %vm8533_vm13, %v2692_v61, %v2693_v19  ;;  %v2645_v62 = vrot.slane %v6926_v26, 7  ;;  %v2646_v32 = vrot.slane %v6946_v14, 7  ;;  %vm8539_vm13 = vmmov %vm8532_vm4 }
 0x54a   : > { %v5018_v49 = vpop.eup %5017  ;;  %v2493_v42 = vadd.f32 1e-05, %v2477_v56  ;;  %v2462_v8 = vmul.f32 %v6956_v24, %v6956_v24  ;;  %v2446_v21 = vmul.f32 0.03125, %v2426_v4  ;;  %v2713_v30 = vsel %vm8534_vm0, %v2691_v6, %v2692_v61 }
 0x54b   : > { %v6969_v51 = vadd.f32 %v6776_v52, %v2560_v50  ;;  %v2545_v35 = vmul.f32 %v5018_v49, %v6761_v37  ;;  %v2724_v25 = vsel %vm5537_vm14, %v2712_v15, 0.0  ;;  %v2348_v9 = vpop.xlane.xlu0 %2347  ;;  %v2663_v0 = vsel %vm8535_vm6, %v2645_v62, %v2646_v32  ;;  %vm8541_vm6 = vmmov %vm8538_vm1 }
 0x54c   : > { %5023 = vrsqrt.f32 %v2493_v42  ;;  %v2478_v17 = vsub.f32 %v2446_v21, %v2462_v8  ;;  %v4937_v33 = vpack.i.bf16 %v2724_v25, %v2713_v30  ;;  %v6976_v12 = vmul.f32 0.03125, %v2348_v9 }
 0x54d   : > { %v2561_v1 = vmul.f32 %v2545_v35, %v2522_v29  ;;  %v2429_v56 = vpop.xlane.xlu1 %2428  ;;  %v2664_v6 = vsel %vm8536_vm5, %v2644_v46, %v2645_v62  ;;  %v2694_v61 = vrot.slane %v6946_v14, 1  ;;  %v2695_v50 = vrot.slane %v6969_v51, 1  ;;  %vm8542_vm5 = vmmov %vm8532_vm4 }
 0x54e   : > { %v5020_v4 = vpop.eup %5019  ;;  %v2494_v15 = vadd.f32 1e-05, %v2478_v17  ;;  %4938 = vrot.lane.b32.xlu1 %v4937_v33, %s8527_s22  ;;  %v2463_v49 = vmul.f32 %v6976_v12, %v6976_v12  ;;  %v2447_v42 = vmul.f32 0.03125, %v2429_v56  ;;  %v4947_v8 = vpack.i.bf16 %v6946_v14, %v6926_v26 }
 0x54f   : > { %v6988_v29 = vadd.f32 %v6776_v52, %v2561_v1  ;;  %v2546_v46 = vmul.f32 %v5020_v4, %v6761_v37  ;;  %v2677_v62 = vsel %vm8465_vm9, %v2664_v6, 0.0  ;;  %v2710_v21 = vsel %vm8537_vm3, %v2694_v61, %v2695_v50  ;;  %vm8543_vm3 = vmmov %vm8538_vm1 }
 0x550   : > { %5025 = vrsqrt.f32 %v2494_v15  ;;  %v2479_v30 = vsub.f32 %v2447_v42, %v2463_v49  ;;  %v4942_v35 = vpack.i.bf16 %v2663_v0, %v2677_v62  ;;  %v2711_v25 = vsel %vm8538_vm1, %v2693_v19, %v2694_v61 }
 0x551   : > { %v2562_v9 = vmul.f32 %v2546_v46, %v2523_v5  ;;  %v2726_v17 = vsel %vm5547_vm15, %v2710_v21, 0.0  ;;  %v2647_v33 = vrot.slane %v6969_v51, 7  ;;  %v2648_v1 = vrot.slane %v6988_v29, 7 }
 0x552   : > { %v5022_v56 = vpop.eup %5021  ;;  %v2524_v6 = vsub.f32 %v6666_v27, %v6915_v31  ;;  %v2495_v4 = vadd.f32 1e-05, %v2479_v30  ;;  %4943 = vrot.lane.b32.xlu0 %v4942_v35, %s8409_s2  ;;  %4948 = vrot.lane.b32.xlu1 %v4947_v8, %s8413_s0  ;;  %v4952_v0 = vpack.i.bf16 %v2726_v17, %v2711_v25  ;;  %v3041_v27 = vld [vmem:[%s8041_s8 + $0x90] sm:$0xff]  ;;  %v3042_v31 = vld [vmem:[%s8041_s8 + $0x98] sm:$0xff]  ;;  %vm8540_vm0 = vnez %v8469_v16 }
 0x553   : > { %v7006_v19 = vadd.f32 %v6776_v52, %v2562_v9  ;;  %v2547_v5 = vmul.f32 %v5022_v56, %v6761_v37  ;;  %v2661_v61 = vsel %vm8532_vm4, %v2647_v33, %v2648_v1  ;;  %v2662_v15 = vsel %vm8539_vm13, %v2646_v32, %v2647_v33 }
 0x554   : > { %5027 = vrsqrt.f32 %v2495_v4  ;;  %v2679_v49 = vsel %vm8540_vm0, %v2662_v15, 0.0  ;;  %v2696_v42 = vrot.slane %v6988_v29, 1  ;;  %v2591_v8 = vrot.slane %v6791_v36, 6 }
 0x555   : > { %v2563_v46 = vmul.f32 %v2547_v5, %v2524_v6  ;;  %v4957_v62 = vpack.i.bf16 %v2661_v61, %v2679_v49  ;;  %v2697_v32 = vrot.slane %v7006_v19, 1  ;;  %v2649_v21 = vrot.slane %v7006_v19, 7 }
 0x556   : > { %v5024_v30 = vpop.eup %5023  ;;  %v2525_v35 = vsub.f32 %v6674_v40, %v6934_v10  ;;  %4953 = vrot.lane.b32.xlu0 %v4952_v0, %s8527_s22  ;;  %v4685_v25 = vpack.c.bf16 %v3042_v31, %v3041_v27  ;;  %v2737_v9 = vrot.slane %v6840_v45, 2  ;;  %v2592_v17 = vrot.slane %v6817_v48, 6 }
 0x557   : > { %v7031_v33 = vadd.f32 %v6776_v52, %v2563_v46  ;;  %v2548_v56 = vmul.f32 %v5024_v30, %v6761_v37  ;;  %4958 = vrot.lane.b32.xlu1 %v4957_v62, %s8409_s2  ;;  %v2708_v6 = vsel %vm8541_vm6, %v2696_v42, %v2697_v32  ;;  %v2660_v40 = vsel %vm8542_vm5, %v2648_v1, %v2649_v21 }
 0x558   : > { %v4962_v10 = vpack.i.bf16 %v6988_v29, %v6969_v51  ;;  %v2709_v4 = vsel %vm8543_vm3, %v2695_v50, %v2696_v42  ;;  %vm8544_vm1 = vnez %v8431_v57  ;;  %4686 = vmatpush1.bf16.msra.mxu0 %v4685_v25  ;;  %v8545_v5 = vrot.slane %v6817_v48, 2 }
 0x559   : > { %v2728_v0 = vsel %vm8544_vm1, %v2708_v6, 0.0  ;;  %vm8546_vm4 = vcmp.lt.s32.totalorder %v5358_v60, 6  ;;  %v2564_v15 = vmul.f32 %v2548_v56, %v2525_v35  ;;  %v2526_v1 = vsub.f32 %v6682_v59, %v6956_v24  ;;  %4711 = vmatprep.subr.bf16.mxu0 %v8410_v13 }
 0x55a   : > { %v7049_v61 = vsel %vm8546_vm4, %v8545_v5, %v2737_v9  ;;  %v4967_v27 = vpack.i.bf16 %v2728_v0, %v2709_v4  ;;  %v2650_v31 = vrot.slane %v7031_v33, 7  ;;  %v5026_v50 = vpop.eup %5025  ;;  %4963 = vrot.lane.b32.xlu0 %v4962_v10, %s8413_s0  ;;  %vm8547_vm13 = vnez %v8474_v28  ;;  %vm8549_vm3 = vmmov %vm8546_vm4 }
 0x55b   : > { %v2681_v49 = vsel %vm8547_vm13, %v2660_v40, 0.0  ;;  %v4977_v48 = vpack.i.bf16 %v7031_v33, %v7006_v19  ;;  %vm8548_vm6 = vcmp.lt.s32.totalorder %v5358_v60, 2  ;;  %v2738_v59 = vrot.slane %v6864_v47, 2 }
 0x55c   : > { %v7064_v42 = vsel %vm8548_vm6, %v2591_v8, %v2592_v17  ;;  %v7068_v24 = vadd.f32 %v6776_v52, %v2564_v15  ;;  %v2549_v46 = vmul.f32 %v5026_v50, %v6761_v37  ;;  %4968 = vrot.lane.b32.xlu1 %v4967_v27, %s8527_s22  ;;  %v2659_v62 = vsel %vm8542_vm5, %v2649_v21, %v2650_v31  ;;  %vm8550_vm4 = vmmov %vm8548_vm6 }
 0x55d   : > { %v2593_v30 = vrot.slane %v6840_v45, 6  ;;  %v4972_v35 = vpack.i.bf16 %v2659_v62, %v2681_v49  ;;  %v2698_v25 = vrot.slane %v7031_v33, 1  ;;  %v7078_v56 = vsel %vm8549_vm3, %v2737_v9, %v2738_v59  ;;  %vm8551_vm6 = vmmov %vm8549_vm3 }
 0x55e   : > { %v2739_v6 = vrot.slane %v6885_v43, 2  ;;  %v2565_v40 = vmul.f32 %v2549_v46, %v2526_v1  ;;  %v2699_v10 = vrot.slane %v7068_v24, 1  ;;  %v2651_v4 = vrot.slane %v7068_v24, 7  ;;  %v5028_v21 = vpop.eup %5027 }
 0x55f   : > { %v7085_v0 = vsel %vm8550_vm4, %v2592_v17, %v2593_v30  ;;  %v2527_v45 = vsub.f32 %v6690_v20, %v6976_v12  ;;  %4973 = vrot.lane.b32.xlu0 %v4972_v35, %s8409_s2  ;;  %v2594_v5 = vrot.slane %v6864_v47, 6  ;;  %v2740_v15 = vrot.slane %v6905_v2, 2 }
 0x560   : > { %v7092_v9 = vsel %vm8551_vm6, %v2738_v59, %v2739_v6  ;;  %v7097_v1 = vadd.f32 %v6776_v52, %v2565_v40  ;;  %v2550_v17 = vmul.f32 %v5028_v21, %v6761_v37  ;;  %4978 = vrot.lane.b32.xlu1 %v4977_v48, %s8413_s0  ;;  %vm8552_vm5 = vcmp.lt.s32.totalorder %v5358_v60, 7 }
 0x561   : > { %v2706_v20 = vsel %vm8552_vm5, %v2698_v25, %v2699_v10  ;;  %vm8553_vm3 = vcmp.lt.s32.totalorder %v5358_v60, 1  ;;  %vm8554_vm4 = vmmov %vm8552_vm5  ;;  %vm8555_vm6 = vnez %v8435_v23  ;;  %vm8556_vm13 = vcmp.lt.s32.totalorder %v5358_v60, 2 }
 0x562   : > { %v2658_v12 = vsel %vm8553_vm3, %v2650_v31, %v2651_v4  ;;  %v2707_v27 = vsel %vm8554_vm4, %v2697_v32, %v2698_v25  ;;  %v2730_v47 = vsel %vm8555_vm6, %v2706_v20, 0.0  ;;  %v7111_v50 = vsel %vm8556_vm13, %v2593_v30, %v2594_v5  ;;  %vm8559_vm13 = vmmov %vm8553_vm3 }
 0x563   : > { %v2566_v49 = vmul.f32 %v2550_v17, %v2527_v45  ;;  %v4982_v37 = vpack.i.bf16 %v2730_v47, %v2707_v27  ;;  %v2652_v48 = vrot.slane %v7097_v1, 7  ;;  %vm8557_vm0 = vnez %v8479_v44 }
 0x564   : > { %v2683_v59 = vsel %vm8557_vm0, %v2658_v12, 0.0  ;;  %vm8558_vm5 = vcmp.lt.s32.totalorder %v5358_v60, 6  ;;  %v2595_v32 = vrot.slane %v6885_v43, 6  ;;  %v2741_v46 = vrot.slane %v6926_v26, 2 }
 0x565   : > { %v7118_v31 = vsel %vm8558_vm5, %v2739_v6, %v2740_v15  ;;  %v7123_v62 = vadd.f32 %v6776_v52, %v2566_v49  ;;  %4983 = vrot.lane.b32.xlu0 %v4982_v37, %s8527_s22  ;;  %v2657_v30 = vsel %vm8559_vm13, %v2651_v4, %v2652_v48  ;;  %v2596_v35 = vrot.slane %v6905_v2, 6  ;;  %vm8561_vm4 = vmmov %vm8558_vm5 }
 0x566   : > { %v2742_v25 = vrot.slane %v6946_v14, 2  ;;  %v4987_v40 = vpack.i.bf16 %v2657_v30, %v2683_v59  ;;  %v2700_v6 = vrot.slane %v7097_v1, 1  ;;  %vm8560_vm3 = vcmp.lt.s32.totalorder %v5358_v60, 2  ;;  %vm8563_vm13 = vmmov %vm8561_vm4 }
 0x567   : > { %v7133_v43 = vsel %vm8560_vm3, %v2594_v5, %v2595_v32  ;;  %v7137_v52 = vsel %vm8561_vm4, %v2740_v15, %v2741_v46  ;;  %v4992_v21 = vpack.i.bf16 %v7097_v1, %v7068_v24  ;;  %v2701_v4 = vrot.slane %v7123_v62, 1  ;;  %vm8562_vm5 = vmmov %vm8560_vm3 }
 0x568   : > { %v2653_v2 = vrot.slane %v7123_v62, 7  ;;  %4988 = vrot.lane.b32.xlu1 %v4987_v40, %s8409_s2  ;;  %v7146_v45 = vsel %vm8562_vm5, %v2595_v32, %v2596_v35  ;;  %v7150_v5 = vsel %vm8563_vm13, %v2741_v46, %v2742_v25  ;;  %v2597_v15 = vrot.slane %v6926_v26, 6  ;;  %vm8566_vm0 = vmmov %vm8562_vm5 }
 0x569   : > { %v2743_v17 = vrot.slane %v6969_v51, 2  ;;  %4993 = vrot.lane.b32.xlu0 %v4992_v21, %s8413_s0  ;;  %vm8564_vm3 = vcmp.lt.s32.totalorder %v5358_v60, 7  ;;  %vm8567_vm5 = vmmov %vm8563_vm13  ;;  %vm8568_vm13 = vnez %v8439_v39  ;;  %vm8569_vm9 = vcmp.lt.s32.totalorder %v5358_v60, 1 }
 0x56a   : > { %v2704_v20 = vsel %vm8564_vm3, %v2700_v6, %v2701_v4  ;;  %vm8565_vm4 = vmmov %vm8564_vm3  ;;  %v7161_v27 = vsel %vm8566_vm0, %v2596_v35, %v2597_v15  ;;  %v2656_v49 = vsel %vm8569_vm9, %v2652_v48, %v2653_v2  ;;  %v2598_v37 = vrot.slane %v6946_v14, 6 }
 0x56b   : > { %v2705_v12 = vsel %vm8565_vm4, %v2699_v10, %v2700_v6  ;;  %v7165_v47 = vsel %vm8567_vm5, %v2742_v25, %v2743_v17  ;;  %v2732_v26 = vsel %vm8568_vm13, %v2704_v20, 0.0  ;;  %v2744_v59 = vrot.slane %v6988_v29, 2  ;;  %vm8570_vm9 = vmmov %vm8567_vm5 }
 0x56c   : > { %2951 = vrot.lane.b32.xlu1 %v2705_v12, %s8527_s22  ;;  %v2599_v10 = vrot.slane %v6969_v51, 6  ;;  %v2745_v32 = vrot.slane %v7006_v19, 2  ;;  %v2600_v46 = vrot.slane %v6988_v29, 6  ;;  %v2746_v30 = vrot.slane %v7031_v33, 2  ;;  %vm8571_vm3 = vmmov %vm8566_vm0 }
 0x56d   : > { %2953 = vrot.lane.b32.xlu0 %v2732_v26, %s8527_s22  ;;  %v7181_v35 = vsel %vm8566_vm0, %v2597_v15, %v2598_v37  ;;  %v7185_v14 = vsel %vm8570_vm9, %v2743_v17, %v2744_v59  ;;  %v2601_v48 = vrot.slane %v7006_v19, 6  ;;  %v2747_v51 = vrot.slane %v7068_v24, 2  ;;  %vm8572_vm4 = vmmov %vm8567_vm5 }
 0x56e   : > { %v7191_v25 = vsel %vm8571_vm3, %v2598_v37, %v2599_v10  ;;  %v7195_v29 = vsel %vm8572_vm4, %v2744_v59, %v2745_v32  ;;  %vm8573_vm5 = vmmov %vm8566_vm0  ;;  %v2685_v19 = vsel %vm8484_vm2, %v2656_v49, 0.0  ;;  %v2702_v17 = vrot.slane %v6797_v18, 1 }
 0x56f   : > { %v7199_v40 = vsel %vm8573_vm5, %v2599_v10, %v2600_v46  ;;  %vm8574_vm0 = vmmov %vm8572_vm4  ;;  %v2606_v20 = vrot.slane %v6797_v18, 6  ;;  %v2602_v12 = vrot.slane %v7031_v33, 6  ;;  %v2748_v26 = vrot.slane %v7097_v1, 2 }
 0x570   : > { %v7203_v6 = vsel %vm8574_vm0, %v2745_v32, %v2746_v30  ;;  %vm8575_vm9 = vmmov %vm8571_vm3  ;;  %2827 = vrot.lane.b32.xlu1 %v2685_v19, %s8409_s2  ;;  %v2604_v49 = vrot.slane %v7097_v1, 6  ;;  %v2605_v37 = vrot.slane %v7123_v62, 6  ;;  %v2603_v59 = vrot.slane %v7068_v24, 6 }
 0x571   : > { %v7209_v21 = vsel %vm8575_vm9, %v2600_v46, %v2601_v48  ;;  %vm8576_vm3 = vmmov %vm8574_vm0  ;;  %2891 = vrot.lane.b32.xlu0 %v7123_v62, %s8413_s0  ;;  %v8174_v10 = vrot.slane %v7123_v62, 2  ;;  %vm8577_vm4 = vcmp.lt.s32.totalorder %v5358_v60, 7  ;;  %v7230_v46 = vsel %vm8573_vm5, %v2601_v48, %v2602_v12 }
 0x572   : > { %v7213_v15 = vsel %vm8576_vm3, %v2746_v30, %v2747_v51  ;;  %v2703_v32 = vsel %vm8577_vm4, %v2701_v4, %v2702_v17  ;;  %v7234_v33 = vsel %vm8574_vm0, %v2747_v51, %v2748_v26  ;;  %vm8578_vm9 = vmmov %vm8573_vm5  ;;  %v8582_v48 = vrot.slane %v6797_v18, 7 }
 0x573   : > { %v7238_v1 = vsel %vm8578_vm9, %v2604_v49, %v2605_v37  ;;  %vm8579_vm3 = vmmov %vm8573_vm5  ;;  %vm8591_vm2 = vcmask 785408  }
 0x574   : > { %v7242_v24 = vsel %vm8579_vm3, %v2602_v12, %v2603_v59  ;;  %vm8580_vm4 = vmmov %vm8574_vm0  ;;  %2955 = vrot.lane.b32.xlu1 %v2703_v32, %s8527_s22  ;;  %vm8583_vm0 = vcmp.lt.s32.totalorder %v5358_v60, 1  ;;  %v8585_v12 = vrot.slane %v6791_v36, 1 }
 0x575   : > { %v7248_v4 = vsel %vm8580_vm4, %v2748_v26, %v8174_v10  ;;  %vm8581_vm5 = vmmov %vm8579_vm3  ;;  %v2655_v51 = vsel %vm8583_vm0, %v2653_v2, %v8582_v48  ;;  %vm8587_vm4 = vnez %v8306_v58  ;;  %vm8588_vm0 = vnez %v8309_v41 }
 0x576   : > { %v7252_v30 = vsel %vm8581_vm5, %v2605_v37, %v2606_v20  ;;  %vm8584_vm9 = vmmov %vm8579_vm3  ;;  %2829 = vrot.lane.b32.xlu0 %v2655_v51, %s8409_s2  ;;  %vm8586_vm3 = vcmp.lt.s32.totalorder %v5358_v60, 7  ;;  %v2622_v2 = vsel %vm8581_vm5, %v2606_v20, %v2591_v8 }
 0x577   : > { %v7261_v19 = vsel %vm8584_vm9, %v2603_v59, %v2604_v49  ;;  %v2718_v26 = vsel %vm8586_vm3, %v2702_v17, %v8585_v12  ;;  %v2623_v48 = vsel %vm8588_vm0, %v2622_v2, 0.0  ;;  %vm8589_vm9 = vcmask 261120  }
 0x578   : > { %2893 = vrot.lane.b32.xlu1 %v6797_v18, %s8413_s0  ;;  %v2734_v37 = vsel %vm8587_vm4, %v2718_v26, 0.0  ;;  %vm8590_vm3 = vcmask 523264   ;;  %vm8592_vm5 = vmmov %vm8589_vm9  ;;  %vm8593_vm0 = vnez %v8313_v53 }
 0x579   : > { %v2768_v41 = vsel %vm8593_vm0, %v7049_v61, 0.0  ;;  %vm8595_vm8 = vmmov %vm8590_vm3 }
 0x57a   : > { %2957 = vrot.lane.b32.xlu0 %v2734_v37, %s8527_s22  ;;  %vm8597_vm12 = vmmov %vm8592_vm5  ;;  %s518_s22 = scalar_lea.vmem [#allocation3], %s517_s21 }
 0x57b   : > { %vm8598_vm0 = vmmov %vm8595_vm8  ;;  %s4159_s29 = sshll.u32 %s518_s22, 4  ;;  %s7993_s29 = int_to_ptr.vmem [resolvable:$true] %s4159_s29 }
 0x57c   : > { %s5061_s3 = scalar_lea.vmem %s7993_s29, 16  ;;  %p5068_p0 = scmp.lt.s32.totalorder %s7993_s29, %s5066_s30 }
 0x57d   : > { %p5062_p11 = scmp.ne.s32.totalorder %s7993_s29, %s5061_s3  ;;  %p5069_p1 = scmp.lt.s32.totalorder %s5067_s1, %s5061_s3 }
 0x57f   : > { %p5063_p12 = pnand %p5062_p11, %p5260_p5  ;;  %p5070_p2 = por %p5069_p1, %p5068_p0 }
 0x581   : > { %p5064_p13 = pneg %p5063_p12 }
 0x583   : > { %p5071_p3 = pnand %p5070_p2, %p5064_p13 }
 0x5a5   : > { %v4904_v59 = vpop.permute.xlu1 %4903 }
 0x5a6   : > { %v4905_v12 = vunpack.i.l.bf16 %v4904_v59  ;;  %v4906_v20 = vunpack.i.h.bf16 %v4904_v59 }
 0x5a9   : > { %v4899_v49 = vpop.permute.xlu0 %4898 }
 0x5aa   : > { %v4900_v32 = vunpack.i.l.bf16 %v4899_v49  ;;  %v4901_v17 = vunpack.i.h.bf16 %v4899_v49 }
 0x5ac   : > { %v2975_v51 = vsel %vm8589_vm9, %v2623_v48, %v4900_v32  ;;  %v2976_v8 = vsel %vm8592_vm5, %v7064_v42, %v4901_v17  ;;  %vm8594_vm9 = vmmov %vm8592_vm5 }
 0x5ad   : > { %v2991_v26 = vsel %vm8590_vm3, %v2975_v51, %v4905_v12  ;;  %v2992_v49 = vsel %vm8595_vm8, %v2976_v8, %v4906_v20  ;;  %vm8596_vm3 = vnez %v8316_v38  ;;  %vm8599_vm8 = vmmov %vm8591_vm2 }
 0x5ae   : > { %v4909_v10 = vpop.permute.xlu1 %4908 }
 0x5af   : > { %v4910_v13 = vunpack.i.l.bf16 %v4909_v10  ;;  %v4911_v37 = vunpack.i.h.bf16 %v4909_v10 }
 0x5b0   : > { %v4914_v54 = vpop.permute.xlu0 %4913 }
 0x5b1   : > { %v3007_v44 = vsel %vm8591_vm2, %v2991_v26, %v4910_v13  ;;  %v4915_v28 = vunpack.i.l.bf16 %v4914_v54  ;;  %v2625_v13 = vsel %vm8596_vm3, %v7085_v0, 0.0  ;;  %v4916_v10 = vunpack.i.h.bf16 %v4914_v54  ;;  %v8601_v0 = vld [vmem:[#allocation28_spill] sm:$0xff] }
 0x5b2   : > { %v4919_v16 = vpop.permute.xlu1 %4918  ;;  %3163 = vmatmul.mubr.f32.vlgmr.msra.gmra.mrb[16].mxu0 %v3007_v44  ;;  %v3008_v42 = vsel %vm8591_vm2, %v2992_v49, %v4911_v37  ;;  %vm8602_vm3 = vnez %v8601_v0  ;;  %vm8603_vm2 = vmmov %vm8592_vm5 }
 0x5b3   : > { %4292 = vmatprep.mubr.msk.f32.mxu0 %vm8594_vm9, %v2768_v41  ;;  %v4920_v2 = vunpack.i.l.bf16 %v4919_v16  ;;  %v2977_v59 = vsel %vm8592_vm5, %v2625_v13, %v4915_v28  ;;  %v4921_v53 = vunpack.i.h.bf16 %v4919_v16  ;;  %vm8600_vm9 = vmmov %vm8592_vm5  ;;  %v2770_v28 = vsel %vm8602_vm3, %v7092_v9, 0.0 }
 0x5b4   : > { %v2978_v38 = vsel %vm8600_vm9, %v7111_v50, %v4916_v10  ;;  %vm8605_vm5 = vmmov %vm8599_vm8  ;;  %v8607_v50 = vld [vmem:[#allocation29_spill] sm:$0xff] }
 0x5b5   : > { %v4924_v32 = vpop.permute.xlu0 %4923  ;;  %v2993_v61 = vsel %vm8598_vm0, %v2977_v59, %v4920_v2 }
 0x5b6   : > { %3168 = vmatmul.mubr.f32.gmra.mrb[18].mxu0 %v3008_v42  ;;  %v4925_v44 = vunpack.i.l.bf16 %v4924_v32  ;;  %v4926_v48 = vunpack.i.h.bf16 %v4924_v32  ;;  %v8613_v32 = vld [vmem:[#allocation30_spill] sm:$0xff] }
 0x5b7   : > { %4293 = vmatprep.mubr.msk.f32.mxu0 %vm8597_vm12, %v7078_v56  ;;  %vm8604_vm12 = vmmov %vm8598_vm0 }
 0x5b8   : > { %v3009_v17 = vsel %vm8599_vm8, %v2993_v61, %v4925_v44  ;;  %v2994_v16 = vsel %vm8604_vm12, %v2978_v38, %v4921_v53  ;;  %vm8606_vm0 = vmmov %vm8603_vm2  ;;  %vm8608_vm8 = vnez %v8607_v50 }
 0x5b9   : > { %v4929_v54 = vpop.permute.xlu1 %4928  ;;  %v4934_v12 = vpop.permute.xlu0 %4933  ;;  %v3010_v56 = vsel %vm8605_vm5, %v2994_v16, %v4926_v48  ;;  %v2627_v37 = vsel %vm8608_vm8, %v7133_v43, 0.0  ;;  %vm8609_vm9 = vmmov %vm8606_vm0  ;;  %v8616_v48 = vld [vmem:[#allocation31_spill] sm:$0xff] }
 0x5ba   : > { %3173 = vmatmul.mubr.f32.gmra.mrb[20].mxu0 %v3009_v17  ;;  %v4930_v51 = vunpack.i.l.bf16 %v4929_v54  ;;  %v4935_v26 = vunpack.i.l.bf16 %v4934_v12  ;;  %v4931_v8 = vunpack.i.h.bf16 %v4929_v54  ;;  %v4936_v2 = vunpack.i.h.bf16 %v4934_v12  ;;  %vm8610_vm3 = vmmov %vm8604_vm12 }
 0x5bb   : > { %4294 = vmatprep.mubr.msk.f32.mxu0 %vm8603_vm2, %v2770_v28  ;;  %vm8611_vm2 = vmmov %vm8605_vm5  ;;  %vm8614_vm5 = vnez %v8613_v32 }
 0x5bc   : > { %v2979_v9 = vsel %vm8609_vm9, %v2627_v37, %v4930_v51  ;;  %vm8612_vm12 = vmmov %vm8606_vm0  ;;  %v2772_v43 = vsel %vm8614_vm5, %v7137_v52, 0.0  ;;  %vm8617_vm9 = vnez %v8616_v48  ;;  %v8624_v37 = vld [vmem:[#allocation32_spill] sm:$0xff] }
 0x5bd   : > { %v2995_v49 = vsel %vm8610_vm3, %v2979_v9, %v4935_v26  ;;  %v2980_v42 = vsel %vm8612_vm12, %v7146_v45, %v4931_v8  ;;  %vm8615_vm8 = vmmov %vm8610_vm3  ;;  %v2629_v17 = vsel %vm8617_vm9, %v7161_v27, 0.0  ;;  %vm8625_vm9 = vnez %v8624_v37  ;;  %v8626_v9 = vld [vmem:[#allocation33_spill] sm:$0xff] }
 0x5be   : > { %3178 = vmatmul.mubr.f32.gmra.mrb[22].mxu0 %v3010_v56  ;;  %v2996_v61 = vsel %vm8615_vm8, %v2980_v42, %v4936_v2  ;;  %vm8618_vm3 = vmmov %vm8611_vm2  ;;  %v2774_v8 = vsel %vm8625_vm9, %v7165_v47, 0.0 }
 0x5bf   : > { %4295 = vmatprep.mubr.msk.f32.mxu0 %vm8606_vm0, %v7118_v31  ;;  %vm8620_vm12 = vmmov %vm8606_vm0 }
 0x5c0   : > { %v4939_v20 = vpop.permute.xlu1 %4938  ;;  %vm8621_vm5 = vmmov %vm8615_vm8 }
 0x5c1   : > { %v4940_v41 = vunpack.i.l.bf16 %v4939_v20  ;;  %v4941_v13 = vunpack.i.h.bf16 %v4939_v20 }
 0x5c3   : > { %v3011_v10 = vsel %vm8611_vm2, %v2995_v49, %v4940_v41  ;;  %v3012_v45 = vsel %vm8618_vm3, %v2996_v61, %v4941_v13  ;;  %vm8619_vm2 = vmmov %vm8606_vm0  ;;  %v8632_v61 = vld [vmem:[#allocation12_spill] sm:$0xff] }
 0x5c4   : > { %v4944_v59 = vpop.permute.xlu0 %4943  ;;  %v4949_v31 = vpop.permute.xlu1 %4948  ;;  %3183 = vmatmul.mubr.f32.gmra.mrb[24].mxu0 %v3011_v10  ;;  %vm8623_vm8 = vmmov %vm8619_vm2 }
 0x5c5   : > { %v4945_v44 = vunpack.i.l.bf16 %v4944_v59  ;;  %4296 = vmatprep.mubr.msk.f32.mxu0 %vm8606_vm0, %v2772_v43  ;;  %v4950_v53 = vunpack.i.l.bf16 %v4949_v31  ;;  %v4946_v38 = vunpack.i.h.bf16 %v4944_v59  ;;  %v4951_v51 = vunpack.i.h.bf16 %v4949_v31  ;;  %vm8622_vm0 = vmmov %vm8618_vm3 }
 0x5c6   : > { %vm8627_vm3 = vnez %v8626_v9  ;;  %vm8630_vm9 = vmmov %vm8619_vm2  ;;  %v8644_v9 = vld [vmem:[#allocation17_spill] sm:$0xff] }
 0x5c7   : > { %v2981_v54 = vsel %vm8619_vm2, %v2629_v17, %v4945_v44  ;;  %v2982_v27 = vsel %vm8623_vm8, %v7181_v35, %v4946_v38  ;;  %vm8629_vm8 = vmmov %vm8621_vm5  ;;  %v8634_v17 = vld [vmem:[#allocation10_spill] sm:$0xff] }
 0x5c8   : > { %v4954_v0 = vpop.permute.xlu0 %4953  ;;  %3188 = vmatmul.mubr.f32.gmra.mrb[26].mxu0 %v3012_v45  ;;  %v2997_v16 = vsel %vm8621_vm5, %v2981_v54, %v4950_v53  ;;  %v2998_v13 = vsel %vm8621_vm5, %v2982_v27, %v4951_v51  ;;  %vm8635_vm5 = vnez %v8634_v17 }
 0x5c9   : > { %v4955_v28 = vunpack.i.l.bf16 %v4954_v0  ;;  %4297 = vmatprep.mubr.msk.f32.mxu0 %vm8620_vm12, %v7150_v5  ;;  %v4959_v52 = vpop.permute.xlu1 %4958  ;;  %v4956_v56 = vunpack.i.h.bf16 %v4954_v0  ;;  %v2631_v5 = vsel %vm8627_vm3, %v7191_v25, 0.0  ;;  %vm8628_vm12 = vmmov %vm8619_vm2  ;;  %v2633_v38 = vsel %vm8635_vm5, %v7209_v21, 0.0 }
 0x5ca   : > { %v4960_v12 = vunpack.i.l.bf16 %v4959_v52  ;;  %v4961_v35 = vunpack.i.h.bf16 %v4959_v52  ;;  %vm8631_vm3 = vmmov %vm8622_vm0 }
 0x5cb   : > { %v3013_v26 = vsel %vm8622_vm0, %v2997_v16, %v4955_v28  ;;  %v3014_v10 = vsel %vm8622_vm0, %v2998_v13, %v4956_v56  ;;  %vm8636_vm0 = vmmov %vm8619_vm2 }
 0x5cc   : > { %v4964_v50 = vpop.permute.xlu0 %4963  ;;  %3193 = vmatmul.mubr.f32.gmra.mrb[28].mxu0 %v3013_v26  ;;  %v2983_v2 = vsel %vm8628_vm12, %v2631_v5, %v4960_v12  ;;  %v2984_v44 = vsel %vm8619_vm2, %v7199_v40, %v4961_v35  ;;  %vm8633_vm12 = vnez %v8632_v61  ;;  %vm8641_vm5 = vmmov %vm8631_vm3 }
 0x5cd   : > { %v4965_v20 = vunpack.i.l.bf16 %v4964_v50  ;;  %4298 = vmatprep.mubr.msk.f32.mxu0 %vm8619_vm2, %v2774_v8  ;;  %v4966_v32 = vunpack.i.h.bf16 %v4964_v50  ;;  %v2776_v48 = vsel %vm8633_vm12, %v7195_v29, 0.0  ;;  %vm8640_vm12 = vmmov %vm8636_vm0  ;;  %v8642_v50 = vld [vmem:[#allocation13_spill] sm:$0xff] }
 0x5ce   : > { %v4969_v41 = vpop.permute.xlu1 %4968 }
 0x5cf   : > { %v4970_v49 = vunpack.i.l.bf16 %v4969_v41  ;;  %v2999_v47 = vsel %vm8629_vm8, %v2983_v2, %v4965_v20  ;;  %v4971_v43 = vunpack.i.h.bf16 %v4969_v41  ;;  %vm8637_vm8 = vmmov %vm8636_vm0 }
 0x5d0   : > { %3198 = vmatmul.mubr.f32.gmra.mrb[30].mxu0 %v3014_v10 }
 0x5d1   : > { %v4974_v42 = vpop.permute.xlu0 %4973  ;;  %4299 = vmatprep.mubr.msk.f32.mxu0 %vm8630_vm9, %v7185_v14  ;;  %v3015_v31 = vsel %vm8631_vm3, %v2999_v47, %v4970_v49  ;;  %vm8638_vm9 = vcmask 523264  }
 0x5d2   : > { %v4975_v25 = vunpack.i.l.bf16 %v4974_v42  ;;  %v4979_v59 = vpop.permute.xlu1 %4978  ;;  %v3000_v0 = vsel %vm8638_vm9, %v2984_v44, %v4966_v32  ;;  %v4976_v28 = vunpack.i.h.bf16 %v4974_v42  ;;  %vm8639_vm2 = vmmov %vm8638_vm9  ;;  %vm8645_vm9 = vnez %v8644_v9  ;;  %v8653_v42 = vld [vmem:[#allocation20_spill] sm:$0xff]  ;;  %v3510_v9 = vld [vmem:[%s8043_s10 + $0x58] sm:$0xff] }
 0x5d3   : > { %v4980_v53 = vunpack.i.l.bf16 %v4979_v59  ;;  %v3016_v40 = vsel %vm8631_vm3, %v3000_v0, %v4971_v43  ;;  %v4981_v16 = vunpack.i.h.bf16 %v4979_v59  ;;  %vm8646_vm3 = vmmov %vm8636_vm0  ;;  %v3499_v0 = vld [vmem:[%s8043_s10] sm:$0xff] }
 0x5d4   : > { %3203 = vmatmul.mubr.f32.gmra.mrb[32].mxu0 %v3015_v31  ;;  %v2985_v45 = vsel %vm8637_vm8, %v2633_v38, %v4975_v25  ;;  %v2986_v26 = vsel %vm8636_vm0, %v7230_v46, %v4976_v28  ;;  %vm8643_vm8 = vnez %v8642_v50  ;;  %v2750_v31 = vrot.slane %v6797_v18, 2  ;;  %v3508_v50 = vld [vmem:[%s8043_s10 + $0x48] sm:$0xff] }
 0x5d5   : > { %4300 = vmatprep.mubr.msk.f32.mxu0 %vm8636_vm0, %v2776_v48  ;;  %v3001_v51 = vsel %vm8639_vm2, %v2985_v45, %v4980_v53  ;;  %v2778_v37 = vsel %vm8643_vm8, %v7213_v15, 0.0  ;;  %vm8647_vm2 = vmmov %vm8636_vm0  ;;  %v8661_v53 = vrot.slane %v7123_v62, 2  ;;  %v8664_v18 = vrot.slane %v6791_v36, 2  ;;  %v8670_v45 = vld [vmem:[#allocation26_spill] sm:$0xff] }
 0x5d6   : > { %vm8650_vm8 = vmmov %vm8647_vm2 }
 0x5d7   : > { %v4984_v14 = vpop.permute.xlu0 %4983 }
 0x5d8   : > { %v4985_v54 = vunpack.i.l.bf16 %v4984_v14  ;;  %3208 = vmatmul.mubr.f32.gmra.mrb[34].mxu0 %v3016_v40  ;;  %v4986_v56 = vunpack.i.h.bf16 %v4984_v14  ;;  %v3501_v40 = vld [vmem:[%s8043_s10 + $0x10] sm:$0xff] }
 0x5d9   : > { %4301 = vmatprep.mubr.msk.f32.mxu0 %vm8640_vm12, %v7203_v6  ;;  %v2635_v6 = vsel %vm8645_vm9, %v7242_v24, 0.0  ;;  %vm8648_vm12 = vcmask 523264   ;;  %vm8651_vm9 = vmmov %vm8647_vm2 }
 0x5da   : > { %v4989_v52 = vpop.permute.xlu1 %4988  ;;  %v3017_v12 = vsel %vm8641_vm5, %v3001_v51, %v4985_v54  ;;  %v3002_v2 = vsel %vm8648_vm12, %v2986_v26, %v4981_v16  ;;  %vm8649_vm0 = vmmov %vm8648_vm12  ;;  %v3503_v51 = vld [vmem:[%s8043_s10 + $0x20] sm:$0xff]  ;;  %v3505_v16 = vld [vmem:[%s8043_s10 + $0x30] sm:$0xff] }
 0x5db   : > { %v4990_v29 = vunpack.i.l.bf16 %v4989_v52  ;;  %v4994_v21 = vpop.permute.xlu0 %4993  ;;  %v4991_v5 = vunpack.i.h.bf16 %v4989_v52  ;;  %v3018_v46 = vsel %vm8641_vm5, %v3002_v2, %v4986_v56  ;;  %vm8655_vm12 = vmmov %vm8649_vm0  ;;  %v3502_v52 = vld [vmem:[%s8043_s10 + $0x18] sm:$0xff] }
 0x5dc   : > { %v4995_v27 = vunpack.i.l.bf16 %v4994_v21  ;;  %3213 = vmatmul.mubr.f32.gmra.mrb[36].mxu0 %v3017_v12  ;;  %v4996_v49 = vunpack.i.h.bf16 %v4994_v21  ;;  %v3504_v21 = vld [vmem:[%s8043_s10 + $0x28] sm:$0xff]  ;;  %v3506_v56 = vld [vmem:[%s8043_s10 + $0x38] sm:$0xff] }
 0x5dd   : > { %4302 = vmatprep.mubr.msk.f32.mxu0 %vm8646_vm3, %v2778_v37  ;;  %v2987_v41 = vsel %vm8647_vm2, %v2635_v6, %v4990_v29  ;;  %v2988_v24 = vsel %vm8651_vm9, %v7261_v19, %v4991_v5  ;;  %vm8652_vm3 = vmmov %vm8641_vm5  ;;  %vm8654_vm2 = vnez %v8653_v42  ;;  %v4691_v29 = vpack.c.bf16 %v3502_v52, %v3501_v40  ;;  %v7448_v5 = vld [vmem:[%s8042_s9] ss:$0 sm:$0xff] }
 0x5de   : > { %v2952_v8 = vpop.permute.xlu1 %2951  ;;  %v3003_v15 = vsel %vm8649_vm0, %v2987_v41, %v4995_v27  ;;  %v2780_v47 = vsel %vm8654_vm2, %v7248_v4, 0.0  ;;  %v3004_v59 = vsel %vm8655_vm12, %v2988_v24, %v4996_v49  ;;  %vm8656_vm5 = vmmov %vm8650_vm8  ;;  %v4695_v12 = vpack.c.bf16 %v3504_v21, %v3503_v51  ;;  %v3507_v27 = vld [vmem:[%s8043_s10 + $0x40] sm:$0xff] }
 0x5df   : > { %v2954_v20 = vpop.permute.xlu0 %2953  ;;  %v3019_v10 = vsel %vm8652_vm3, %v3003_v15, %v2952_v8  ;;  %vm8660_vm9 = vmmov %vm8652_vm3  ;;  %vm8662_vm3 = vcmp.lt.s32.totalorder %v5358_v60, 6  ;;  %v4699_v26 = vpack.c.bf16 %v3506_v56, %v3505_v16  ;;  %v4703_v37 = vpack.c.bf16 %v3508_v50, %v3507_v27  ;;  %v3509_v8 = vld [vmem:[%s8043_s10 + $0x50] sm:$0xff] }
 0x5e0   : > { %3218 = vmatmul.mubr.f32.gmra.mrb[38].mxu0 %v3018_v46  ;;  %v3020_v44 = vsel %vm8660_vm9, %v3004_v59, %v2954_v20  ;;  %v2751_v4 = vsel %vm8662_vm3, %v8661_v53, %v2750_v31  ;;  %vm8663_vm2 = vmmov %vm8656_vm5  ;;  %v4707_v6 = vpack.c.bf16 %v3510_v9, %v3509_v8 }
 0x5e1   : > { %4303 = vmatprep.mubr.msk.f32.mxu0 %vm8650_vm8, %v7234_v33  ;;  %v8657_v33 = vld [vmem:[#allocation34_spill] sm:$0xff]  ;;  %vm8659_vm8 = vmmov %vm8656_vm5 }
 0x5e2   : > { %v2828_v13 = vpop.permute.xlu1 %2827  ;;  %vm8658_vm0 = vnez %v8657_v33  ;;  %vm8665_vm12 = vmmov %vm8662_vm3  ;;  %vm8671_vm3 = vnez %v8670_v45 }
 0x5e3   : > { %v2892_v35 = vpop.permute.xlu0 %2891  ;;  %v2637_v32 = vsel %vm8658_vm0, %v7238_v1, 0.0  ;;  %v2766_v48 = vsel %vm8665_vm12, %v2750_v31, %v8664_v18  ;;  %vm8667_vm0 = vmmov %vm8663_vm2  ;;  %vm8675_vm12 = vcmp.lt.s32.totalorder %v5358_v60, 1 }
 0x5e4   : > { %3223 = vmatmul.mubr.f32.gmra.mrb[40].mxu0 %v3019_v10  ;;  %v2989_v19 = vsel %vm8659_vm8, %v2637_v32, %v2828_v13  ;;  %vm8668_vm8 = vmmov %vm8660_vm9  ;;  %v2782_v54 = vsel %vm8671_vm3, %v2766_v48, 0.0 }
 0x5e5   : > { %4304 = vmatprep.mubr.msk.f32.mxu0 %vm8656_vm5, %v2780_v47  ;;  %vm8666_vm5 = vcmask 523264   ;;  %vm8673_vm7 = vmmov %vm8668_vm8 }
 0x5e6   : > { %v2956_v25 = vpop.permute.xlu1 %2955  ;;  %v3005_v1 = vsel %vm8666_vm5, %v2989_v19, %v2892_v35  ;;  %vm8669_vm9 = vmmov %vm8666_vm5 }
 0x5e7   : > { %v3021_v38 = vsel %vm8668_vm8, %v3005_v1, %v2956_v25 }
 0x5e8   : > { %v2830_v43 = vpop.permute.xlu0 %2829  ;;  %3228 = vmatmul.mubr.f32.gmra.mrb[42].mxu0 %v3020_v44 }
 0x5e9   : > { %4305 = vmatprep.mubr.msk.f32.mxu0 %vm8663_vm2, %v2751_v4  ;;  %v2990_v17 = vsel %vm8667_vm0, %v7252_v30, %v2830_v43  ;;  %vm8672_vm2 = vmmov %vm8667_vm0  ;;  %v3500_v30 = vld [vmem:[%s8043_s10 + $0x8] sm:$0xff] }
 0x5ea   : > { %v2894_v61 = vpop.permute.xlu1 %2893  ;;  %v4687_v28 = vpack.c.bf16 %v3500_v30, %v3499_v0  ;;  %vm8677_vm0 = vmmov %vm8675_vm12 }
 0x5eb   : > { %v3006_v62 = vsel %vm8669_vm9, %v2990_v17, %v2894_v61  ;;  %vm8679_vm9 = vmmov %vm8677_vm0 }
 0x5ec   : > { %v2958_v14 = vpop.permute.xlu0 %2957  ;;  %3233 = vmatmul.mubr.f32.gmra.mrb[44].mxu0 %v3021_v38  ;;  %4688 = vmatprep.subr.bf16.mxu1 %v4687_v28  ;;  %vm8681_vm3 = vmmov %vm8677_vm0 }
 0x5ed   : > { %4306 = vmatprep.mubr.msk.f32.mxu0 %vm8672_vm2, %v2782_v54  ;;  %v3022_v36 = vsel %vm8673_vm7, %v3006_v62, %v2958_v14  ;;  %4690 = vmatpush3.bf16.msra.mxu1 %v4687_v28  ;;  %vm8674_vm7 = vcmp.lt.s32.totalorder %v5358_v60, 7 }
 0x5ee   : > { %4692 = vmatprep.subr.bf16.mxu1 %v4691_v29  ;;  %vm8676_vm5 = vmmov %vm8674_vm7 }
 0x5ef   : > { %vm8678_vm8 = vmmov %vm8676_vm5 }
 0x5f0   : > { %3238 = vmatmul.mubr.f32.gmra.mrb[46].mxu0 %v3022_v36  ;;  %vm8682_vm2 = vmmov %vm8676_vm5 }
 0x5f1   : > { %4694 = vmatpush3.bf16.msra.mxu1 %v4691_v29 }
 0x5f2   : > { %4696 = vmatprep.subr.bf16.mxu1 %v4695_v12 }
 0x5f5   : > { %4698 = vmatpush3.bf16.msra.mxu1 %v4695_v12 }
 0x5f6   : > { %4700 = vmatprep.subr.bf16.mxu1 %v4699_v26 }
 0x5f9   : > { %4702 = vmatpush3.bf16.msra.mxu1 %v4699_v26 }
 0x5fa   : > { %4704 = vmatprep.subr.bf16.mxu1 %v4703_v37 }
 0x5fd   : > { %4706 = vmatpush3.bf16.msra.mxu1 %v4703_v37 }
 0x5fe   : > { %4708 = vmatprep.subr.bf16.mxu1 %v4707_v6 }
 0x601   : > { %4710 = vmatpush3.bf16.msra.mxu1 %v4707_v6 }
 0x685   : > { %v3164_v20 = vpop.f32.mrb[16].mxu0 }
 0x686   : > { %v7451_v41 = vadd.f32 %v7448_v5, %v3164_v20  ;;  %v3166_v2 = vpop.f32.mrb[17].mxu0 }
 0x688   : > { %3355 = vrot.lane.b32.xlu1 %v7451_v41, %s8409_s2  ;;  %v3243_v15 = vrot.slane %v7451_v41, 7  ;;  %v3291_v35 = vrot.slane %v7451_v41, 1 }
 0x689   : > { %v3169_v46 = vpop.f32.mrb[18].mxu0 }
 0x68a   : > { %v3170_v49 = vadd.f32 %v7448_v5, %v3169_v46  ;;  %v3171_v13 = vpop.f32.mrb[19].mxu0 }
 0x68c   : > { %v3244_v24 = vrot.slane %v3170_v49, 7  ;;  %v3292_v10 = vrot.slane %v3170_v49, 1  ;;  %3357 = vrot.lane.b32.xlu0 %v3170_v49, %s8409_s2 }
 0x68d   : > { %v3174_v42 = vpop.f32.mrb[20].mxu0 }
 0x68e   : > { %v3175_v47 = vadd.f32 %v7448_v5, %v3174_v42  ;;  %v3176_v25 = vpop.f32.mrb[21].mxu0  ;;  %v3321_v59 = vsel %vm8674_vm7, %v3291_v35, %v3292_v10  ;;  %v7468_v31 = vsel %vm8675_vm12, %v3243_v15, %v3244_v24  ;;  %vm8683_vm7 = vmmov %vm8677_vm0 }
 0x68f   : > { %3419 = vrot.lane.b32.xlu1 %v3321_v59, %s8413_s0  ;;  %vm8685_vm12 = vmmov %vm8677_vm0 }
 0x690   : > { %v3245_v33 = vrot.slane %v3175_v47, 7  ;;  %v3293_v32 = vrot.slane %v3175_v47, 1 }
 0x691   : > { %v3179_v43 = vpop.f32.mrb[22].mxu0 }
 0x692   : > { %v3180_v19 = vadd.f32 %v7448_v5, %v3179_v43  ;;  %v3181_v44 = vpop.f32.mrb[23].mxu0  ;;  %v3320_v53 = vsel %vm8676_vm5, %v3292_v10, %v3293_v32  ;;  %v7476_v4 = vsel %vm8677_vm0, %v3244_v24, %v3245_v33 }
 0x693   : > { %3359 = vrot.lane.b32.xlu1 %v3175_v47, %s8409_s2  ;;  %v3324_v61 = vsel %vm5414_vm10, %v3320_v53, 0.0  ;;  %vm8680_vm10 = vmmov %vm8676_vm5 }
 0x694   : > { %v3246_v18 = vrot.slane %v3180_v19, 7  ;;  %v3294_v48 = vrot.slane %v3180_v19, 1  ;;  %3421 = vrot.lane.b32.xlu0 %v3324_v61, %s8413_s0  ;;  %vm8686_vm5 = vmmov %vm8682_vm2 }
 0x696   : > { %v3319_v1 = vsel %vm8678_vm8, %v3293_v32, %v3294_v48  ;;  %v7486_v17 = vsel %vm8679_vm9, %v3245_v33, %v3246_v18  ;;  %vm8688_vm8 = vmmov %vm8677_vm0 }
 0x697   : > { %3423 = vrot.lane.b32.xlu1 %v3319_v1, %s8413_s0  ;;  %v3184_v38 = vpop.f32.mrb[24].mxu0  ;;  %vm8689_vm9 = vmmov %vm8682_vm2 }
 0x698   : > { %3361 = vrot.lane.b32.xlu0 %v3180_v19, %s8409_s2  ;;  %v3185_v62 = vadd.f32 %v7448_v5, %v3184_v38  ;;  %v3186_v63 = vpop.f32.mrb[25].mxu0 }
 0x69a   : > { %v3247_v14 = vrot.slane %v3185_v62, 7  ;;  %v3295_v45 = vrot.slane %v3185_v62, 1 }
 0x69b   : > { %3363 = vrot.lane.b32.xlu1 %v3185_v62, %s8409_s2  ;;  %v3189_v54 = vpop.f32.mrb[26].mxu0 }
 0x69c   : > { %v3190_v36 = vadd.f32 %v7448_v5, %v3189_v54  ;;  %v3191_v0 = vpop.f32.mrb[27].mxu0  ;;  %v3318_v30 = vsel %vm8680_vm10, %v3294_v48, %v3295_v45  ;;  %v7497_v28 = vsel %vm8681_vm3, %v3246_v18, %v3247_v14  ;;  %vm8690_vm10 = vmmov %vm8677_vm0 }
 0x69d   : > { %v3326_v40 = vsel %vm5438_vm11, %v3318_v30, 0.0  ;;  %vm8684_vm11 = vmmov %vm8682_vm2 }
 0x69e   : > { %v3248_v52 = vrot.slane %v3190_v36, 7  ;;  %v3296_v51 = vrot.slane %v3190_v36, 1  ;;  %3425 = vrot.lane.b32.xlu0 %v3326_v40, %s8413_s0  ;;  %vm8692_vm3 = vmmov %vm8677_vm0 }
 0x69f   : > { %v3194_v29 = vpop.f32.mrb[28].mxu0 }
 0x6a0   : > { %v3195_v21 = vadd.f32 %v7448_v5, %v3194_v29  ;;  %v3196_v12 = vpop.f32.mrb[29].mxu0  ;;  %v3317_v16 = vsel %vm8682_vm2, %v3295_v45, %v3296_v51  ;;  %v7507_v56 = vsel %vm8683_vm7, %v3247_v14, %v3248_v52  ;;  %vm8693_vm7 = vmmov %vm8677_vm0 }
 0x6a1   : > { %3427 = vrot.lane.b32.xlu1 %v3317_v16, %s8413_s0 }
 0x6a2   : > { %v3249_v26 = vrot.slane %v3195_v21, 7  ;;  %v3297_v22 = vrot.slane %v3195_v21, 1  ;;  %3365 = vrot.lane.b32.xlu0 %v3190_v36, %s8409_s2 }
 0x6a3   : > { %v3199_v27 = vpop.f32.mrb[30].mxu0 }
 0x6a4   : > { %v3200_v50 = vadd.f32 %v7448_v5, %v3199_v27  ;;  %v3201_v37 = vpop.f32.mrb[31].mxu0  ;;  %v3316_v8 = vsel %vm8684_vm11, %v3296_v51, %v3297_v22  ;;  %v7516_v9 = vsel %vm8685_vm12, %v3248_v52, %v3249_v26  ;;  %vm8695_vm11 = vmmov %vm8677_vm0 }
 0x6a5   : > { %3367 = vrot.lane.b32.xlu1 %v3195_v21, %s8409_s2  ;;  %v3328_v6 = vsel %vm5537_vm14, %v3316_v8, 0.0  ;;  %vm8687_vm14 = vmmov %vm8682_vm2 }
 0x6a6   : > { %v3250_v20 = vrot.slane %v3200_v50, 7  ;;  %v3298_v2 = vrot.slane %v3200_v50, 1  ;;  %3429 = vrot.lane.b32.xlu0 %v3328_v6, %s8413_s0 }
 0x6a7   : > { %v3204_v46 = vpop.f32.mrb[32].mxu0 }
 0x6a8   : > { %v3205_v49 = vadd.f32 %v7448_v5, %v3204_v46  ;;  %v3206_v13 = vpop.f32.mrb[33].mxu0  ;;  %v3315_v24 = vsel %vm8686_vm5, %v3297_v22, %v3298_v2  ;;  %v7527_v10 = vsel %vm8677_vm0, %v3249_v26, %v3250_v20  ;;  %vm8697_vm5 = vmmov %vm8677_vm0 }
 0x6a9   : > { %3431 = vrot.lane.b32.xlu1 %v3315_v24, %s8413_s0 }
 0x6aa   : > { %v3251_v42 = vrot.slane %v3205_v49, 7  ;;  %v3299_v11 = vrot.slane %v3205_v49, 1  ;;  %3369 = vrot.lane.b32.xlu0 %v3200_v50, %s8409_s2 }
 0x6ab   : > { %v3209_v47 = vpop.f32.mrb[34].mxu0 }
 0x6ac   : > { %v3210_v25 = vadd.f32 %v7448_v5, %v3209_v47  ;;  %v3211_v59 = vpop.f32.mrb[35].mxu0  ;;  %v3314_v33 = vsel %vm8687_vm14, %v3298_v2, %v3299_v11  ;;  %v7536_v32 = vsel %vm8688_vm8, %v3250_v20, %v3251_v42 }
 0x6ad   : > { %3371 = vrot.lane.b32.xlu1 %v3205_v49, %s8409_s2  ;;  %v3330_v43 = vsel %vm5547_vm15, %v3314_v33, 0.0  ;;  %vm8691_vm15 = vmmov %vm8682_vm2 }
 0x6ae   : > { %v3252_v19 = vrot.slane %v3210_v25, 7  ;;  %v3300_v44 = vrot.slane %v3210_v25, 1  ;;  %3433 = vrot.lane.b32.xlu0 %v3330_v43, %s8413_s0 }
 0x6af   : > { %v3214_v53 = vpop.f32.mrb[36].mxu0 }
 0x6b0   : > { %v3215_v61 = vadd.f32 %v7448_v5, %v3214_v53  ;;  %v3216_v18 = vpop.f32.mrb[37].mxu0  ;;  %v3313_v48 = vsel %vm8689_vm9, %v3299_v11, %v3300_v44  ;;  %v7547_v1 = vsel %vm8690_vm10, %v3251_v42, %v3252_v19  ;;  %vm8701_vm9 = vmmov %vm8677_vm0 }
 0x6b1   : > { %3435 = vrot.lane.b32.xlu1 %v3313_v48, %s8413_s0  ;;  %vm8702_vm10 = vmmov %vm8677_vm0 }
 0x6b2   : > { %v3253_v38 = vrot.slane %v3215_v61, 7  ;;  %v3301_v34 = vrot.slane %v3215_v61, 1  ;;  %3373 = vrot.lane.b32.xlu0 %v3210_v25, %s8409_s2 }
 0x6b3   : > { %v3219_v62 = vpop.f32.mrb[38].mxu0 }
 0x6b4   : > { %v3220_v63 = vadd.f32 %v7448_v5, %v3219_v62  ;;  %v3221_v14 = vpop.f32.mrb[39].mxu0  ;;  %v3312_v45 = vsel %vm8691_vm15, %v3300_v44, %v3301_v34  ;;  %v7556_v54 = vsel %vm8692_vm3, %v3252_v19, %v3253_v38  ;;  %vm8705_vm15 = vcmask 261120  }
 0x6b5   : > { %3375 = vrot.lane.b32.xlu1 %v3215_v61, %s8409_s2  ;;  %v3332_v36 = vsel %vm8544_vm1, %v3312_v45, 0.0  ;;  %vm8694_vm1 = vmmov %vm8682_vm2  ;;  %vm8706_vm3 = vcmask 523264  }
 0x6b6   : > { %v3254_v0 = vrot.slane %v3220_v63, 7  ;;  %v3302_v30 = vrot.slane %v3220_v63, 1  ;;  %3437 = vrot.lane.b32.xlu0 %v3332_v36, %s8413_s0  ;;  %vm8696_vm12 = vmmov %vm8694_vm1 }
 0x6b7   : > { %v3224_v40 = vpop.f32.mrb[40].mxu0  ;;  %vm8699_vm14 = vmmov %vm8694_vm1 }
 0x6b8   : > { %v3225_v52 = vadd.f32 %v7448_v5, %v3224_v40  ;;  %v3226_v51 = vpop.f32.mrb[41].mxu0  ;;  %v3311_v29 = vsel %vm8682_vm2, %v3301_v34, %v3302_v30  ;;  %v7567_v21 = vsel %vm8693_vm7, %v3253_v38, %v3254_v0  ;;  %vm8700_vm8 = vmmov %vm8694_vm1  ;;  %vm8707_vm2 = vcmask 785408  }
 0x6b9   : > { %3439 = vrot.lane.b32.xlu1 %v3311_v29, %s8413_s0  ;;  %vm8708_vm7 = vmmov %vm8705_vm15 }
 0x6ba   : > { %v3255_v12 = vrot.slane %v3225_v52, 7  ;;  %v3303_v57 = vrot.slane %v3225_v52, 1  ;;  %3377 = vrot.lane.b32.xlu0 %v3220_v63, %s8409_s2 }
 0x6bb   : > { %v3229_v16 = vpop.f32.mrb[42].mxu0 }
 0x6bc   : > { %v3230_v26 = vadd.f32 %v7448_v5, %v3229_v16  ;;  %v3231_v22 = vpop.f32.mrb[43].mxu0  ;;  %v3310_v27 = vsel %vm8694_vm1, %v3302_v30, %v3303_v57  ;;  %v7576_v50 = vsel %vm8695_vm11, %v3254_v0, %v3255_v12  ;;  %vm8711_vm11 = vmmov %vm8707_vm2 }
 0x6bd   : > { %3379 = vrot.lane.b32.xlu1 %v3225_v52, %s8409_s2  ;;  %v3334_v37 = vsel %vm8555_vm6, %v3310_v27, 0.0  ;;  %vm8698_vm6 = vmmov %vm8694_vm1  ;;  %vm8710_vm1 = vnez %v8451_v7 }
 0x6be   : > { %v3256_v8 = vrot.slane %v3230_v26, 7  ;;  %v3304_v6 = vrot.slane %v3230_v26, 1  ;;  %3441 = vrot.lane.b32.xlu0 %v3334_v37, %s8413_s0  ;;  %v3277_v45 = vsel %vm8710_vm1, %v7476_v4, 0.0 }
 0x6bf   : > { %v3234_v20 = vpop.f32.mrb[44].mxu0 }
 0x6c0   : > { %v3235_v2 = vadd.f32 %v7448_v5, %v3234_v20  ;;  %v3236_v46 = vpop.f32.mrb[45].mxu0  ;;  %v3309_v49 = vsel %vm8696_vm12, %v3303_v57, %v3304_v6  ;;  %v7587_v13 = vsel %vm8697_vm5, %v3255_v12, %v3256_v8  ;;  %vm8712_vm12 = vmmov %vm8708_vm7 }
 0x6c1   : > { %3443 = vrot.lane.b32.xlu1 %v3309_v49, %s8413_s0  ;;  %vm8713_vm5 = vmmov %vm8706_vm3 }
 0x6c2   : > { %v3257_v24 = vrot.slane %v3235_v2, 7  ;;  %v3305_v23 = vrot.slane %v3235_v2, 1  ;;  %3381 = vrot.lane.b32.xlu0 %v3230_v26, %s8409_s2 }
 0x6c3   : > { %v3239_v42 = vpop.f32.mrb[46].mxu0 }
 0x6c4   : > { %v3240_v11 = vadd.f32 %v7448_v5, %v3239_v42  ;;  %v3241_v47 = vpop.f32.mrb[47].mxu0  ;;  %v3308_v25 = vsel %vm8698_vm6, %v3304_v6, %v3305_v23  ;;  %v7596_v59 = vsel %vm8677_vm0, %v3256_v8, %v3257_v24  ;;  %vm8714_vm6 = vmmov %vm8707_vm2 }
 0x6c5   : > { %3383 = vrot.lane.b32.xlu1 %v3235_v2, %s8409_s2  ;;  %v3336_v33 = vsel %vm8568_vm13, %v3308_v25, 0.0  ;;  %vm8715_vm0 = vmmov %vm8708_vm7 }
 0x6c6   : > { %v3258_v43 = vrot.slane %v3240_v11, 7  ;;  %v3306_v19 = vrot.slane %v3240_v11, 1  ;;  %3445 = vrot.lane.b32.xlu0 %v3336_v33, %s8413_s0  ;;  %vm8726_vm1 = vmmov %vm8715_vm0  ;;  %v8739_v33 = vld [vmem:[#allocation19_spill] sm:$0xff] }
 0x6c8   : > { %v3307_v5 = vsel %vm8699_vm14, %v3305_v23, %v3306_v19  ;;  %v3322_v44 = vsel %vm8700_vm8, %v3306_v19, %v3291_v35  ;;  %v3274_v53 = vsel %vm8701_vm9, %v3258_v43, %v3243_v15  ;;  %v7614_v39 = vsel %vm8702_vm10, %v3257_v24, %v3258_v43  ;;  %v8703_v35 = vld [vmem:[#allocation24_spill] sm:$0xff]  ;;  %vm8716_vm14 = vmmov %vm8706_vm3 }
 0x6c9   : > { %3447 = vrot.lane.b32.xlu1 %v3307_v5, %s8413_s0  ;;  %v3338_v61 = vsel %vm8587_vm4, %v3322_v44, 0.0  ;;  %vm8704_vm13 = vnez %v8703_v35  ;;  %vm8709_vm4 = vmmov %vm8706_vm3  ;;  %vm8717_vm8 = vnez %v8459_v55  ;;  %v8747_v35 = vld [vmem:[#allocation23_spill] sm:$0xff] }
 0x6ca   : > { %3385 = vrot.lane.b32.xlu0 %v3240_v11, %s8409_s2  ;;  %v3275_v41 = vsel %vm8704_vm13, %v3274_v53, 0.0  ;;  %v3279_v7 = vsel %vm8717_vm8, %v7497_v28, 0.0  ;;  %vm8718_vm9 = vmmov %vm8707_vm2 }
 0x6cb   : > { %vm8719_vm10 = vmmov %vm8715_vm0 }
 0x6cc   : > { %vm8720_vm13 = vmmov %vm8706_vm3 }
 0x6cd   : > { %vm8734_vm8 = vmmov %vm8726_vm1 }
 0x6ce   : > { %3449 = vrot.lane.b32.xlu0 %v3338_v61, %s8413_s0 }
 0x6fa   : > { %v3356_v18 = vpop.permute.xlu1 %3355 }
 0x6fb   : > { %v3467_v48 = vsel %vm8705_vm15, %v3275_v41, %v3356_v18  ;;  %vm8721_vm15 = vmmov %vm8707_vm2 }
 0x6fe   : > { %v3358_v38 = vpop.permute.xlu0 %3357 }
 0x6ff   : > { %v3468_v63 = vsel %vm8708_vm7, %v7468_v31, %v3358_v38  ;;  %vm8724_vm7 = vnez %v8464_v3  ;;  %v8731_v3 = vld [vmem:[#allocation18_spill] sm:$0xff] }
 0x700   : > { %v3281_v55 = vsel %vm8724_vm7, %v7516_v9, 0.0  ;;  %vm8742_vm7 = vmmov %vm8726_vm1 }
 0x701   : > { %v3420_v15 = vpop.permute.xlu1 %3419 }
 0x702   : > { %v3483_v34 = vsel %vm8706_vm3, %v3467_v48, %v3420_v15  ;;  %vm8722_vm3 = vmmov %vm8715_vm0 }
 0x703   : > { %4538 = vmatprep.mubr.msk.f32.mxu1 %vm8707_vm2, %v3483_v34  ;;  %vm8723_vm2 = vmmov %vm8709_vm4 }
 0x705   : > { %v3360_v62 = vpop.permute.xlu1 %3359 }
 0x706   : > { %v3422_v58 = vpop.permute.xlu0 %3421  ;;  %v3469_v36 = vsel %vm8712_vm12, %v3277_v45, %v3360_v62 }
 0x707   : > { %v3484_v14 = vsel %vm8709_vm4, %v3468_v63, %v3422_v58  ;;  %vm8725_vm4 = vmmov %vm8714_vm6  ;;  %v8755_v58 = vld [vmem:[#allocation27_spill] sm:$0xff] }
 0x708   : > { %4539 = vmatmul.mubr.msk.f32.vlgmr.msra.gmra.mrb[48].mxu1 %vm8711_vm11, %v3484_v14  ;;  %vm8727_vm11 = vmmov %vm8723_vm2 }
 0x709   : > { %v3424_v0 = vpop.permute.xlu1 %3423  ;;  %vm8728_vm12 = vmmov %vm8725_vm4 }
 0x70a   : > { %v3485_v30 = vsel %vm8713_vm5, %v3469_v36, %v3424_v0  ;;  %v3362_v40 = vpop.permute.xlu0 %3361  ;;  %vm8729_vm5 = vmmov %vm8715_vm0 }
 0x70b   : > { %4541 = vmatprep.mubr.msk.f32.mxu1 %vm8714_vm6, %v3485_v30  ;;  %v3470_v31 = vsel %vm8715_vm0, %v7486_v17, %v3362_v40  ;;  %vm8730_vm6 = vmmov %vm8723_vm2  ;;  %vm8732_vm0 = vnez %v8731_v3 }
 0x70c   : > { %v3283_v9 = vsel %vm8732_vm0, %v7536_v32, 0.0  ;;  %vm8750_vm0 = vmmov %vm8742_vm7 }
 0x70d   : > { %v3364_v52 = vpop.permute.xlu1 %3363 }
 0x70e   : > { %v3471_v4 = vsel %vm8719_vm10, %v3279_v7, %v3364_v52  ;;  %vm8736_vm10 = vmmov %vm8725_vm4 }
 0x710   : > { %v3426_v51 = vpop.permute.xlu0 %3425 }
 0x711   : > { %v3486_v29 = vsel %vm8716_vm14, %v3470_v31, %v3426_v51  ;;  %vm8733_vm14 = vmmov %vm8725_vm4 }
 0x712   : > { %4542 = vmatmul.mubr.msk.f32.gmra.mrb[50].mxu1 %vm8718_vm9, %v3486_v29  ;;  %vm8735_vm9 = vmmov %vm8723_vm2 }
 0x713   : > { %v3428_v12 = vpop.permute.xlu1 %3427 }
 0x714   : > { %v3487_v57 = vsel %vm8720_vm13, %v3471_v4, %v3428_v12  ;;  %v3366_v16 = vpop.permute.xlu0 %3365  ;;  %vm8737_vm13 = vmmov %vm8726_vm1 }
 0x715   : > { %4544 = vmatprep.mubr.msk.f32.mxu1 %vm8721_vm15, %v3487_v57  ;;  %v3472_v17 = vsel %vm8722_vm3, %v7507_v56, %v3366_v16  ;;  %vm8738_vm15 = vmmov %vm8723_vm2  ;;  %vm8740_vm3 = vnez %v8739_v33 }
 0x716   : > { %v3285_v32 = vsel %vm8740_vm3, %v7556_v54, 0.0  ;;  %vm8758_vm3 = vmmov %vm8750_vm0 }
 0x717   : > { %v3368_v26 = vpop.permute.xlu1 %3367 }
 0x718   : > { %v3430_v22 = vpop.permute.xlu0 %3429  ;;  %v3473_v28 = vsel %vm8726_vm1, %v3281_v55, %v3368_v26 }
 0x719   : > { %v3488_v27 = vsel %vm8723_vm2, %v3472_v17, %v3430_v22  ;;  %vm8741_vm2 = vmmov %vm8725_vm4 }
 0x71a   : > { %4545 = vmatmul.mubr.msk.f32.gmra.mrb[52].mxu1 %vm8725_vm4, %v3488_v27  ;;  %vm8743_vm4 = vmmov %vm8730_vm6 }
 0x71b   : > { %v3432_v37 = vpop.permute.xlu1 %3431  ;;  %vm8744_vm1 = vmmov %vm8741_vm2 }
 0x71c   : > { %v3489_v8 = vsel %vm8727_vm11, %v3473_v28, %v3432_v37  ;;  %v3370_v6 = vpop.permute.xlu0 %3369  ;;  %vm8745_vm11 = vmmov %vm8729_vm5 }
 0x71d   : > { %4547 = vmatprep.mubr.msk.f32.mxu1 %vm8728_vm12, %v3489_v8  ;;  %v3474_v56 = vsel %vm8729_vm5, %v7527_v10, %v3370_v6  ;;  %vm8746_vm12 = vmmov %vm8743_vm4  ;;  %vm8748_vm5 = vnez %v8747_v35 }
 0x71e   : > { %v3287_v54 = vsel %vm8748_vm5, %v7576_v50, 0.0  ;;  %vm8765_vm5 = vmmov %vm8750_vm0 }
 0x71f   : > { %v3372_v20 = vpop.permute.xlu1 %3371 }
 0x720   : > { %v3434_v2 = vpop.permute.xlu0 %3433  ;;  %v3475_v49 = vsel %vm8734_vm8, %v3283_v9, %v3372_v20  ;;  %vm8752_vm8 = vmmov %vm8744_vm1 }
 0x721   : > { %v3490_v46 = vsel %vm8730_vm6, %v3474_v56, %v3434_v2  ;;  %vm8749_vm6 = vmmov %vm8744_vm1 }
 0x722   : > { %4548 = vmatmul.mubr.msk.f32.gmra.mrb[54].mxu1 %vm8733_vm14, %v3490_v46  ;;  %vm8751_vm14 = vmmov %vm8743_vm4 }
 0x723   : > { %v3436_v24 = vpop.permute.xlu1 %3435 }
 0x724   : > { %v3491_v23 = vsel %vm8735_vm9, %v3475_v49, %v3436_v24  ;;  %v3374_v42 = vpop.permute.xlu0 %3373  ;;  %vm8753_vm9 = vmmov %vm8750_vm0 }
 0x725   : > { %4550 = vmatprep.mubr.msk.f32.mxu1 %vm8736_vm10, %v3491_v23  ;;  %v3476_v10 = vsel %vm8737_vm13, %v7547_v1, %v3374_v42  ;;  %vm8754_vm10 = vmmov %vm8743_vm4  ;;  %vm8756_vm13 = vnez %v8755_v58 }
 0x726   : > { %v3289_v50 = vsel %vm8756_vm13, %v7596_v59, 0.0  ;;  %v7703_v59 = vld [vmem:[%s8044_s11] ss:$0 sm:$0xff]  ;;  %vm8771_vm13 = vmmov %vm8750_vm0 }
 0x727   : > { %v3376_v11 = vpop.permute.xlu1 %3375 }
 0x728   : > { %v3438_v47 = vpop.permute.xlu0 %3437  ;;  %v3477_v43 = vsel %vm8742_vm7, %v3285_v32, %v3376_v11  ;;  %vm8760_vm7 = vmmov %vm8744_vm1 }
 0x729   : > { %v3492_v25 = vsel %vm8738_vm15, %v3476_v10, %v3438_v47  ;;  %vm8757_vm15 = vmmov %vm8744_vm1 }
 0x72a   : > { %4551 = vmatmul.mubr.msk.f32.gmra.mrb[56].mxu1 %vm8741_vm2, %v3492_v25  ;;  %vm8759_vm2 = vmmov %vm8743_vm4 }
 0x72b   : > { %v3440_v19 = vpop.permute.xlu1 %3439 }
 0x72c   : > { %v3493_v5 = vsel %vm8743_vm4, %v3477_v43, %v3440_v19  ;;  %v3378_v44 = vpop.permute.xlu0 %3377  ;;  %vm8761_vm4 = vmmov %vm8750_vm0 }
 0x72d   : > { %4553 = vmatprep.mubr.msk.f32.mxu1 %vm8744_vm1, %v3493_v5  ;;  %v3478_v1 = vsel %vm8745_vm11, %v7567_v21, %v3378_v44  ;;  %vm8762_vm1 = vmmov %vm8759_vm2 }
 0x72e   : > { %vm8763_vm11 = vmmov %vm8749_vm6 }
 0x72f   : > { %v3380_v53 = vpop.permute.xlu1 %3379 }
 0x730   : > { %v3442_v61 = vpop.permute.xlu0 %3441  ;;  %v3479_v41 = vsel %vm8750_vm0, %v3287_v54, %v3380_v53 }
 0x731   : > { %v3494_v18 = vsel %vm8746_vm12, %v3478_v1, %v3442_v61  ;;  %vm8764_vm12 = vmmov %vm8750_vm0 }
 0x732   : > { %4554 = vmatmul.mubr.msk.f32.gmra.mrb[58].mxu1 %vm8749_vm6, %v3494_v18  ;;  %vm8766_vm6 = vmmov %vm8750_vm0 }
 0x733   : > { %v3444_v48 = vpop.permute.xlu1 %3443 }
 0x734   : > { %v3495_v15 = vsel %vm8751_vm14, %v3479_v41, %v3444_v48  ;;  %v3382_v38 = vpop.permute.xlu0 %3381  ;;  %vm8767_vm14 = vmmov %vm8750_vm0 }
 0x735   : > { %4556 = vmatprep.mubr.msk.f32.mxu1 %vm8752_vm8, %v3495_v15  ;;  %v3480_v21 = vsel %vm8753_vm9, %v7587_v13, %v3382_v38  ;;  %vm8768_vm8 = vmmov %vm8750_vm0 }
 0x736   : > { %vm8769_vm9 = vmmov %vm8750_vm0 }
 0x737   : > { %v3384_v34 = vpop.permute.xlu1 %3383 }
 0x738   : > { %v3446_v62 = vpop.permute.xlu0 %3445  ;;  %v3481_v14 = vsel %vm8758_vm3, %v3289_v50, %v3384_v34  ;;  %vm8773_vm3 = vmmov %vm8750_vm0 }
 0x739   : > { %v3496_v63 = vsel %vm8754_vm10, %v3480_v21, %v3446_v62  ;;  %vm8770_vm10 = vmmov %vm8750_vm0 }
 0x73a   : > { %4557 = vmatmul.mubr.msk.f32.gmra.mrb[60].mxu1 %vm8757_vm15, %v3496_v63  ;;  %vm8772_vm15 = vmmov %vm8750_vm0 }
 0x73b   : > { %v3448_v45 = vpop.permute.xlu1 %3447 }
 0x73c   : > { %v3497_v36 = vsel %vm8759_vm2, %v3481_v14, %v3448_v45  ;;  %v3386_v0 = vpop.permute.xlu0 %3385  ;;  %vm8774_vm2 = vmmov %vm8750_vm0 }
 0x73d   : > { %4559 = vmatprep.mubr.msk.f32.mxu1 %vm8760_vm7, %v3497_v36  ;;  %v3482_v13 = vsel %vm8761_vm4, %v7614_v39, %v3386_v0  ;;  %vm8775_vm7 = vmmov %vm8750_vm0 }
 0x73e   : > { %vm8776_vm4 = vmmov %vm8750_vm0 }
 0x740   : > { %v3450_v30 = vpop.permute.xlu0 %3449 }
 0x741   : > { %v3498_v40 = vsel %vm8762_vm1, %v3482_v13, %v3450_v30  ;;  %vm8777_vm1 = vmmov %vm8750_vm0 }
 0x742   : > { %4560 = vmatmul.mubr.msk.f32.gmra.mrb[62].mxu1 %vm8763_vm11, %v3498_v40  ;;  %vm8778_vm11 = vmmov %vm8750_vm0 }
 0x7db   : > { %v4540_v52 = vpop.f32.mrb[48].mxu1 }
 0x7dc   : > { %v3638_v31 = vadd.f32 %v4540_v52, %v7703_v59  ;;  %v3632_v51 = vpop.f32.mrb[49].mxu1 }
 0x7dd   : > { %v3633_v29 = vadd.f32 %v7703_v59, %v3632_v51 }
 0x7de   : > { %v7707_v7 = vmax.f32 %v3638_v31, 0.0 }
 0x7df   : > { %v7709_v4 = vmax.f32 %v3633_v29, 0.0 }
 0x7e0   : > { %v3730_v39 = vsel %vm8764_vm12, %v7707_v7, 0.0  ;;  %v3792_v16 = vmul.f32 %v7707_v7, %v7707_v7  ;;  %vm8779_vm12 = vmmov %vm8750_vm0 }
 0x7e1   : > { %3731 = vadd.xlane.f32.xlu0 %v3730_v39  ;;  %v3727_v12 = vsel %vm8765_vm5, %v7709_v4, 0.0  ;;  %v3791_v57 = vmul.f32 %v7709_v4, %v7709_v4  ;;  %vm8780_vm5 = vmmov %vm8750_vm0 }
 0x7e2   : > { %3728 = vadd.xlane.f32.xlu1 %v3727_v12  ;;  %v3810_v17 = vsel %vm8750_vm0, %v3792_v16, 0.0 }
 0x7e3   : > { %v3807_v26 = vsel %vm8766_vm6, %v3791_v57, 0.0  ;;  %vm8781_vm6 = vmmov %vm8750_vm0 }
 0x7e5   : > { %3808 = vadd.xlane.f32.xlu0 %v3807_v26  ;;  %v4543_v22 = vpop.f32.mrb[50].mxu1 }
 0x7e6   : > { %3811 = vadd.xlane.f32.xlu1 %v3810_v17  ;;  %v3648_v27 = vadd.f32 %v4543_v22, %v7703_v59  ;;  %v3642_v55 = vpop.f32.mrb[51].mxu1 }
 0x7e7   : > { %v3643_v28 = vadd.f32 %v7703_v59, %v3642_v55 }
 0x7e8   : > { %v7723_v37 = vmax.f32 %v3648_v27, 0.0 }
 0x7e9   : > { %v7725_v8 = vmax.f32 %v3643_v28, 0.0 }
 0x7ea   : > { %v3736_v6 = vsel %vm8767_vm14, %v7723_v37, 0.0  ;;  %v3794_v20 = vmul.f32 %v7723_v37, %v7723_v37  ;;  %vm8782_vm14 = vmmov %vm8750_vm0 }
 0x7eb   : > { %v3733_v56 = vsel %vm8768_vm8, %v7725_v8, 0.0  ;;  %3737 = vadd.xlane.f32.xlu1 %v3736_v6  ;;  %v3793_v2 = vmul.f32 %v7725_v8, %v7725_v8  ;;  %vm8783_vm8 = vmmov %vm8750_vm0 }
 0x7ec   : > { %3734 = vadd.xlane.f32.xlu0 %v3733_v56  ;;  %v3816_v49 = vsel %vm8769_vm9, %v3794_v20, 0.0  ;;  %vm8784_vm9 = vmmov %vm8750_vm0 }
 0x7ed   : > { %v4546_v46 = vpop.f32.mrb[52].mxu1  ;;  %v3813_v23 = vsel %vm8770_vm10, %v3793_v2, 0.0  ;;  %vm8785_vm10 = vmmov %vm8750_vm0 }
 0x7ee   : > { %v3658_v3 = vadd.f32 %v4546_v46, %v7703_v59  ;;  %v3652_v9 = vpop.f32.mrb[53].mxu1 }
 0x7ef   : > { %v3653_v24 = vadd.f32 %v7703_v59, %v3652_v9  ;;  %3817 = vadd.xlane.f32.xlu1 %v3816_v49 }
 0x7f0   : > { %v7739_v42 = vmax.f32 %v3658_v3, 0.0  ;;  %3814 = vadd.xlane.f32.xlu0 %v3813_v23 }
 0x7f1   : > { %v7741_v11 = vmax.f32 %v3653_v24, 0.0 }
 0x7f2   : > { %v3742_v10 = vsel %vm8771_vm13, %v7739_v42, 0.0  ;;  %v3796_v47 = vmul.f32 %v7739_v42, %v7739_v42  ;;  %vm8786_vm13 = vmmov %vm8750_vm0 }
 0x7f3   : > { %v3739_v25 = vsel %vm8772_vm15, %v7741_v11, 0.0  ;;  %3743 = vadd.xlane.f32.xlu1 %v3742_v10  ;;  %v3795_v33 = vmul.f32 %v7741_v11, %v7741_v11  ;;  %vm8787_vm15 = vmmov %vm8750_vm0 }
 0x7f4   : > { %3740 = vadd.xlane.f32.xlu0 %v3739_v25  ;;  %v3822_v5 = vsel %vm8773_vm3, %v3796_v47, 0.0  ;;  %vm8788_vm3 = vmmov %vm8750_vm0 }
 0x7f5   : > { %v4549_v32 = vpop.f32.mrb[54].mxu1  ;;  %v3819_v53 = vsel %vm8774_vm2, %v3795_v33, 0.0  ;;  %vm8789_vm2 = vmmov %vm8750_vm0 }
 0x7f6   : > { %v3668_v43 = vadd.f32 %v4549_v32, %v7703_v59  ;;  %v3662_v19 = vpop.f32.mrb[55].mxu1 }
 0x7f7   : > { %v3663_v44 = vadd.f32 %v7703_v59, %v3662_v19  ;;  %3823 = vadd.xlane.f32.xlu1 %v3822_v5 }
 0x7f8   : > { %v7755_v1 = vmax.f32 %v3668_v43, 0.0  ;;  %3820 = vadd.xlane.f32.xlu0 %v3819_v53  ;;  %v4014_v53 = vld [vmem:[#allocation2] sm:$0x1] }
 0x7f9   : > { %v7757_v61 = vmax.f32 %v3663_v44, 0.0 }
 0x7fa   : > { %v3748_v18 = vsel %vm8775_vm7, %v7755_v1, 0.0  ;;  %v3798_v35 = vmul.f32 %v7755_v1, %v7755_v1  ;;  %vm8790_vm7 = vmmov %vm8750_vm0 }
 0x7fb   : > { %v3745_v54 = vsel %vm8776_vm4, %v7757_v61, 0.0  ;;  %3749 = vadd.xlane.f32.xlu1 %v3748_v18  ;;  %v3797_v41 = vmul.f32 %v7757_v61, %v7757_v61  ;;  %vm8791_vm4 = vmmov %vm8750_vm0  ;;  %v8794_v18 = vmov 0.0  }
 0x7fc   : > { %3746 = vadd.xlane.f32.xlu0 %v3745_v54  ;;  %v3828_v34 = vsel %vm8777_vm1, %v3798_v35, 0.0  ;;  %vm8792_vm1 = vmmov %vm8750_vm0 }
 0x7fd   : > { %v4552_v48 = vpop.f32.mrb[56].mxu1  ;;  %v3825_v62 = vsel %vm8778_vm11, %v3797_v41, 0.0  ;;  %vm8793_vm11 = vmmov %vm8750_vm0 }
 0x7fe   : > { %v3678_v15 = vadd.f32 %v4552_v48, %v7703_v59  ;;  %v3672_v38 = vpop.f32.mrb[57].mxu1 }
 0x7ff   : > { %v3673_v21 = vadd.f32 %v7703_v59, %v3672_v38  ;;  %3829 = vadd.xlane.f32.xlu1 %v3828_v34 }
 0x800   : > { %v7771_v63 = vmax.f32 %v3678_v15, 0.0  ;;  %3826 = vadd.xlane.f32.xlu0 %v3825_v62 }
 0x801   : > { %v7773_v58 = vmax.f32 %v3673_v21, 0.0 }
 0x802   : > { %v3754_v50 = vsel %vm8779_vm12, %v7771_v63, 0.0  ;;  %v3800_v14 = vmul.f32 %v7771_v63, %v7771_v63  ;;  %vm5132_vm12 = vmmov 0  }
 0x803   : > { %v3751_v45 = vsel %vm8780_vm5, %v7773_v58, 0.0  ;;  %3755 = vadd.xlane.f32.xlu1 %v3754_v50  ;;  %v3799_v36 = vmul.f32 %v7773_v58, %v7773_v58  ;;  %4594 = vmatprep.mubr.msk.f32.mxu0 %vm5132_vm12, %v8794_v18  ;;  %vm8795_vm5 = vmmov %vm8750_vm0 }
 0x804   : > { %3752 = vadd.xlane.f32.xlu0 %v3751_v45  ;;  %v3834_v40 = vsel %vm8781_vm6, %v3800_v14, 0.0  ;;  %vm7870_vm6 = vmpackc.low %vm8795_vm5, %vm8795_vm5 }
 0x805   : > { %v4555_v0 = vpop.f32.mrb[58].mxu1  ;;  %v3831_v31 = vsel %vm8750_vm0, %v3799_v36, 0.0 }
 0x806   : > { %v3688_v13 = vadd.f32 %v4555_v0, %v7703_v59  ;;  %v3682_v30 = vpop.f32.mrb[59].mxu1 }
 0x807   : > { %v3683_v52 = vadd.f32 %v7703_v59, %v3682_v30  ;;  %3835 = vadd.xlane.f32.xlu1 %v3834_v40 }
 0x808   : > { %v7787_v51 = vmax.f32 %v3688_v13, 0.0  ;;  %3832 = vadd.xlane.f32.xlu0 %v3831_v31 }
 0x809   : > { %v7789_v29 = vmax.f32 %v3683_v52, 0.0 }
 0x80a   : > { %v3760_v39 = vsel %vm8782_vm14, %v7787_v51, 0.0  ;;  %v3802_v12 = vmul.f32 %v7787_v51, %v7787_v51 }
 0x80b   : > { %v3757_v57 = vsel %vm8783_vm8, %v7789_v29, 0.0  ;;  %3761 = vadd.xlane.f32.xlu1 %v3760_v39  ;;  %v3801_v16 = vmul.f32 %v7789_v29, %v7789_v29 }
 0x80c   : > { %3758 = vadd.xlane.f32.xlu0 %v3757_v57  ;;  %v3840_v27 = vsel %vm8784_vm9, %v3802_v12, 0.0 }
 0x80d   : > { %v4558_v26 = vpop.f32.mrb[60].mxu1  ;;  %v3837_v28 = vsel %vm8785_vm10, %v3801_v16, 0.0 }
 0x80e   : > { %v3698_v17 = vadd.f32 %v4558_v26, %v7703_v59  ;;  %v3692_v22 = vpop.f32.mrb[61].mxu1 }
 0x80f   : > { %v3693_v55 = vadd.f32 %v7703_v59, %v3692_v22  ;;  %3841 = vadd.xlane.f32.xlu1 %v3840_v27  ;;  %v7845_v22 = vld [vmem:[%s8045_s12] ss:$0 sm:$0xff] }
 0x810   : > { %v7803_v6 = vmax.f32 %v3698_v17, 0.0  ;;  %3838 = vadd.xlane.f32.xlu0 %v3837_v28 }
 0x811   : > { %v7805_v20 = vmax.f32 %v3693_v55, 0.0 }
 0x812   : > { %v3766_v56 = vsel %vm8786_vm13, %v7803_v6, 0.0  ;;  %v3804_v2 = vmul.f32 %v7803_v6, %v7803_v6 }
 0x813   : > { %v3763_v46 = vsel %vm8787_vm15, %v7805_v20, 0.0  ;;  %3767 = vadd.xlane.f32.xlu1 %v3766_v56  ;;  %v3803_v3 = vmul.f32 %v7805_v20, %v7805_v20 }
 0x814   : > { %3764 = vadd.xlane.f32.xlu0 %v3763_v46  ;;  %v3846_v23 = vsel %vm8788_vm3, %v3804_v2, 0.0 }
 0x815   : > { %v4561_v9 = vpop.f32.mrb[62].mxu1  ;;  %v3843_v47 = vsel %vm8789_vm2, %v3803_v3, 0.0 }
 0x816   : > { %v3708_v49 = vadd.f32 %v4561_v9, %v7703_v59  ;;  %v3702_v24 = vpop.f32.mrb[63].mxu1 }
 0x817   : > { %v3703_v10 = vadd.f32 %v7703_v59, %v3702_v24  ;;  %3847 = vadd.xlane.f32.xlu1 %v3846_v23 }
 0x818   : > { %v7819_v25 = vmax.f32 %v3708_v49, 0.0  ;;  %3844 = vadd.xlane.f32.xlu0 %v3843_v47 }
 0x819   : > { %v7821_v33 = vmax.f32 %v3703_v10, 0.0 }
 0x81a   : > { %v3772_v32 = vsel %vm8790_vm7, %v7819_v25, 0.0  ;;  %v3806_v43 = vmul.f32 %v7819_v25, %v7819_v25 }
 0x81b   : > { %v3769_v19 = vsel %vm8791_vm4, %v7821_v33, 0.0  ;;  %3773 = vadd.xlane.f32.xlu1 %v3772_v32  ;;  %v3805_v59 = vmul.f32 %v7821_v33, %v7821_v33 }
 0x81c   : > { %3770 = vadd.xlane.f32.xlu0 %v3769_v19  ;;  %v3852_v5 = vsel %vm8792_vm1, %v3806_v43, 0.0  ;;  %v7858_v43 = vld [vmem:[%s8046_s13] ss:$0 sm:$0xff] }
 0x81d   : > { %v3849_v44 = vsel %vm8793_vm11, %v3805_v59, 0.0 }
 0x81f   : > { %3853 = vadd.xlane.f32.xlu1 %v3852_v5 }
 0x820   : > { %3850 = vadd.xlane.f32.xlu0 %v3849_v44 }
 0x836   : > { %4017 = vperm.xlu0 %4790, %v4014_v53  }
 0x86e   : > { %v3732_v35 = vpop.xlane.xlu0 %3731 }
 0x86f   : > { %v3729_v54 = vpop.xlane.xlu1 %3728  ;;  %v3776_v41 = vmul.f32 0.03125, %v3732_v35 }
 0x870   : > { %v3775_v48 = vmul.f32 0.03125, %v3729_v54 }
 0x871   : > { %v3872_v62 = vmul.f32 %v3776_v41, %v3776_v41  ;;  %v3936_v10 = vsub.f32 %v7707_v7, %v3776_v41 }
 0x872   : > { %v3871_v15 = vmul.f32 %v3775_v48, %v3775_v48  ;;  %v3809_v38 = vpop.xlane.xlu0 %3808  ;;  %v3935_v24 = vsub.f32 %v7709_v4, %v3775_v48 }
 0x873   : > { %v3855_v34 = vmul.f32 0.03125, %v3809_v38  ;;  %v3812_v21 = vpop.xlane.xlu1 %3811 }
 0x874   : > { %v3856_v50 = vmul.f32 0.03125, %v3812_v21 }
 0x875   : > { %v3887_v14 = vsub.f32 %v3855_v34, %v3871_v15 }
 0x876   : > { %v3888_v45 = vsub.f32 %v3856_v50, %v3872_v62 }
 0x877   : > { %v3903_v36 = vadd.f32 1e-05, %v3887_v14 }
 0x878   : > { %v3904_v0 = vadd.f32 1e-05, %v3888_v45  ;;  %v3738_v13 = vpop.xlane.xlu1 %3737 }
 0x879   : > { %5029 = vrsqrt.f32 %v3903_v36  ;;  %v3735_v30 = vpop.xlane.xlu0 %3734  ;;  %v7834_v40 = vmul.f32 0.03125, %v3738_v13 }
 0x87a   : > { %5031 = vrsqrt.f32 %v3904_v0  ;;  %v7836_v52 = vmul.f32 0.03125, %v3735_v30 }
 0x87b   : > { %v3874_v39 = vmul.f32 %v7834_v40, %v7834_v40 }
 0x87c   : > { %v3818_v31 = vpop.xlane.xlu1 %3817  ;;  %v3873_v16 = vmul.f32 %v7836_v52, %v7836_v52 }
 0x87d   : > { %v3815_v12 = vpop.xlane.xlu0 %3814  ;;  %v3858_v57 = vmul.f32 0.03125, %v3818_v31  ;;  %v8798_v31 = vmov 0.0|0.0  }
 0x87e   : > { %v3857_v26 = vmul.f32 0.03125, %v3815_v12  ;;  %v3938_v12 = vsub.f32 %v7723_v37, %v7834_v40 }
 0x87f   : > { %v3890_v17 = vsub.f32 %v3858_v57, %v3874_v39 }
 0x880   : > { %v3889_v27 = vsub.f32 %v3857_v26, %v3873_v16  ;;  %v3744_v55 = vpop.xlane.xlu1 %3743 }
 0x881   : > { %v3906_v28 = vadd.f32 1e-05, %v3890_v17  ;;  %v3741_v56 = vpop.xlane.xlu0 %3740  ;;  %v7847_v2 = vmul.f32 0.03125, %v3744_v55  ;;  %v3937_v17 = vsub.f32 %v7725_v8, %v7836_v52 }
 0x882   : > { %v3905_v3 = vadd.f32 1e-05, %v3889_v27  ;;  %v7849_v9 = vmul.f32 0.03125, %v3741_v56 }
 0x883   : > { %v5030_v46 = vpop.eup %5029  ;;  %5033 = vrsqrt.f32 %v3906_v28  ;;  %v3876_v19 = vmul.f32 %v7847_v2, %v7847_v2 }
 0x884   : > { %v5032_v49 = vpop.eup %5031  ;;  %v3958_v23 = vmul.f32 %v5030_v46, %v7845_v22  ;;  %5035 = vrsqrt.f32 %v3905_v3  ;;  %v3824_v32 = vpop.xlane.xlu1 %3823  ;;  %v3875_v44 = vmul.f32 %v7849_v9, %v7849_v9 }
 0x885   : > { %v3959_v47 = vmul.f32 %v5032_v49, %v7845_v22  ;;  %v3821_v59 = vpop.xlane.xlu0 %3820  ;;  %v3860_v5 = vmul.f32 0.03125, %v3824_v32 }
 0x886   : > { %v3974_v4 = vmul.f32 %v3958_v23, %v3935_v24  ;;  %v3859_v53 = vmul.f32 0.03125, %v3821_v59 }
 0x887   : > { %v3975_v7 = vmul.f32 %v3959_v47, %v3936_v10  ;;  %v3892_v18 = vsub.f32 %v3860_v5, %v3876_v19 }
 0x888   : > { %v3997_v35 = vadd.f32 %v7858_v43, %v3974_v4  ;;  %v3891_v54 = vsub.f32 %v3859_v53, %v3875_v44  ;;  %v3750_v41 = vpop.xlane.xlu1 %3749  ;;  %v3940_v44 = vsub.f32 %v7739_v42, %v7847_v2 }
 0x889   : > { %v3998_v48 = vadd.f32 %v7858_v43, %v3975_v7  ;;  %v3908_v15 = vadd.f32 1e-05, %v3892_v18  ;;  %v3747_v38 = vpop.xlane.xlu0 %3746  ;;  %v7866_v34 = vmul.f32 0.03125, %v3750_v41 }
 0x88a   : > { %v3907_v62 = vadd.f32 1e-05, %v3891_v54  ;;  %v7874_v50 = vmul.f32 0.03125, %v3747_v38 }
 0x88b   : > { %v4712_v14 = vpack.c.bf16 %v3998_v48, %v3997_v35  ;;  %5037 = vrsqrt.f32 %v3908_v15  ;;  %v3878_v0 = vmul.f32 %v7866_v34, %v7866_v34  ;;  %v3939_v35 = vsub.f32 %v7741_v11, %v7849_v9 }
 0x88c   : > { %5039 = vrsqrt.f32 %v3907_v62  ;;  %v3830_v45 = vpop.xlane.xlu1 %3829  ;;  %v3877_v16 = vmul.f32 %v7874_v50, %v7874_v50 }
 0x88d   : > { %4714 = vmatpush3.bf16.xpose.msk.msra.mxu0 %vm7870_vm6, %v4712_v14  ;;  %v5034_v36 = vpop.eup %5033  ;;  %v3827_v13 = vpop.xlane.xlu0 %3826  ;;  %v3862_v30 = vmul.f32 0.03125, %v3830_v45 }
 0x88e   : > { %4715 = vmatprep.subr.bf16.mxu0 %v8798_v31  ;;  %v5036_v39 = vpop.eup %5035  ;;  %v3961_v57 = vmul.f32 %v5034_v36, %v7845_v22  ;;  %v3861_v26 = vmul.f32 0.03125, %v3827_v13 }
 0x88f   : > { %v3960_v27 = vmul.f32 %v5036_v39, %v7845_v22  ;;  %v3894_v55 = vsub.f32 %v3862_v30, %v3878_v0 }
 0x890   : > { %v3893_v28 = vsub.f32 %v3861_v26, %v3877_v16  ;;  %v3756_v56 = vpop.xlane.xlu1 %3755  ;;  %v3977_v46 = vmul.f32 %v3961_v57, %v3938_v12  ;;  %v3942_v26 = vsub.f32 %v7755_v1, %v7866_v34 }
 0x891   : > { %v3910_v3 = vadd.f32 1e-05, %v3894_v55  ;;  %v3753_v49 = vpop.xlane.xlu0 %3752  ;;  %v7889_v24 = vmul.f32 0.03125, %v3756_v56  ;;  %v3976_v37 = vmul.f32 %v3960_v27, %v3937_v17 }
 0x892   : > { %v3909_v40 = vadd.f32 1e-05, %v3893_v28  ;;  %v7891_v23 = vmul.f32 0.03125, %v3753_v49  ;;  %v4000_v10 = vadd.f32 %v7858_v43, %v3977_v46  ;;  %v3941_v28 = vsub.f32 %v7757_v61, %v7874_v50 }
 0x893   : > { %5041 = vrsqrt.f32 %v3910_v3  ;;  %v3999_v47 = vadd.f32 %v7858_v43, %v3976_v37  ;;  %v3880_v32 = vmul.f32 %v7889_v24, %v7889_v24 }
 0x894   : > { %5043 = vrsqrt.f32 %v3909_v40  ;;  %v3836_v8 = vpop.xlane.xlu1 %3835  ;;  %v3879_v7 = vmul.f32 %v7891_v23, %v7891_v23 }
 0x895   : > { %v5038_v52 = vpop.eup %5037  ;;  %v3833_v19 = vpop.xlane.xlu0 %3832  ;;  %v3864_v59 = vmul.f32 0.03125, %v3836_v8  ;;  %v4716_v5 = vpack.c.bf16 %v4000_v10, %v3999_v47 }
 0x896   : > { %v5040_v4 = vpop.eup %5039  ;;  %v3963_v53 = vmul.f32 %v5038_v52, %v7845_v22  ;;  %v3863_v18 = vmul.f32 0.03125, %v3833_v19 }
 0x897   : > { %v3962_v54 = vmul.f32 %v5040_v4, %v7845_v22  ;;  %v3896_v41 = vsub.f32 %v3864_v59, %v3880_v32  ;;  %4718 = vmatpush3.bf16.xpose.msk.msra.mxu0 %vm7870_vm6, %v4716_v5 }
 0x898   : > { %v3895_v48 = vsub.f32 %v3863_v18, %v3879_v7  ;;  %v3762_v15 = vpop.xlane.xlu1 %3761  ;;  %4719 = vmatprep.subr.bf16.mxu0 %v8798_v31  ;;  %v3979_v42 = vmul.f32 %v3963_v53, %v3940_v44  ;;  %v3944_v53 = vsub.f32 %v7771_v63, %v7889_v24 }
 0x899   : > { %v3912_v2 = vadd.f32 1e-05, %v3896_v41  ;;  %v3759_v38 = vpop.xlane.xlu0 %3758  ;;  %v7908_v62 = vmul.f32 0.03125, %v3762_v15  ;;  %v3978_v14 = vmul.f32 %v3962_v54, %v3939_v35  ;;  %v3943_v54 = vsub.f32 %v7773_v58, %v7891_v23 }
 0x89a   : > { %v3911_v45 = vadd.f32 1e-05, %v3895_v48  ;;  %v7910_v36 = vmul.f32 0.03125, %v3759_v38  ;;  %v4002_v11 = vadd.f32 %v7858_v43, %v3979_v42 }
 0x89b   : > { %5045 = vrsqrt.f32 %v3912_v2  ;;  %v4001_v9 = vadd.f32 %v7858_v43, %v3978_v14  ;;  %v3882_v30 = vmul.f32 %v7908_v62, %v7908_v62 }
 0x89c   : > { %5047 = vrsqrt.f32 %v3911_v45  ;;  %v3842_v0 = vpop.xlane.xlu1 %3841  ;;  %v3881_v27 = vmul.f32 %v7910_v36, %v7910_v36 }
 0x89d   : > { %v5042_v13 = vpop.eup %5041  ;;  %v3839_v39 = vpop.xlane.xlu0 %3838  ;;  %v3866_v12 = vmul.f32 0.03125, %v3842_v0  ;;  %v4720_v57 = vpack.c.bf16 %v4002_v11, %v4001_v9 }
 0x89e   : > { %v5044_v16 = vpop.eup %5043  ;;  %v3965_v17 = vmul.f32 %v5042_v13, %v7845_v22  ;;  %v3865_v55 = vmul.f32 0.03125, %v3839_v39 }
 0x89f   : > { %v3964_v56 = vmul.f32 %v5044_v16, %v7845_v22  ;;  %v3898_v46 = vsub.f32 %v3866_v12, %v3882_v30  ;;  %4722 = vmatpush3.bf16.xpose.msk.msra.mxu0 %vm7870_vm6, %v4720_v57  ;;  %v3946_v16 = vsub.f32 %v7787_v51, %v7908_v62 }
 0x8a0   : > { %v3897_v3 = vsub.f32 %v3865_v55, %v3881_v27  ;;  %v3768_v49 = vpop.xlane.xlu1 %3767  ;;  %4723 = vmatprep.subr.bf16.mxu0 %v8798_v31  ;;  %v3981_v1 = vmul.f32 %v3965_v17, %v3942_v26  ;;  %v3945_v55 = vsub.f32 %v7789_v29, %v7910_v36 }
 0x8a1   : > { %v3914_v34 = vadd.f32 1e-05, %v3898_v46  ;;  %v3765_v37 = vpop.xlane.xlu0 %3764  ;;  %v7927_v40 = vmul.f32 0.03125, %v3768_v49  ;;  %v3980_v10 = vmul.f32 %v3964_v56, %v3941_v28 }
 0x8a2   : > { %v3913_v47 = vadd.f32 1e-05, %v3897_v3  ;;  %v7929_v8 = vmul.f32 0.03125, %v3765_v37  ;;  %v4004_v61 = vadd.f32 %v7858_v43, %v3981_v1 }
 0x8a3   : > { %5049 = vrsqrt.f32 %v3914_v34  ;;  %v4003_v50 = vadd.f32 %v7858_v43, %v3980_v10  ;;  %v3884_v19 = vmul.f32 %v7927_v40, %v7927_v40  ;;  %v3948_v10 = vsub.f32 %v7803_v6, %v7927_v40 }
 0x8a4   : > { %5051 = vrsqrt.f32 %v3913_v47  ;;  %v3848_v52 = vpop.xlane.xlu1 %3847  ;;  %v3883_v18 = vmul.f32 %v7929_v8, %v7929_v8 }
 0x8a5   : > { %v5046_v32 = vpop.eup %5045  ;;  %v3845_v59 = vpop.xlane.xlu0 %3844  ;;  %v3868_v5 = vmul.f32 0.03125, %v3848_v52  ;;  %v4724_v4 = vpack.c.bf16 %v4004_v61, %v4003_v50  ;;  %v3947_v61 = vsub.f32 %v7805_v20, %v7929_v8 }
 0x8a6   : > { %v5048_v44 = vpop.eup %5047  ;;  %v3967_v7 = vmul.f32 %v5046_v32, %v7845_v22  ;;  %v3867_v35 = vmul.f32 0.03125, %v3845_v59 }
 0x8a7   : > { %v3966_v41 = vmul.f32 %v5048_v44, %v7845_v22  ;;  %v3900_v48 = vsub.f32 %v3868_v5, %v3884_v19  ;;  %4726 = vmatpush3.bf16.xpose.msk.msra.mxu0 %vm7870_vm6, %v4724_v4 }
 0x8a8   : > { %v3899_v15 = vsub.f32 %v3867_v35, %v3883_v18  ;;  %v3774_v42 = vpop.xlane.xlu1 %3773  ;;  %4727 = vmatprep.subr.bf16.mxu0 %v8798_v31  ;;  %v3983_v63 = vmul.f32 %v3967_v7, %v3944_v53 }
 0x8a9   : > { %v3916_v24 = vadd.f32 1e-05, %v3900_v48  ;;  %v3771_v2 = vpop.xlane.xlu0 %3770  ;;  %v3790_v38 = vmul.f32 0.03125, %v3774_v42  ;;  %v3982_v14 = vmul.f32 %v3966_v41, %v3943_v54 }
 0x8aa   : > { %v3915_v45 = vadd.f32 1e-05, %v3899_v15  ;;  %v3789_v11 = vmul.f32 0.03125, %v3771_v2  ;;  %v4006_v9 = vadd.f32 %v7858_v43, %v3983_v63 }
 0x8ab   : > { %5053 = vrsqrt.f32 %v3916_v24  ;;  %v4005_v58 = vadd.f32 %v7858_v43, %v3982_v14  ;;  %v3886_v13 = vmul.f32 %v3790_v38, %v3790_v38  ;;  %v3950_v4 = vsub.f32 %v7819_v25, %v3790_v38  ;;  %v4013_v25 = vld [vmem:[%s8047_s14] sm:$0x1] }
 0x8ac   : > { %5055 = vrsqrt.f32 %v3915_v45  ;;  %v3854_v23 = vpop.xlane.xlu1 %3853  ;;  %v3885_v17 = vmul.f32 %v3789_v11, %v3789_v11  ;;  %v3949_v8 = vsub.f32 %v7821_v33, %v3789_v11  ;;  %v4022_v33 = vsub.s32 0, %v5358_v60 }
 0x8ad   : > { %v5050_v0 = vpop.eup %5049  ;;  %v3851_v30 = vpop.xlane.xlu0 %3850  ;;  %v3870_v39 = vmul.f32 0.03125, %v3854_v23  ;;  %v4728_v12 = vpack.c.bf16 %v4006_v9, %v4005_v58 }
 0x8ae   : > { %v5052_v57 = vpop.eup %5051  ;;  %v3969_v26 = vmul.f32 %v5050_v0, %v7845_v22  ;;  %v3869_v27 = vmul.f32 0.03125, %v3851_v30 }
 0x8af   : > { %v3968_v28 = vmul.f32 %v5052_v57, %v7845_v22  ;;  %v3902_v56 = vsub.f32 %v3870_v39, %v3886_v13  ;;  %4730 = vmatpush3.bf16.xpose.msk.msra.mxu0 %vm7870_vm6, %v4728_v12 }
 0x8b0   : > { %v3901_v46 = vsub.f32 %v3869_v27, %v3885_v17  ;;  %4731 = vmatprep.subr.bf16.mxu0 %v8798_v31  ;;  %v3985_v3 = vmul.f32 %v3969_v26, %v3946_v16 }
 0x8b1   : > { %v3918_v49 = vadd.f32 1e-05, %v3902_v56  ;;  %v3984_v1 = vmul.f32 %v3968_v28, %v3945_v55 }
 0x8b2   : > { %v3917_v51 = vadd.f32 1e-05, %v3901_v46  ;;  %v4008_v62 = vadd.f32 %v7858_v43, %v3985_v3 }
 0x8b3   : > { %5057 = vrsqrt.f32 %v3918_v49  ;;  %v4007_v34 = vadd.f32 %v7858_v43, %v3984_v1 }
 0x8b4   : > { %5059 = vrsqrt.f32 %v3917_v51 }
 0x8b5   : > { %v5054_v29 = vpop.eup %5053  ;;  %v4732_v36 = vpack.c.bf16 %v4008_v62, %v4007_v34 }
 0x8b6   : > { %v5056_v37 = vpop.eup %5055  ;;  %v3971_v47 = vmul.f32 %v5054_v29, %v7845_v22 }
 0x8b7   : > { %v3970_v50 = vmul.f32 %v5056_v37, %v7845_v22  ;;  %4734 = vmatpush3.bf16.xpose.msk.msra.mxu0 %vm7870_vm6, %v4732_v36 }
 0x8b8   : > { %4735 = vmatprep.subr.bf16.mxu0 %v8798_v31  ;;  %v3987_v52 = vmul.f32 %v3971_v47, %v3948_v10 }
 0x8b9   : > { %v3986_v32 = vmul.f32 %v3970_v50, %v3947_v61 }
 0x8ba   : > { %v4010_v19 = vadd.f32 %v7858_v43, %v3987_v52 }
 0x8bb   : > { %v4009_v59 = vadd.f32 %v7858_v43, %v3986_v32 }
 0x8bd   : > { %v5058_v5 = vpop.eup %5057  ;;  %v4736_v6 = vpack.c.bf16 %v4010_v19, %v4009_v59 }
 0x8be   : > { %v5060_v40 = vpop.eup %5059  ;;  %v3973_v20 = vmul.f32 %v5058_v5, %v7845_v22 }
 0x8bf   : > { %v3972_v44 = vmul.f32 %v5060_v40, %v7845_v22  ;;  %4738 = vmatpush3.bf16.xpose.msk.msra.mxu0 %vm7870_vm6, %v4736_v6  ;;  %v4018_v22 = vpop.permute.xlu0 %4017 }
 0x8c0   : > { %v3989_v53 = vmul.f32 %v3973_v20, %v3950_v4  ;;  %4739 = vmatprep.subr.bf16.mxu0 %v8798_v31  ;;  %v4023_v31 = vrot.slane %v4018_v22, %v4022_v33 }
 0x8c1   : > { %v3988_v7 = vmul.f32 %v3972_v44, %v3949_v8 }
 0x8c2   : > { %v4012_v18 = vadd.f32 %v7858_v43, %v3989_v53 }
 0x8c3   : > { %v4011_v35 = vadd.f32 %v7858_v43, %v3988_v7 }
 0x8c5   : > { %v4740_v54 = vpack.c.bf16 %v4012_v18, %v4011_v35 }
 0x8c7   : > { %4742 = vmatpush3.bf16.xpose.msk.msra.mxu0 %vm7870_vm6, %v4740_v54 }
 0x8ce   : > { %4595 = vmatmul.mubr.msk.f32.vlgmr.msra.gmra.mrb[48].mxu0 %vm8750_vm0, %v4013_v25 }
 0x9a1   : > { %v4141_v43 = vpop.f32.mrb[48].mxu0 }
 0x9a2   : > { %v4142_v41 = vadd.f32 %v4141_v43, %v4023_v31  ;;  %v4596_v48 = vpop.f32.mrb[49].mxu0 }
 0x9a4   : > { %4145 = vst [vmem:[%s518_s22] sm:$0x1] %v4142_v41 }
 0x9a5   : > { %5074 = shalt.err (!%p5071_p3)
}
 0x9a6   : > { %s5075_s19 = scalar_lea.hbm %s7991_s4, 16  ;;  %s5079_s22 = scalar_lea.hbm %s8049_s16, 32 }
 0x9a7   : > { %p5076_p4 = scmp.ne.s32.totalorder %s7991_s4, %s5075_s19  ;;  %p5080_p9 = scmp.lt.u32.totalorder %s7991_s4, %s8049_s16 }
 0x9a8   : > { %p5081_p10 = scmp.lt.u32.totalorder %s5079_s22, %s5075_s19  ;;  %p5083_p12 = scmp.lt.u32.totalorder %s5075_s19, %s7991_s4 }
 0x9a9   : > { %p5077_p7 = pnand %p5076_p4, %p5260_p5 }
 0x9aa   : > { %p5082_p11 = por %p5081_p10, %p5080_p9 }
 0x9ab   : > { %p5078_p8 = pneg %p5077_p7 }
 0x9ac   : > { %p5084_p13 = por %p5083_p12, %p5082_p11 }
 0x9ae   : > { %p5085_p0 = pnand %p5084_p13, %p5078_p8 }
 0x9b0   : > { %5088 = shalt.err (!%p5085_p0)
}
 0x9b1   : > { %4743 = dma.vmem_to_hbm [thread:$0]  (%p5260_p5), %s7993_s29, 16, %s7991_s4, %s4147_s27  }
 0x9b2 PF: > { %p4749_p1 = scmp.ge.s32.totalorder %s5123_s26, 2  ;;  %s4171_s3 = sand.u32 1, %s5111_s23  }
 0x9b3   : > { %s4172_s15 = scalar_lea.sflag [#allocation4], %s4171_s3 }
 0x9b4   : > { %p4746_p2 = pnand %p4749_p1, %p5264_p6 }
 0x9b6   : > { %5106 = dma.done.wait (!%p4746_p2), %s4172_s15, 16  }
 0x9b7   : > { %5108 = vsyncadd (!%p4746_p2), %s4172_s15, 4294967280  ;;  %s8799_s30 = sld [smem:[#allocation6_spill]]  ;;  %p28_p3 = scmp.ge.s32.totalorder %s5247_s28, 4  }
 0x9b8   : > { %s8800_s23 = smov %s5115_s24  ;;  %s8801_s24 = smov %s5119_s25 }
 0x9b9   : > { %s8803_s26 = smov %s5247_s28  ;;  %30 = sbr.rel (!%p28_p3) target bundleno = 9 (0x9), region = 119 }
 0x9bd   : > { %s8802_s25 = smov %s8799_s30 }
 0x9c0   :  { %4176 = vsyncpa [#allocation4], 1 }
 0x9c1   :  { %4178 = vsyncpa [#allocation4 + $0x1], 1 }

</bundles_post_ra>
